<compile_context>
chip_gen: v7x
topology: tpu7x:2x2x1
jax: 0.10.0
libtpu: 0.0.40
codegen_flags: <defaults>
</compile_context>

<pallas_src>
import jax
import jax.numpy as jnp
from jax import lax
from jax.experimental import pallas as pl
from jax.experimental.pallas import tpu as pltpu

_EPS = 1e-5       # PyTorch InstanceNorm2d default
_LANES = 128      # TPU vreg lane width


def _round_up(n, m):
    return ((n + m - 1) // m) * m


def _vmem_limit_bytes():
    # v5e/v6e: 128 MiB physical VMEM; v7x: 64 MiB.  Query the chip and leave
    # headroom instead of hard-coding a low limit (perf review: 48 MiB OOM'd
    # around 96x96 even though v5e/v6e have room).
    cap = None
    try:
        cap = int(pltpu.get_tpu_info().vmem_capacity_bytes)
    except Exception:
        cap = None
    if not cap:
        cap = 64 * 1024 * 1024
    return min(100 * 1024 * 1024, cap - 8 * 1024 * 1024)


def _conv_in_act(x_hwc, w_ref, g_ref, b_ref, *, H, W, C, apply_relu):
    """reflect-pad(1) 3x3 conv (bias=False) -> InstanceNorm2d(affine)
    -> optional ReLU.

    x_hwc : (H, W, C) value (cast to bf16 here)
    w_ref : (3, 3*C, C) bf16 ref; w_ref[dh] is flattened over (dw, c_in)
    g_ref/b_ref : (1, C) f32 refs
    Returns (H*W, C) f32.
    """
    xb = x_hwc.astype(jnp.bfloat16)

    # Reflect-pad rows: concat along the majormost dim (cheap).
    xr = jnp.concatenate([xb[1:2], xb, xb[H - 2:H - 1]], axis=0)          # (H+2, W, C)

    # Build the 3 dw-shifted taps ONCE (column reflect-pad folded in) and
    # lane-concatenate them.  Only these sublane-shifted copies are
    # materialized (~3*H*W*C writes, vs 9x before); the dh shifts below are
    # free major-dim slices.
    left = jnp.concatenate([xr[:, 1:2], xr[:, :W - 1]], axis=1)           # dw = 0
    right = jnp.concatenate([xr[:, 1:W], xr[:, W - 2:W - 1]], axis=1)     # dw = 2
    pw = jnp.concatenate([left, xr, right], axis=-1)                      # (H+2, W, 3*C)

    # 3 accumulating MXU matmuls over kernel rows (K = 3*C each, f32 acc).
    # Deep-K form also keeps v5e's slower 128x128 MXU fed.
    acc = None
    for dh in range(3):
        blk = pw[dh:dh + H].reshape(H * W, 3 * C)                         # free dh slice
        part = jnp.dot(blk, w_ref[dh], preferred_element_type=jnp.float32)
        acc = part if acc is None else acc + part                         # (H*W, C) f32

    # InstanceNorm2d: centered two-pass variance (numerically robust; acc is
    # already VMEM-resident so the second traversal is cheap now that the
    # im2col copy no longer dominates).  Biased variance, like PyTorch.
    mean = jnp.mean(acc, axis=0, keepdims=True)                           # (1, C)
    cen = acc - mean
    var = jnp.mean(cen * cen, axis=0, keepdims=True)
    y = cen * lax.rsqrt(var + _EPS)                                       # EUP rsqrt

    # affine (gamma/beta); padded channels have gamma=beta=0 -> stay zero.
    y = y * g_ref[...] + b_ref[...]
    if apply_relu:
        y = jnp.maximum(y, 0.0)
    return y


def _make_resblock_kernel(H, W, C):
    def kernel(x_ref, w1_ref, g1_ref, b1_ref, w2_ref, g2_ref, b2_ref, out_ref):
        x = x_ref[0]                                                      # (H, W, C) bf16
        h = _conv_in_act(x, w1_ref, g1_ref, b1_ref,
                         H=H, W=W, C=C, apply_relu=True)                  # (H*W, C) f32
        h = h.astype(jnp.bfloat16).reshape(H, W, C)                       # conv2 eats bf16
        y = _conv_in_act(h, w2_ref, g2_ref, b2_ref,
                         H=H, W=W, C=C, apply_relu=False)                 # (H*W, C) f32
        res = x.reshape(H * W, C).astype(jnp.float32)
        out_ref[0] = (y + res).reshape(H, W, C)                           # residual add
    return kernel


def _pack_weight(w_hwio, C, Cp):
    # (3,3,C,C) HWIO -> zero-pad channels -> (3, 3*Cp, Cp) bf16; w[dh] is
    # flattened over (dw, c_in) to match the in-kernel dw lane-concat order.
    # (PyTorch OIHW weights convert via w.transpose(2, 3, 1, 0) -> HWIO.)
    w = jnp.pad(w_hwio.astype(jnp.float32),
                ((0, 0), (0, 0), (0, Cp - C), (0, Cp - C)))
    return w.reshape(3, 3 * Cp, Cp).astype(jnp.bfloat16)


def _pack_vec(v, C, Cp):
    return jnp.pad(v.astype(jnp.float32), (0, Cp - C)).reshape(1, Cp)


def res_block_nhwc(x_nhwc, params):
    """Fused ResBlock forward, NHWC in / NHWC out (TPU-native layout)."""
    N, H, W, C = x_nhwc.shape
    assert H >= 2 and W >= 2, "reflect pad(1) requires H >= 2 and W >= 2"
    Cp = _round_up(max(C, _LANES), _LANES)          # lane-dense channel count

    # bf16 activation I/O: conv consumes bf16 anyway; halves input DMA bytes.
    x = jnp.pad(x_nhwc.astype(jnp.bfloat16),
                ((0, 0), (0, 0), (0, 0), (0, Cp - C)))

    w1 = _pack_weight(params["w1"], C, Cp)
    w2 = _pack_weight(params["w2"], C, Cp)
    g1 = _pack_vec(params["g1"], C, Cp)
    b1 = _pack_vec(params["b1"], C, Cp)
    g2 = _pack_vec(params["g2"], C, Cp)
    b2 = _pack_vec(params["b2"], C, Cp)

    img_spec = pl.BlockSpec((1, H, W, Cp), lambda b: (b, 0, 0, 0))
    w_spec = pl.BlockSpec((3, 3 * Cp, Cp), lambda b: (0, 0, 0))
    v_spec = pl.BlockSpec((1, Cp), lambda b: (0, 0))

    out = pl.pallas_call(
        _make_resblock_kernel(H, W, Cp),
        out_shape=jax.ShapeDtypeStruct((N, H, W, Cp), jnp.float32),
        grid_spec=pltpu.PrefetchScalarGridSpec(
            num_scalar_prefetch=0,
            grid=(N,),
            in_specs=[img_spec, w_spec, v_spec, v_spec,
                      w_spec, v_spec, v_spec],
            out_specs=img_spec,
        ),
        compiler_params=pltpu.CompilerParams(
            dimension_semantics=("parallel",),
            vmem_limit_bytes=_vmem_limit_bytes(),
        ),
    )(x, w1, g1, b1, w2, g2, b2)

    return out[..., :C] if Cp != C else out


def res_block(x_nchw, params):
    """PyTorch-convention NCHW entry point (boundary transposes are glue;
    XLA fuses them with the channel pad/slice into one copy each way)."""
    x = jnp.transpose(x_nchw, (0, 2, 3, 1))         # NCHW -> NHWC
    out = res_block_nhwc(x, params)
    return jnp.transpose(out, (0, 3, 1, 2))         # NHWC -> NCHW


# ---------------------------------------------------------------------------
# Pure-JAX f32 reference (XLA convs) for numerical checks.  The kernel runs
# the convs in bf16 with f32 accumulation, so tolerances below are for bf16
# rounding, not a bound on packing/ordering bugs (those produce O(1) errors).
# ---------------------------------------------------------------------------
def _reference_res_block(x_nchw, params):
    def block(x, w, g, b, relu):
        xp = jnp.pad(x, ((0, 0), (0, 0), (1, 1), (1, 1)), mode="reflect")
        y = lax.conv_general_dilated(
            xp, w, window_strides=(1, 1), padding="VALID",
            dimension_numbers=("NCHW", "HWIO", "NCHW"))
        mean = jnp.mean(y, axis=(2, 3), keepdims=True)
        var = jnp.var(y, axis=(2, 3), keepdims=True)
        y = (y - mean) / jnp.sqrt(var + _EPS)
        y = y * g.reshape(1, -1, 1, 1) + b.reshape(1, -1, 1, 1)
        return jnp.maximum(y, 0.0) if relu else y

    h = block(x_nchw, params["w1"], params["g1"], params["b1"], True)
    y = block(h, params["w2"], params["g2"], params["b2"], False)
    return y + x_nchw


if __name__ == "__main__":
    N, C, H, W = 2, 4, 16, 16
    key = jax.random.PRNGKey(0)
    kx, kw1, kw2, kg1, kg2 = jax.random.split(key, 5)

    # Conv weights stored HWIO (3, 3, C_in, C_out); bias=False (norm='in').
    # InstanceNorm2d affine params: gamma random (nontrivial), beta zeros.
    params = {
        "w1": jax.random.normal(kw1, (3, 3, C, C), jnp.float32) * 0.1,
        "g1": jax.random.uniform(kg1, (C,), jnp.float32),
        "b1": jnp.zeros((C,), jnp.float32),
        "w2": jax.random.normal(kw2, (3, 3, C, C), jnp.float32) * 0.1,
        "g2": jax.random.uniform(kg2, (C,), jnp.float32),
        "b2": jnp.zeros((C,), jnp.float32),
    }
    x = jax.random.normal(kx, (N, C, H, W), jnp.float32)

    out = res_block(x, params)
    jax.block_until_ready(out)
    assert out.shape == (N, C, H, W)
    assert bool(jnp.all(jnp.isfinite(out)))

    ref = _reference_res_block(x, params)
    err = jnp.abs(out - ref)
    max_err = float(jnp.max(err))
    mean_err = float(jnp.mean(err))
    assert max_err < 0.1, f"max abs err {max_err}"
    assert mean_err < 0.03, f"mean abs err {mean_err}"

    print("KERNEL_OK")
</pallas_src>

<mosaic_0001>
module attributes {stable_mosaic.version = 11 : i64} {
  func.func @kernel(%arg0: i32, %arg1: memref<1x16x16x128xbf16, #tpu.memory_space<vmem>>, %arg2: memref<3x384x128xbf16, #tpu.memory_space<vmem>>, %arg3: memref<1x128xf32, #tpu.memory_space<vmem>>, %arg4: memref<1x128xf32, #tpu.memory_space<vmem>>, %arg5: memref<3x384x128xbf16, #tpu.memory_space<vmem>>, %arg6: memref<1x128xf32, #tpu.memory_space<vmem>>, %arg7: memref<1x128xf32, #tpu.memory_space<vmem>>, %arg8: memref<1x16x16x128xf32, #tpu.memory_space<vmem>>) attributes {dimension_semantics = [#tpu.dimension_semantics<parallel>], iteration_bounds = array<i64: 2>, scalar_prefetch = 0 : i64, scratch_operands = 0 : i64, tpu.core_type = #tpu.core_type<tc>, window_params = [{transform_indices = @transform_0, window_bounds = array<i64: 1, 16, 16, 128>}, {pipeline_mode = #tpu.pipeline_mode<synchronous>, transform_indices = @transform_1, window_bounds = array<i64: 3, 384, 128>}, {pipeline_mode = #tpu.pipeline_mode<synchronous>, transform_indices = @transform_2, window_bounds = array<i64: 1, 128>}, {pipeline_mode = #tpu.pipeline_mode<synchronous>, transform_indices = @transform_3, window_bounds = array<i64: 1, 128>}, {pipeline_mode = #tpu.pipeline_mode<synchronous>, transform_indices = @transform_4, window_bounds = array<i64: 3, 384, 128>}, {pipeline_mode = #tpu.pipeline_mode<synchronous>, transform_indices = @transform_5, window_bounds = array<i64: 1, 128>}, {pipeline_mode = #tpu.pipeline_mode<synchronous>, transform_indices = @transform_6, window_bounds = array<i64: 1, 128>}, {transform_indices = @transform_7, window_bounds = array<i64: 1, 16, 16, 128>}]} {
    %c0 = arith.constant 0 : index
    %c0_0 = arith.constant 0 : index
    %c0_1 = arith.constant 0 : index
    %c0_2 = arith.constant 0 : index
    %0 = vector.load %arg1[%c0, %c0_0, %c0_1, %c0_2] : memref<1x16x16x128xbf16, #tpu.memory_space<vmem>>, vector<1x16x16x128xbf16>
    %1 = vector.shape_cast %0 : vector<1x16x16x128xbf16> to vector<16x16x128xbf16>
    %2 = vector.extract_strided_slice %1 {offsets = [1, 0, 0], sizes = [1, 16, 128], strides = [1, 1, 1]} : vector<16x16x128xbf16> to vector<1x16x128xbf16>
    %3 = vector.extract_strided_slice %1 {offsets = [14, 0, 0], sizes = [1, 16, 128], strides = [1, 1, 1]} : vector<16x16x128xbf16> to vector<1x16x128xbf16>
    %4 = tpu.concatenate %2, %1, %3 in 0 : vector<1x16x128xbf16>, vector<16x16x128xbf16>, vector<1x16x128xbf16> -> vector<18x16x128xbf16>
    %5 = vector.extract_strided_slice %4 {offsets = [0, 1, 0], sizes = [18, 1, 128], strides = [1, 1, 1]} : vector<18x16x128xbf16> to vector<18x1x128xbf16>
    %6 = vector.extract_strided_slice %4 {offsets = [0, 0, 0], sizes = [18, 15, 128], strides = [1, 1, 1]} : vector<18x16x128xbf16> to vector<18x15x128xbf16>
    %7 = tpu.concatenate %5, %6 in 1 : vector<18x1x128xbf16>, vector<18x15x128xbf16> -> vector<18x16x128xbf16>
    %8 = vector.extract_strided_slice %4 {offsets = [0, 1, 0], sizes = [18, 15, 128], strides = [1, 1, 1]} : vector<18x16x128xbf16> to vector<18x15x128xbf16>
    %9 = vector.extract_strided_slice %4 {offsets = [0, 14, 0], sizes = [18, 1, 128], strides = [1, 1, 1]} : vector<18x16x128xbf16> to vector<18x1x128xbf16>
    %10 = tpu.concatenate %8, %9 in 1 : vector<18x15x128xbf16>, vector<18x1x128xbf16> -> vector<18x16x128xbf16>
    %11 = tpu.concatenate %7, %4, %10 in 2 : vector<18x16x128xbf16>, vector<18x16x128xbf16>, vector<18x16x128xbf16> -> vector<18x16x384xbf16>
    %12 = vector.extract_strided_slice %11 {offsets = [0, 0, 0], sizes = [16, 16, 384], strides = [1, 1, 1]} : vector<18x16x384xbf16> to vector<16x16x384xbf16>
    %13 = vector.shape_cast %12 : vector<16x16x384xbf16> to vector<256x384xbf16>
    %c0_3 = arith.constant 0 : index
    %c0_4 = arith.constant 0 : index
    %c0_5 = arith.constant 0 : index
    %14 = vector.load %arg2[%c0_3, %c0_4, %c0_5] : memref<3x384x128xbf16, #tpu.memory_space<vmem>>, vector<1x384x128xbf16>
    %15 = vector.shape_cast %14 : vector<1x384x128xbf16> to vector<384x128xbf16>
    %cst = arith.constant dense<0.000000e+00> : vector<256x128xf32>
    %16 = tpu.matmul %13, %15, %cst {dimension_numbers = #tpu.dot_dimension_numbers<[1], [0], [0], [1], [0, 0, 1, 1], [], []>} : vector<256x384xbf16>, vector<384x128xbf16>, vector<256x128xf32> -> vector<256x128xf32>
    %17 = vector.extract_strided_slice %11 {offsets = [1, 0, 0], sizes = [16, 16, 384], strides = [1, 1, 1]} : vector<18x16x384xbf16> to vector<16x16x384xbf16>
    %18 = vector.shape_cast %17 : vector<16x16x384xbf16> to vector<256x384xbf16>
    %c1 = arith.constant 1 : index
    %c0_6 = arith.constant 0 : index
    %c0_7 = arith.constant 0 : index
    %19 = vector.load %arg2[%c1, %c0_6, %c0_7] : memref<3x384x128xbf16, #tpu.memory_space<vmem>>, vector<1x384x128xbf16>
    %20 = vector.shape_cast %19 : vector<1x384x128xbf16> to vector<384x128xbf16>
    %cst_8 = arith.constant dense<0.000000e+00> : vector<256x128xf32>
    %21 = tpu.matmul %18, %20, %cst_8 {dimension_numbers = #tpu.dot_dimension_numbers<[1], [0], [0], [1], [0, 0, 1, 1], [], []>} : vector<256x384xbf16>, vector<384x128xbf16>, vector<256x128xf32> -> vector<256x128xf32>
    %22 = arith.addf %16, %21 : vector<256x128xf32>
    %23 = vector.extract_strided_slice %11 {offsets = [2, 0, 0], sizes = [16, 16, 384], strides = [1, 1, 1]} : vector<18x16x384xbf16> to vector<16x16x384xbf16>
    %24 = vector.shape_cast %23 : vector<16x16x384xbf16> to vector<256x384xbf16>
    %c2 = arith.constant 2 : index
    %c0_9 = arith.constant 0 : index
    %c0_10 = arith.constant 0 : index
    %25 = vector.load %arg2[%c2, %c0_9, %c0_10] : memref<3x384x128xbf16, #tpu.memory_space<vmem>>, vector<1x384x128xbf16>
    %26 = vector.shape_cast %25 : vector<1x384x128xbf16> to vector<384x128xbf16>
    %cst_11 = arith.constant dense<0.000000e+00> : vector<256x128xf32>
    %27 = tpu.matmul %24, %26, %cst_11 {dimension_numbers = #tpu.dot_dimension_numbers<[1], [0], [0], [1], [0, 0, 1, 1], [], []>} : vector<256x384xbf16>, vector<384x128xbf16>, vector<256x128xf32> -> vector<256x128xf32>
    %28 = arith.addf %22, %27 : vector<256x128xf32>
    %cst_12 = arith.constant dense<0.000000e+00> : vector<128xf32>
    %29 = vector.multi_reduction <add>, %28, %cst_12 [0] : vector<256x128xf32> to vector<128xf32>
    %30 = vector.shape_cast %29 : vector<128xf32> to vector<1x128xf32>
    %cst_13 = arith.constant 2.560000e+02 : f32
    %31 = vector.broadcast %cst_13 : f32 to vector<1x128xf32>
    %32 = arith.divf %30, %31 : vector<1x128xf32>
    %33 = vector.broadcast %32 : vector<1x128xf32> to vector<256x128xf32>
    %34 = arith.subf %28, %33 : vector<256x128xf32>
    %35 = arith.mulf %34, %34 : vector<256x128xf32>
    %cst_14 = arith.constant dense<0.000000e+00> : vector<128xf32>
    %36 = vector.multi_reduction <add>, %35, %cst_14 [0] : vector<256x128xf32> to vector<128xf32>
    %37 = vector.shape_cast %36 : vector<128xf32> to vector<1x128xf32>
    %cst_15 = arith.constant 2.560000e+02 : f32
    %38 = vector.broadcast %cst_15 : f32 to vector<1x128xf32>
    %39 = arith.divf %37, %38 : vector<1x128xf32>
    %cst_16 = arith.constant 9.99999974E-6 : f32
    %40 = vector.broadcast %cst_16 : f32 to vector<1x128xf32>
    %41 = arith.addf %39, %40 : vector<1x128xf32>
    %42 = math.rsqrt %41 : vector<1x128xf32>
    %43 = vector.broadcast %42 : vector<1x128xf32> to vector<256x128xf32>
    %44 = arith.mulf %34, %43 : vector<256x128xf32>
    %c0_17 = arith.constant 0 : index
    %c0_18 = arith.constant 0 : index
    %45 = vector.load %arg3[%c0_17, %c0_18] : memref<1x128xf32, #tpu.memory_space<vmem>>, vector<1x128xf32>
    %46 = vector.broadcast %45 : vector<1x128xf32> to vector<256x128xf32>
    %47 = arith.mulf %44, %46 : vector<256x128xf32>
    %c0_19 = arith.constant 0 : index
    %c0_20 = arith.constant 0 : index
    %48 = vector.load %arg4[%c0_19, %c0_20] : memref<1x128xf32, #tpu.memory_space<vmem>>, vector<1x128xf32>
    %49 = vector.broadcast %48 : vector<1x128xf32> to vector<256x128xf32>
    %50 = arith.addf %47, %49 : vector<256x128xf32>
    %cst_21 = arith.constant 0.000000e+00 : f32
    %51 = vector.broadcast %cst_21 : f32 to vector<256x128xf32>
    %52 = arith.maximumf %50, %51 : vector<256x128xf32>
    %53 = arith.truncf %52 : vector<256x128xf32> to vector<256x128xbf16>
    %54 = vector.shape_cast %53 : vector<256x128xbf16> to vector<16x16x128xbf16>
    %55 = vector.extract_strided_slice %54 {offsets = [1, 0, 0], sizes = [1, 16, 128], strides = [1, 1, 1]} : vector<16x16x128xbf16> to vector<1x16x128xbf16>
    %56 = vector.extract_strided_slice %54 {offsets = [14, 0, 0], sizes = [1, 16, 128], strides = [1, 1, 1]} : vector<16x16x128xbf16> to vector<1x16x128xbf16>
    %57 = tpu.concatenate %55, %54, %56 in 0 : vector<1x16x128xbf16>, vector<16x16x128xbf16>, vector<1x16x128xbf16> -> vector<18x16x128xbf16>
    %58 = vector.extract_strided_slice %57 {offsets = [0, 1, 0], sizes = [18, 1, 128], strides = [1, 1, 1]} : vector<18x16x128xbf16> to vector<18x1x128xbf16>
    %59 = vector.extract_strided_slice %57 {offsets = [0, 0, 0], sizes = [18, 15, 128], strides = [1, 1, 1]} : vector<18x16x128xbf16> to vector<18x15x128xbf16>
    %60 = tpu.concatenate %58, %59 in 1 : vector<18x1x128xbf16>, vector<18x15x128xbf16> -> vector<18x16x128xbf16>
    %61 = vector.extract_strided_slice %57 {offsets = [0, 1, 0], sizes = [18, 15, 128], strides = [1, 1, 1]} : vector<18x16x128xbf16> to vector<18x15x128xbf16>
    %62 = vector.extract_strided_slice %57 {offsets = [0, 14, 0], sizes = [18, 1, 128], strides = [1, 1, 1]} : vector<18x16x128xbf16> to vector<18x1x128xbf16>
    %63 = tpu.concatenate %61, %62 in 1 : vector<18x15x128xbf16>, vector<18x1x128xbf16> -> vector<18x16x128xbf16>
    %64 = tpu.concatenate %60, %57, %63 in 2 : vector<18x16x128xbf16>, vector<18x16x128xbf16>, vector<18x16x128xbf16> -> vector<18x16x384xbf16>
    %65 = vector.extract_strided_slice %64 {offsets = [0, 0, 0], sizes = [16, 16, 384], strides = [1, 1, 1]} : vector<18x16x384xbf16> to vector<16x16x384xbf16>
    %66 = vector.shape_cast %65 : vector<16x16x384xbf16> to vector<256x384xbf16>
    %c0_22 = arith.constant 0 : index
    %c0_23 = arith.constant 0 : index
    %c0_24 = arith.constant 0 : index
    %67 = vector.load %arg5[%c0_22, %c0_23, %c0_24] : memref<3x384x128xbf16, #tpu.memory_space<vmem>>, vector<1x384x128xbf16>
    %68 = vector.shape_cast %67 : vector<1x384x128xbf16> to vector<384x128xbf16>
    %cst_25 = arith.constant dense<0.000000e+00> : vector<256x128xf32>
    %69 = tpu.matmul %66, %68, %cst_25 {dimension_numbers = #tpu.dot_dimension_numbers<[1], [0], [0], [1], [0, 0, 1, 1], [], []>} : vector<256x384xbf16>, vector<384x128xbf16>, vector<256x128xf32> -> vector<256x128xf32>
    %70 = vector.extract_strided_slice %64 {offsets = [1, 0, 0], sizes = [16, 16, 384], strides = [1, 1, 1]} : vector<18x16x384xbf16> to vector<16x16x384xbf16>
    %71 = vector.shape_cast %70 : vector<16x16x384xbf16> to vector<256x384xbf16>
    %c1_26 = arith.constant 1 : index
    %c0_27 = arith.constant 0 : index
    %c0_28 = arith.constant 0 : index
    %72 = vector.load %arg5[%c1_26, %c0_27, %c0_28] : memref<3x384x128xbf16, #tpu.memory_space<vmem>>, vector<1x384x128xbf16>
    %73 = vector.shape_cast %72 : vector<1x384x128xbf16> to vector<384x128xbf16>
    %cst_29 = arith.constant dense<0.000000e+00> : vector<256x128xf32>
    %74 = tpu.matmul %71, %73, %cst_29 {dimension_numbers = #tpu.dot_dimension_numbers<[1], [0], [0], [1], [0, 0, 1, 1], [], []>} : vector<256x384xbf16>, vector<384x128xbf16>, vector<256x128xf32> -> vector<256x128xf32>
    %75 = arith.addf %69, %74 : vector<256x128xf32>
    %76 = vector.extract_strided_slice %64 {offsets = [2, 0, 0], sizes = [16, 16, 384], strides = [1, 1, 1]} : vector<18x16x384xbf16> to vector<16x16x384xbf16>
    %77 = vector.shape_cast %76 : vector<16x16x384xbf16> to vector<256x384xbf16>
    %c2_30 = arith.constant 2 : index
    %c0_31 = arith.constant 0 : index
    %c0_32 = arith.constant 0 : index
    %78 = vector.load %arg5[%c2_30, %c0_31, %c0_32] : memref<3x384x128xbf16, #tpu.memory_space<vmem>>, vector<1x384x128xbf16>
    %79 = vector.shape_cast %78 : vector<1x384x128xbf16> to vector<384x128xbf16>
    %cst_33 = arith.constant dense<0.000000e+00> : vector<256x128xf32>
    %80 = tpu.matmul %77, %79, %cst_33 {dimension_numbers = #tpu.dot_dimension_numbers<[1], [0], [0], [1], [0, 0, 1, 1], [], []>} : vector<256x384xbf16>, vector<384x128xbf16>, vector<256x128xf32> -> vector<256x128xf32>
    %81 = arith.addf %75, %80 : vector<256x128xf32>
    %cst_34 = arith.constant dense<0.000000e+00> : vector<128xf32>
    %82 = vector.multi_reduction <add>, %81, %cst_34 [0] : vector<256x128xf32> to vector<128xf32>
    %83 = vector.shape_cast %82 : vector<128xf32> to vector<1x128xf32>
    %cst_35 = arith.constant 2.560000e+02 : f32
    %84 = vector.broadcast %cst_35 : f32 to vector<1x128xf32>
    %85 = arith.divf %83, %84 : vector<1x128xf32>
    %86 = vector.broadcast %85 : vector<1x128xf32> to vector<256x128xf32>
    %87 = arith.subf %81, %86 : vector<256x128xf32>
    %88 = arith.mulf %87, %87 : vector<256x128xf32>
    %cst_36 = arith.constant dense<0.000000e+00> : vector<128xf32>
    %89 = vector.multi_reduction <add>, %88, %cst_36 [0] : vector<256x128xf32> to vector<128xf32>
    %90 = vector.shape_cast %89 : vector<128xf32> to vector<1x128xf32>
    %cst_37 = arith.constant 2.560000e+02 : f32
    %91 = vector.broadcast %cst_37 : f32 to vector<1x128xf32>
    %92 = arith.divf %90, %91 : vector<1x128xf32>
    %cst_38 = arith.constant 9.99999974E-6 : f32
    %93 = vector.broadcast %cst_38 : f32 to vector<1x128xf32>
    %94 = arith.addf %92, %93 : vector<1x128xf32>
    %95 = math.rsqrt %94 : vector<1x128xf32>
    %96 = vector.broadcast %95 : vector<1x128xf32> to vector<256x128xf32>
    %97 = arith.mulf %87, %96 : vector<256x128xf32>
    %c0_39 = arith.constant 0 : index
    %c0_40 = arith.constant 0 : index
    %98 = vector.load %arg6[%c0_39, %c0_40] : memref<1x128xf32, #tpu.memory_space<vmem>>, vector<1x128xf32>
    %99 = vector.broadcast %98 : vector<1x128xf32> to vector<256x128xf32>
    %100 = arith.mulf %97, %99 : vector<256x128xf32>
    %c0_41 = arith.constant 0 : index
    %c0_42 = arith.constant 0 : index
    %101 = vector.load %arg7[%c0_41, %c0_42] : memref<1x128xf32, #tpu.memory_space<vmem>>, vector<1x128xf32>
    %102 = vector.broadcast %101 : vector<1x128xf32> to vector<256x128xf32>
    %103 = arith.addf %100, %102 : vector<256x128xf32>
    %104 = vector.shape_cast %1 : vector<16x16x128xbf16> to vector<256x128xbf16>
    %105 = arith.extf %104 : vector<256x128xbf16> to vector<256x128xf32>
    %106 = arith.addf %103, %105 : vector<256x128xf32>
    %107 = vector.shape_cast %106 : vector<256x128xf32> to vector<16x16x128xf32>
    %c0_43 = arith.constant 0 : index
    %c0_44 = arith.constant 0 : index
    %c0_45 = arith.constant 0 : index
    %c0_46 = arith.constant 0 : index
    %108 = vector.load %arg8[%c0_43, %c0_44, %c0_45, %c0_46] : memref<1x16x16x128xf32, #tpu.memory_space<vmem>>, vector<1x16x16x128xf32>
    %109 = vector.shape_cast %108 : vector<1x16x16x128xf32> to vector<16x16x128xf32>
    %110 = vector.shape_cast %107 : vector<16x16x128xf32> to vector<1x16x16x128xf32>
    tpu.vector_store %arg8[%c0_43, %c0_44, %c0_45, %c0_46], %110 {strides = array<i32>} : memref<1x16x16x128xf32, #tpu.memory_space<vmem>>, vector<1x16x16x128xf32>,
    return
  }
  func.func @transform_0(%arg0: i32) -> (i32, i32, i32, i32) {
    %c0_i32 = arith.constant 0 : i32
    %c0_i32_0 = arith.constant 0 : i32
    %c0_i32_1 = arith.constant 0 : i32
    %c0_i32_2 = arith.constant 0 : i32
    return %arg0, %c0_i32, %c0_i32_0, %c0_i32_1 : i32, i32, i32, i32
  }
  func.func @transform_1(%arg0: i32) -> (i32, i32, i32) {
    %c0_i32 = arith.constant 0 : i32
    %c0_i32_0 = arith.constant 0 : i32
    %c0_i32_1 = arith.constant 0 : i32
    %c0_i32_2 = arith.constant 0 : i32
    return %c0_i32, %c0_i32_0, %c0_i32_1 : i32, i32, i32
  }
  func.func @transform_2(%arg0: i32) -> (i32, i32) {
    %c0_i32 = arith.constant 0 : i32
    %c0_i32_0 = arith.constant 0 : i32
    %c0_i32_1 = arith.constant 0 : i32
    return %c0_i32, %c0_i32_0 : i32, i32
  }
  func.func @transform_3(%arg0: i32) -> (i32, i32) {
    %c0_i32 = arith.constant 0 : i32
    %c0_i32_0 = arith.constant 0 : i32
    %c0_i32_1 = arith.constant 0 : i32
    return %c0_i32, %c0_i32_0 : i32, i32
  }
  func.func @transform_4(%arg0: i32) -> (i32, i32, i32) {
    %c0_i32 = arith.constant 0 : i32
    %c0_i32_0 = arith.constant 0 : i32
    %c0_i32_1 = arith.constant 0 : i32
    %c0_i32_2 = arith.constant 0 : i32
    return %c0_i32, %c0_i32_0, %c0_i32_1 : i32, i32, i32
  }
  func.func @transform_5(%arg0: i32) -> (i32, i32) {
    %c0_i32 = arith.constant 0 : i32
    %c0_i32_0 = arith.constant 0 : i32
    %c0_i32_1 = arith.constant 0 : i32
    return %c0_i32, %c0_i32_0 : i32, i32
  }
  func.func @transform_6(%arg0: i32) -> (i32, i32) {
    %c0_i32 = arith.constant 0 : i32
    %c0_i32_0 = arith.constant 0 : i32
    %c0_i32_1 = arith.constant 0 : i32
    return %c0_i32, %c0_i32_0 : i32, i32
  }
  func.func @transform_7(%arg0: i32) -> (i32, i32, i32, i32) {
    %c0_i32 = arith.constant 0 : i32
    %c0_i32_0 = arith.constant 0 : i32
    %c0_i32_1 = arith.constant 0 : i32
    %c0_i32_2 = arith.constant 0 : i32
    return %arg0, %c0_i32, %c0_i32_0, %c0_i32_1 : i32, i32, i32, i32
  }
}

</mosaic_0001>

<bundles_post_ra>
// kernel: tpu_custom_call.1
= control target key start
LH: loop header
LB: loop body
LE: loop exit
PB: predicated region body
PF: predicated region fallthrough
CT: control target
= control target key end

     0   :  { %12 = vsyncpa [#allocation3], 0  ;;  %s10030_s0 = inlined_call_operand.hbm [shape: bf16[2,16,16,128], index: 0, kind: input, shape index: {}]   ;;  %s10031_s1 = inlined_call_operand.hbm [shape: bf16[3,384,128], index: 1, kind: input, shape index: {}]   ;;  %s10032_s2 = inlined_call_operand.vmem [shape: f32[1,128], index: 2, kind: input, shape index: {}]   ;;  %s10033_s3 = inlined_call_operand.vmem [shape: f32[1,128], index: 3, kind: input, shape index: {}]   ;;  %s10034_s4 = inlined_call_operand.hbm [shape: bf16[3,384,128], index: 4, kind: input, shape index: {}]   ;;  %s10035_s5 = inlined_call_operand.vmem [shape: f32[1,128], index: 5, kind: input, shape index: {}]   ;;  %s10036_s6 = inlined_call_operand.vmem [shape: f32[1,128], index: 6, kind: input, shape index: {}]   ;;  %s10037_s7 = inlined_call_operand.hbm [shape: f32[2,16,16,128], index: 7, kind: output, shape index: {}]  }
   0x1   :  { %14 = vsyncpa [#allocation3 + $0x1], 0 }
   0x2   :  { %15 = vsyncpa [#allocation6], 0 }
   0x3   :  { %16 = vsyncpa [#allocation4], 0 }
   0x4   :  { %18 = vsyncpa [#allocation4 + $0x1], 0  ;;  %s7139_s24 = smov 0   ;;  %s7141_s25 = smov 0  }
   0x5   :  { %s7143_s26 = smov 0   ;;  %s7145_s27 = smov 0  }
   0x6 LB: > { %s7160_s28 = sadd.s32 4294967295, %s7089_s27   ;;  %s4992_s29 = sadd.s32 4294967294, %s7089_s27   ;;  %s7089_s27 = sphi %s7145_s27, %s10259_s27   ;;  %s7085_s26 = sphi %s7143_s26, %s10258_s26   ;;  %s7081_s25 = sphi %s7141_s25, %s10257_s25   ;;  %s7077_s24 = sphi %s7139_s24, %s10256_s24  }
   0x7   : > { %p44_p0 = scmp.ne.s32.totalorder %s7081_s25, %s7077_s24  ;;  %p10038_p1 = scmp.eq.s32.totalorder %s7160_s28, 0 }
   0x8   : > { %p200_p3 = scmp.eq.s32.totalorder %s4992_s29, 1  ;;  %p4993_p5 = scmp.ge.s32.totalorder %s7089_s27, 1 }
   0x9   : > { %p7169_p4 = por %p10038_p1, %p44_p0  ;;  %p207_p7 = scmp.lt.s32.totalorder %s7089_s27, 3 }
   0xa   : > { %p7174_p6 = por %p200_p3, %p44_p0  ;;  %s7091_s10 = smov [#allocation5]  }
   0xb   : > { %s10090_s30 = scalar_select %p7169_p4, 1, 0 }
   0xc   : > { %s10091_s8 = scalar_select %p7174_p6, 1, 0 }
   0xd   : > { %p7179_p8 = pnand %p4993_p5, %p207_p7  ;;  %s219_s11 = sshll.u32 %s7091_s10, 4  ;;  %s7183_s11 = int_to_ptr.vmem [resolvable:$true] %s219_s11 }
   0xe   : > { %s7092_s13 = smov [#allocation7]   ;;  %s6933_s17 = scalar_lea.hbm %s10031_s1, 9216 }
   0xf   : > { %p6644_p9 = pneg %p7179_p8  ;;  %s238_s14 = sshll.u32 %s7092_s13, 4  ;;  %s7194_s14 = int_to_ptr.vmem [resolvable:$true] %s238_s14 }
  0x10   : > { %p6934_p12 = scmp.ne.s32.totalorder %s10031_s1, %s6933_s17  ;;  %p6940_p5 = scmp.lt.u32.totalorder %s6933_s17, %s10031_s1 }
  0x11   : > { %p7190_p11 = pnand %p6644_p9, %p10038_p1 }
  0x13   : > { %p6935_p13 = pneg %p7190_p11 }
  0x15   : > { %p6936_p0 = pnand %p6935_p13, %p6934_p12 }
  0x17   : > { %p6937_p3 = pneg %p6936_p0 }
  0x19   : > { %p6942_p7 = pnand %p6940_p5, %p6937_p3 }
  0x1b   : > { %6945 = shalt.err (!%p6942_p7)
}
  0x1c   : > { %s6946_s22 = scalar_lea.vmem %s7183_s11, 9216  ;;  %p6954_p2 = scmp.lt.s32.totalorder %s7183_s11, %s7183_s11 }
  0x1d   : > { %p6947_p9 = scmp.ne.s32.totalorder %s7183_s11, %s6946_s22  ;;  %p6955_p12 = scmp.lt.s32.totalorder %s6946_s22, %s6946_s22 }
  0x1f   : > { %p6949_p10 = pnand %p6947_p9, %p6935_p13  ;;  %p6956_p0 = por %p6955_p12, %p6954_p2 }
  0x21   : > { %p6950_p1 = pneg %p6949_p10 }
  0x23   : > { %p6957_p6 = pnand %p6956_p0, %p6950_p1 }
  0x25   : > { %6960 = shalt.err (!%p6957_p6)
}
  0x26   : > { %s10039_s23 = smov 64   ;;  %s7094_s29 = smov 4  }
  0x27   : > { %6647 = dma.hbm_to_vmem [thread:$0]  (!%p7190_p11), %s10031_s1, 9216, %s7183_s11, [#allocation6], %s10039_s23, %s10039_s23, %s7094_s29  }
  0x28   : > { %s6961_s17 = scalar_lea.hbm %s10034_s4, 9216 }
  0x29   : > { %p6962_p1 = scmp.ne.s32.totalorder %s10034_s4, %s6961_s17  ;;  %p6968_p10 = scmp.lt.u32.totalorder %s6961_s17, %s10034_s4 }
  0x2b   : > { %p6964_p2 = pnand %p6962_p1, %p6935_p13 }
  0x2d   : > { %p6965_p6 = pneg %p6964_p2 }
  0x2f   : > { %p6970_p3 = pnand %p6968_p10, %p6965_p6 }
  0x31   : > { %6973 = shalt.err (!%p6970_p3)
}
  0x32   : > { %s6974_s11 = scalar_lea.vmem %s7194_s14, 9216  ;;  %p6982_p12 = scmp.lt.s32.totalorder %s7194_s14, %s7194_s14 }
  0x33   : > { %p6975_p5 = scmp.ne.s32.totalorder %s7194_s14, %s6974_s11  ;;  %p6983_p0 = scmp.lt.s32.totalorder %s6974_s11, %s6974_s11 }
  0x35   : > { %p6977_p7 = pnand %p6975_p5, %p6935_p13  ;;  %p6984_p1 = por %p6983_p0, %p6982_p12 }
  0x37   : > { %p6978_p9 = pneg %p6977_p7 }
  0x39   : > { %p6985_p2 = pnand %p6984_p1, %p6978_p9 }
  0x3b   : > { %6988 = shalt.err (!%p6985_p2)
}
  0x3c   : > { %6650 = dma.hbm_to_vmem [thread:$0]  (!%p7190_p11), %s10034_s4, 9216, %s7194_s14, [#allocation6], %s10039_s23, %s10039_s23, %s7094_s29  }
  0x3d   : > { %s7255_s12 = sadd.s32 1, %s7089_s27   ;;  %s31_s13 = sadd.s32 1, %s7085_s26 }
  0x3e   : > { %s28_s15 = ssub.s32 %s7089_s27, %s7255_s12  ;;  %p38_p13 = scmp.ne.s32.totalorder %s7085_s26, %s7081_s25 }
  0x3f   : > { %p29_p6 = scmp.eq.s32.totalorder %s28_s15, 0  ;;  %p39_p10 = scmp.eq.s32.totalorder %s7089_s27, 0 }
  0x40   : > { %p10094_p3 = scmp.eq.s32.totalorder %s7160_s28, 1  ;;  %p6661_p7 = scmp.lt.s32.totalorder %s7089_s27, 2 }
  0x41   : > { %s7271_s17 = scalar_select %p29_p6, %s7085_s26, %s31_s13  }
  0x42   : > { %p7265_p5 = por %p10094_p3, %p38_p13  ;;  %p40_p9 = por %p39_p10, %p38_p13 }
  0x43   : > { %s258_s18 = sand.u32 1, %s7085_s26   ;;  %s5206_s14 = sshll.u32 %s7089_s27, 11 }
  0x44   : > { %s10095_s16 = scalar_select %p7265_p5, 1, 0 }
  0x45   : > { %s4997_s19 = sshll.u32 %s258_s18, 7  ;;  %s7278_s11 = scalar_lea.hbm %s10030_s0, %s5206_s14 }
  0x46   : > { %s262_s22 = scalar_lea.vmem [#allocation2], %s4997_s19  ;;  %p7282_p11 = pnand %p6661_p7, %p40_p9 }
  0x47   : > { %s269_s10 = sshll.u32 %s262_s22, 4  ;;  %s7286_s15 = scalar_lea.sflag [#allocation3], %s258_s18  ;;  %s7280_s10 = int_to_ptr.vmem [resolvable:$true] %s269_s10 }
  0x48   : > { %s6989_s23 = scalar_lea.hbm %s7278_s11, 2048  ;;  %p6991_p0 = pneg %p7282_p11 }
  0x49   : > { %p6990_p12 = scmp.ne.s32.totalorder %s7278_s11, %s6989_s23  ;;  %s6994_s20 = scalar_lea.hbm %s10030_s0, 4096 }
  0x4a   : > { %p6995_p13 = scmp.lt.u32.totalorder %s7278_s11, %s10030_s0  ;;  %p6996_p6 = scmp.lt.u32.totalorder %s6994_s20, %s6989_s23 }
  0x4b   : > { %p6992_p1 = pnand %p6991_p0, %p6990_p12  ;;  %p6998_p3 = scmp.lt.u32.totalorder %s6989_s23, %s7278_s11 }
  0x4c   : > { %p6997_p10 = por %p6996_p6, %p6995_p13 }
  0x4d   : > { %p6993_p2 = pneg %p6992_p1 }
  0x4e   : > { %p6999_p7 = por %p6998_p3, %p6997_p10 }
  0x50   : > { %p7000_p9 = pnand %p6999_p7, %p6993_p2 }
  0x52   : > { %7003 = shalt.err (!%p7000_p9)
}
  0x53   : > { %s7004_s18 = scalar_lea.vmem %s7280_s10, 2048  ;;  %s7095_s19 = smov [#allocation2]  }
  0x54   : > { %p7005_p12 = scmp.ne.s32.totalorder %s7280_s10, %s7004_s18  ;;  %s7009_s14 = sshll.u32 %s7095_s19, 4  ;;  %s7010_s14 = int_to_ptr.vmem [resolvable:$false] %s7009_s14 }
  0x55   : > { %s7011_s21 = scalar_lea.vmem %s7010_s14, 4096  ;;  %p7012_p4 = scmp.lt.s32.totalorder %s7280_s10, %s7010_s14 }
  0x56   : > { %p7007_p1 = pnand %p7005_p12, %p6991_p0  ;;  %p7013_p13 = scmp.lt.s32.totalorder %s7011_s21, %s7004_s18 }
  0x58   : > { %p7008_p5 = pneg %p7007_p1  ;;  %p7014_p6 = por %p7013_p13, %p7012_p4 }
  0x5a   : > { %p7015_p10 = pnand %p7014_p6, %p7008_p5 }
  0x5c   : > { %7018 = shalt.err (!%p7015_p10)
}
  0x5d   : > { %s10097_s23 = smov 64   ;;  %281 = sbr.rel (%p7179_p8) target bundleno = 1522 (0x5f2), region = 48 }
  0x5e   : > { %6654 = dma.hbm_to_vmem [thread:$0]  (!%p7282_p11), %s7278_s11, 2048, %s7280_s10, %s7286_s15, %s10097_s23, %s10097_s23, %s7094_s29  }
  0x64   : > { %s7320_s20 = sand.u32 1, %s7081_s25   ;;  %p10098_p4 = scmp.ne.s32.totalorder %s10090_s30, 0 }
  0x65   : > { %s5001_s22 = sshll.u32 %s7320_s20, 7  ;;  %s284_s18 = scalar_lea.sflag [#allocation3], %s7320_s20 }
  0x66   : > { %s7324_s19 = scalar_lea.vmem [#allocation2], %s5001_s22 }
  0x67   : > { %7064 = dma.done.wait (%p10098_p4), %s284_s18, 2048  }
  0x68   : > { %7066 = vsyncadd (%p10098_p4), %s284_s18, 4294965248  ;;  %p10099_p5 = scmp.eq.s32.totalorder %s7160_s28, 0 }
  0x6a   : > { %7068 = dma.done.wait (%p10099_p5), [#allocation6], 18432   ;;  %p10100_p8 = pmov %p10099_p5 }
  0x6b   : > { %v6703_v0 = vld [vmem:[#allocation5 + $0x100] sm:$0xff]   ;;  %v6707_v4 = vld [vmem:[#allocation5 + $0x108] sm:$0xff]   ;;  %v6711_v8 = vld [vmem:[#allocation5 + $0x110] sm:$0xff]   ;;  %vm647_vm0 = vcmask 1040384   ;;  %vm648_vm1 = vsmask.f32 256 }
  0x6c   : > { %7070 = vsyncadd (%p10100_p8), [#allocation6], 4294948864  ;;  %v6704_v1 = vld [vmem:[#allocation5 + $0x40] sm:$0xff]   ;;  %5208 = vmatprep.subr.bf16.mxu0 %v6703_v0  ;;  %v6708_v5 = vld [vmem:[#allocation5 + $0x48] sm:$0xff]   ;;  %v10102_v49 = vmov 0  ;;  %vm810_vm3 = vcmask 1047552  }
  0x6d   : > { %v6705_v2 = vld [vmem:[#allocation5 + $0xc0] sm:$0xff]   ;;  %5344 = vmatprep.subr.bf16.mxu1 %v6704_v1  ;;  %v6709_v6 = vld [vmem:[#allocation5 + $0xc8] sm:$0xff]   ;;  %v6712_v9 = vld [vmem:[#allocation5 + $0x50] sm:$0xff]   ;;  %vm811_vm4 = vsmask.f32 7424  ;;  %s5004_s21 = sshll.u32 %s7320_s20, 8 }
  0x6e   : > { %v6706_v3 = vld [vmem:[#allocation5] sm:$0xff]   ;;  %5209 = vmatpush3.bf16.msra.mxu0 %v6705_v2  ;;  %v6710_v7 = vld [vmem:[#allocation5 + $0x8] sm:$0xff]   ;;  %v6713_v10 = vld [vmem:[#allocation5 + $0xd0] sm:$0xff]   ;;  %s9818_s23 = scalar_lea.vmem [#allocation8], %s5004_s21  ;;  %s5207_s22 = sshll.u32 %s7160_s28, 12 }
  0x6f   : > { %5345 = vmatpush3.bf16.msra.mxu1 %v6706_v3  ;;  %5210 = vmatprep.subr.bf16.mxu0 %v6707_v4  ;;  %v6714_v11 = vld [vmem:[#allocation5 + $0x10] sm:$0xff]   ;;  %v6715_v12 = vld [vmem:[#allocation5 + $0x118] sm:$0xff]   ;;  %v6719_v16 = vld [vmem:[#allocation5 + $0x120] sm:$0xff]   ;;  %s4900_s18 = sshll.u32 %s9818_s23, 4  ;;  %s9964_s30 = scalar_lea.hbm %s10037_s7, %s5207_s22  ;;  %s9966_s18 = int_to_ptr.vmem [resolvable:$true] %s4900_s18 }
  0x70   : > { %5346 = vmatprep.subr.bf16.mxu1 %v6708_v5  ;;  %v6716_v13 = vld [vmem:[#allocation5 + $0x58] sm:$0xff]   ;;  %v6720_v17 = vld [vmem:[#allocation5 + $0x60] sm:$0xff]   ;;  %v6723_v20 = vld [vmem:[#allocation5 + $0x128] sm:$0xff]   ;;  %s4887_s9 = scalar_lea.sflag [#allocation4], %s7320_s20  ;;  %s7019_s29 = scalar_lea.vmem %s9966_s18, 4096 }
  0x71   : > { %v6717_v14 = vld [vmem:[#allocation5 + $0xd8] sm:$0xff]   ;;  %v6721_v18 = vld [vmem:[#allocation5 + $0xe0] sm:$0xff]   ;;  %v6724_v21 = vld [vmem:[#allocation5 + $0x68] sm:$0xff]   ;;  %p7020_p11 = scmp.ne.s32.totalorder %s9966_s18, %s7019_s29  ;;  %p10253_p0 = scmp.ne.s32.totalorder %s10095_s16, 0 }
  0x72   : > { %5211 = vmatpush3.bf16.msra.mxu0 %v6709_v6  ;;  %v6718_v15 = vld [vmem:[#allocation5 + $0x18] sm:$0xff]   ;;  %v6722_v19 = vld [vmem:[#allocation5 + $0x20] sm:$0xff]   ;;  %v6725_v22 = vld [vmem:[#allocation5 + $0xe8] sm:$0xff]   ;;  %s7096_s11 = smov [#allocation8]  }
  0x73   : > { %5347 = vmatpush3.bf16.msra.mxu1 %v6710_v7  ;;  %5212 = vmatprep.subr.bf16.mxu0 %v6711_v8  ;;  %v6726_v23 = vld [vmem:[#allocation5 + $0x28] sm:$0xff]   ;;  %v6727_v24 = vld [vmem:[#allocation5 + $0x130] sm:$0xff]   ;;  %v6731_v28 = vld [vmem:[#allocation5 + $0x138] sm:$0xff]   ;;  %p7021_p2 = pnand %p7020_p11, %p10253_p0  ;;  %s7023_s10 = sshll.u32 %s7096_s11, 4  ;;  %s7024_s10 = int_to_ptr.vmem [resolvable:$false] %s7023_s10 }
  0x74   : > { %5348 = vmatprep.subr.bf16.mxu1 %v6712_v9  ;;  %v6728_v25 = vld [vmem:[#allocation5 + $0x70] sm:$0xff]   ;;  %v6732_v29 = vld [vmem:[#allocation5 + $0x78] sm:$0xff]   ;;  %v327_v32 = vld [vmem:[%s7324_s19] sm:$0xf]  ;;  %s7025_s13 = scalar_lea.vmem %s7024_s10, 8192  ;;  %p7026_p7 = scmp.lt.s32.totalorder %s9966_s18, %s7024_s10 }
  0x75   : > { %v6729_v26 = vld [vmem:[#allocation5 + $0xf0] sm:$0xff]   ;;  %v6733_v30 = vld [vmem:[#allocation5 + $0xf8] sm:$0xff]   ;;  %v7336_v33 = vld [vmem:[%s7324_s19 + $0x4] sm:$0xf]  ;;  %v5006_v37 = vcombine.low %v327_v32, %v327_v32  ;;  %p7022_p3 = pneg %p7021_p2  ;;  %p7027_p9 = scmp.lt.s32.totalorder %s7025_s13, %s7019_s29 }
  0x76   : > { %5213 = vmatpush3.bf16.msra.mxu0 %v6713_v10  ;;  %v6730_v27 = vld [vmem:[#allocation5 + $0x30] sm:$0xff]   ;;  %v6734_v31 = vld [vmem:[#allocation5 + $0x38] sm:$0xff]   ;;  %v329_v34 = vld [vmem:[%s7324_s19 + $0x8] sm:$0xf]  ;;  %v7340_v35 = vcombine.low %v327_v32, %v7336_v33 }
  0x77   : > { %5349 = vmatpush3.bf16.msra.mxu1 %v6714_v11  ;;  %5214 = vmatprep.subr.bf16.mxu0 %v6715_v12  ;;  %v330_v36 = vld [vmem:[%s7324_s19 + $0xc] sm:$0xf]  ;;  %v6738_v39 = vld [vmem:[#allocation5 + $0x140] sm:$0xff]   ;;  %v5005_v40 = vcombine.low %v329_v34, %v329_v34  ;;  %v331_v43 = vld [vmem:[%s7324_s19 + $0x10] sm:$0xf]  ;;  %v411_v47 = vshrl.u32 %v5006_v37, 16  ;;  %p7028_p12 = por %p7027_p9, %p7026_p7 }
  0x78   : > { %5350 = vmatprep.subr.bf16.mxu1 %v6716_v13  ;;  %v7343_v38 = vcombine.low %v329_v34, %v330_v36  ;;  %1118 = vmatprep.mubr.bf16.mxu0 %v7340_v35  ;;  %v527_v41 = vshrl.u32 %v7340_v35, 16  ;;  %v530_v42 = vshll.u32 %v7340_v35, 16  ;;  %v332_v46 = vld [vmem:[%s7324_s19 + $0x14] sm:$0xf]  ;;  %vm7356_vm2 = vmand %vm647_vm0, %vm648_vm1  ;;  %v6758_v55 = vld [vmem:[#allocation5 + $0x80] sm:$0xff]   ;;  %v5007_v1 = vcombine.low %v331_v43, %v331_v43 }
  0x79   : > { %v10103_v49 = vsel %vm7356_vm2, 4294967295, %v10102_v49  ;;  %v408_v50 = vshrl.u32 %v5005_v40, 16  ;;  %v7364_v53 = vcombine.low %v331_v43, %v332_v46  ;;  %v6742_v57 = vld [vmem:[#allocation5 + $0x148] sm:$0xff]   ;;  %v333_v61 = vld [vmem:[%s7324_s19 + $0x18] sm:$0xf]  ;;  %v6747_v63 = vld [vmem:[#allocation5 + $0x150] sm:$0xff]   ;;  %p7029_p1 = pnand %p7028_p12, %p7022_p3 }
  0x7a   : > { %5215 = vmatpush3.bf16.msra.mxu0 %v6717_v14  ;;  %10101 = vst [vmem:[#allocation12_spill] sm:$0xff] %v7343_v38  ;;  %1584 = vmatprep.mubr.bf16.mxu1 %v7343_v38  ;;  %v520_v44 = vshrl.u32 %v7343_v38, 16  ;;  %v523_v45 = vshll.u32 %v7343_v38, 16  ;;  %v529_v48 = vrot.slane %v527_v41, 7  ;;  %10104 = vst [vmem:[#allocation13_spill] sm:$0xff] %v10103_v49  ;;  %v6764_v60 = vld [vmem:[#allocation5 + $0x88] sm:$0xff]  }
  0x7b   : > { %5351 = vmatpush3.bf16.msra.mxu1 %v6718_v15  ;;  %5216 = vmatprep.subr.bf16.mxu0 %v6719_v16  ;;  %10105 = vst [vmem:[#allocation14_spill] sm:$0xff] %v7364_v53  ;;  %v534_v59 = vshrl.u32 %v7364_v53, 16  ;;  %v7380_v62 = vld [vmem:[%s7324_s19 + $0x1c] sm:$0xf]  ;;  %v6770_v0 = vld [vmem:[#allocation5 + $0x90] sm:$0xff]   ;;  %v537_v3 = vshll.u32 %v7364_v53, 16  ;;  %v5008_v15 = vcombine.low %v333_v61, %v333_v61  ;;  %vm7492_vm5 = vmand %vm810_vm3, %vm811_vm4 }
  0x7c   : > { %5352 = vmatprep.subr.bf16.mxu1 %v6720_v17  ;;  %v522_v51 = vrot.slane %v520_v44, 7  ;;  %v532_v52 = vor.u32 %v530_v42, %v529_v48  ;;  %v7386_v4 = vcombine.low %v333_v61, %v7380_v62  ;;  %v335_v5 = vld [vmem:[%s7324_s19 + $0x20] sm:$0xf]  ;;  %v7390_v6 = vld [vmem:[%s7324_s19 + $0x24] sm:$0xf]  ;;  %v6752_v7 = vld [vmem:[#allocation5 + $0x158] sm:$0xff]  }
  0x7d   : > { %v536_v2 = vrot.slane %v534_v59, 7  ;;  %v6773_v8 = vld [vmem:[#allocation5 + $0x98] sm:$0xff]   ;;  %v414_v9 = vshrl.u32 %v5007_v1, 16  ;;  %v7399_v12 = vcombine.low %v335_v5, %v7390_v6  ;;  %v337_v13 = vld [vmem:[%s7324_s19 + $0x28] sm:$0xf]  ;;  %v6757_v14 = vld [vmem:[#allocation5 + $0x160] sm:$0xff]  }
  0x7e   : > { %5217 = vmatpush3.bf16.msra.mxu0 %v6721_v18  ;;  %v525_v54 = vor.u32 %v523_v45, %v522_v51  ;;  %v651_v56 = vsel %vm7356_vm2, %v411_v47, %v532_v52  ;;  %10107 = vst [vmem:[#allocation16_spill] sm:$0xff] %v7386_v4  ;;  %v541_v11 = vshrl.u32 %v7386_v4, 16  ;;  %v7403_v16 = vld [vmem:[%s7324_s19 + $0x2c] sm:$0xf]  ;;  %v6777_v17 = vld [vmem:[#allocation5 + $0xa0] sm:$0xff]   ;;  %v417_v32 = vshrl.u32 %v5008_v15, 16 }
  0x7f   : > { %5353 = vmatpush3.bf16.msra.mxu1 %v6722_v19  ;;  %5218 = vmatprep.subr.bf16.mxu0 %v6723_v20  ;;  %v539_v10 = vor.u32 %v537_v3, %v536_v2  ;;  %10108 = vst [vmem:[#allocation17_spill] sm:$0xff] %v7399_v12  ;;  %v544_v20 = vshll.u32 %v7386_v4, 16  ;;  %v551_v40 = vshll.u32 %v7399_v12, 16  ;;  %v7441_v46 = vld [vmem:[%s7324_s19 + $0x3c] sm:$0xf]  ;;  %v6769_v47 = vld [vmem:[#allocation5 + $0x170] sm:$0xff]  }
  0x80   : > { %5354 = vmatprep.subr.bf16.mxu1 %v6724_v21  ;;  %v7372_v58 = vsel %vm7356_vm2, %v408_v50, %v525_v54  ;;  %v543_v19 = vrot.slane %v541_v11, 7  ;;  %v5009_v21 = vcombine.low %v335_v5, %v335_v5  ;;  %v7447_v51 = vld [vmem:[%s7324_s19 + $0x40] sm:$0xf]  ;;  %v6781_v52 = vld [vmem:[#allocation5 + $0xb0] sm:$0xff]   ;;  %v7471_v5 = vld [vmem:[%s7324_s19 + $0x48] sm:$0xf] }
  0x81   : > { %10106 = vst [vmem:[#allocation15_spill] sm:$0xff] %v7372_v58  ;;  %v7407_v18 = vsel %vm7356_vm2, %v414_v9, %v539_v10  ;;  %v7480_v10 = vld [vmem:[%s7324_s19 + $0x4c] sm:$0xf]  ;;  %v6785_v15 = vld [vmem:[#allocation5 + $0x1c0] sm:$0xff]  }
  0x82   : > { %5219 = vmatpush3.bf16.msra.mxu0 %v6725_v22  ;;  %10109 = vst [vmem:[#allocation18_spill] sm:$0xff] %v7407_v18  ;;  %v339_v22 = vld [vmem:[%s7324_s19 + $0x30] sm:$0xf]  ;;  %v546_v34 = vor.u32 %v544_v20, %v543_v19  ;;  %v420_v36 = vshrl.u32 %v5009_v21, 16  ;;  %v10113_v21 = vmov 0 }
  0x83   : > { %5355 = vmatpush3.bf16.msra.mxu1 %v6726_v23  ;;  %5220 = vmatprep.subr.bf16.mxu0 %v6727_v24  ;;  %v7414_v23 = vld [vmem:[%s7324_s19 + $0x34] sm:$0xf]  ;;  %v548_v24 = vshrl.u32 %v7399_v12, 16  ;;  %v5011_v37 = vcombine.low %v339_v22, %v339_v22  ;;  %v10114_v21 = vsel %vm7492_vm5, 4294967295, %v10113_v21 }
  0x84   : > { %5356 = vmatprep.subr.bf16.mxu1 %v6728_v25  ;;  %v6763_v25 = vld [vmem:[#allocation5 + $0x168] sm:$0xff]   ;;  %10115 = vst [vmem:[#allocation22_spill] sm:$0xff] %v10114_v21 }
  0x86   : > { %5221 = vmatpush3.bf16.msra.mxu0 %v6729_v26  ;;  %v668_v26 = vrot.slane %v530_v42, 1  ;;  %v341_v42 = vld [vmem:[%s7324_s19 + $0x38] sm:$0xf] }
  0x87   : > { %5357 = vmatpush3.bf16.msra.mxu1 %v6730_v27  ;;  %5222 = vmatprep.subr.bf16.mxu0 %v6731_v28  ;;  %v7420_v27 = vcombine.low %v337_v13, %v7403_v16  ;;  %v5010_v28 = vcombine.low %v337_v13, %v337_v13  ;;  %v7463_v61 = vcombine.low %v341_v42, %v7441_v46  ;;  %v7484_v13 = vld [vmem:[%s7324_s19 + $0x50] sm:$0xf] }
  0x88   : > { %5358 = vmatprep.subr.bf16.mxu1 %v6732_v29  ;;  %v7424_v29 = vcombine.low %v339_v22, %v7414_v23 }
  0x89   : > { %10110 = vst [vmem:[#allocation19_spill] sm:$0xff] %v7420_v27  ;;  %v555_v43 = vshrl.u32 %v7420_v27, 16  ;;  %v7443_v48 = vshrl.u32 %v5010_v28, 16  ;;  %v569_v19 = vshrl.u32 %v7463_v61, 16  ;;  %v10048_v28 = vshll.u32 %v7463_v61, 16 }
  0x8a   : > { %5223 = vmatpush3.bf16.msra.mxu0 %v6733_v30  ;;  %10111 = vst [vmem:[#allocation20_spill] sm:$0xff] %v7424_v29  ;;  %v6778_v30 = vld [vmem:[#allocation5 + $0xa8] sm:$0xff]   ;;  %v562_v50 = vshrl.u32 %v7424_v29, 16 }
  0x8b   : > { %5359 = vmatpush3.bf16.msra.mxu1 %v6734_v31  ;;  %6024 = vmatprep.subr.bf16.mxu0 %v6738_v39  ;;  %v5038_v31 = vcombine.low %v7336_v33, %v7336_v33  ;;  %v669_v33 = vor.u32 %v668_v26, %v527_v41  ;;  %v558_v41 = vshll.u32 %v7420_v27, 16 }
  0x8c   : > { %6072 = vmatprep.subr.bf16.mxu1 %v6758_v55  ;;  %v7468_v2 = vrot.slane %v562_v50, 7 }
  0x8d   : > { %1119 = vmatmul.mubr.bf16.vlgmr.msra.gmra.mrb[0].mxu0 %v651_v56  ;;  %v735_v54 = vshll.u32 %v5038_v31, 16  ;;  %v7515_v31 = vcombine.low %v7471_v5, %v7480_v10 }
  0x8e   : > { %1585 = vmatmul.mubr.bf16.vlgmr.msra.gmra.mrb[0].mxu1 %v7372_v58  ;;  %6025 = vmatpush3.bf16.msra.mxu0 %v6738_v39  ;;  %v550_v39 = vrot.slane %v548_v24, 7 }
  0x8f   : > { %1126 = vmatprep.mubr.bf16.mxu0 %v7343_v38  ;;  %1592 = vmatprep.mubr.bf16.mxu1 %v7340_v35  ;;  %v7451_v35 = vsel %vm7356_vm2, %v417_v32, %v546_v34  ;;  %v670_v32 = vrot.slane %v537_v3, 1  ;;  %v7520_v34 = vld [vmem:[%s7324_s19 + $0x58] sm:$0xf] }
  0x90   : > { %6026 = vmatprep.subr.bf16.mxu0 %v6742_v57  ;;  %6073 = vmatpush3.bf16.msra.mxu1 %v6758_v55  ;;  %10112 = vst [vmem:[#allocation21_spill] sm:$0xff] %v7451_v35  ;;  %v7454_v55 = vshrl.u32 %v5011_v37, 16  ;;  %v553_v1 = vor.u32 %v551_v40, %v550_v39  ;;  %v7529_v39 = vld [vmem:[%s7324_s19 + $0x5c] sm:$0xf] }
  0x91   : > { %6074 = vmatprep.subr.bf16.mxu1 %v6764_v60 }
  0x92   : > { %6027 = vmatpush3.bf16.msra.mxu0 %v6742_v57  ;;  %v557_v57 = vrot.slane %v555_v43, 7  ;;  %v7498_v22 = vsel %vm7356_vm2, %v420_v36, %v553_v1  ;;  %v672_v36 = vrot.slane %v544_v20, 1  ;;  %v7538_v20 = vld [vmem:[%s7324_s19 + $0x60] sm:$0xf]  ;;  %v680_v1 = vrot.slane %v10048_v28, 1 }
  0x93   : > { %6028 = vmatprep.subr.bf16.mxu0 %v6747_v63  ;;  %10116 = vst [vmem:[#allocation23_spill] sm:$0xff] %v7498_v22  ;;  %v571_v28 = vrot.slane %v569_v19, 7 }
  0x94   : > { %6075 = vmatpush3.bf16.msra.mxu1 %v6764_v60  ;;  %v565_v60 = vshll.u32 %v7424_v29, 16  ;;  %v560_v3 = vor.u32 %v558_v41, %v557_v57  ;;  %v7556_v57 = vld [vmem:[%s7324_s19 + $0x64] sm:$0xf] }
  0x95   : > { %1127 = vmatmul.mubr.bf16.gmra.mrb[4].mxu0 %v7372_v58  ;;  %6076 = vmatprep.subr.bf16.mxu1 %v6770_v0 }
  0x96   : > { %1593 = vmatmul.mubr.bf16.gmra.mrb[4].mxu1 %v651_v56  ;;  %1134 = vmatprep.mubr.bf16.mxu0 %v7364_v53  ;;  %v7457_v56 = vld [vmem:[%s7324_s19 + $0x44] sm:$0xf] }
  0x97   : > { %1600 = vmatprep.mubr.bf16.mxu1 %v7343_v38  ;;  %6029 = vmatpush3.bf16.msra.mxu0 %v6747_v63  ;;  %v5012_v63 = vcombine.low %v341_v42, %v341_v42  ;;  %v7477_v9 = vcombine.low %v7447_v51, %v7457_v56  ;;  %v7533_v42 = vor.u32 %v670_v32, %v534_v59  ;;  %v10045_v59 = vshrl.u32 %v7515_v31, 16 }
  0x98   : > { %6030 = vmatprep.subr.bf16.mxu0 %v6752_v7  ;;  %6077 = vmatpush3.bf16.msra.mxu1 %v6770_v0  ;;  %v6776_v0 = vld [vmem:[#allocation5 + $0x178] sm:$0xff]  }
  0x99   : > { %6078 = vmatprep.subr.bf16.mxu1 %v6773_v8 }
  0x9b   : > { %6031 = vmatpush3.bf16.msra.mxu0 %v6752_v7  ;;  %v6782_v7 = vld [vmem:[#allocation5 + $0xb8] sm:$0xff]  }
  0x9c   : > { %6032 = vmatprep.subr.bf16.mxu0 %v6757_v14  ;;  %6079 = vmatpush3.bf16.msra.mxu1 %v6773_v8  ;;  %v737_v8 = vrot.slane %v735_v54, 4  ;;  %v676_v54 = vrot.slane %v558_v41, 1 }
  0x9d   : > { %1135 = vmatmul.mubr.bf16.gmra.mrb[8].mxu0 %v7407_v18  ;;  %6080 = vmatprep.subr.bf16.mxu1 %v6777_v17 }
  0x9e   : > { %1601 = vmatmul.mubr.bf16.gmra.mrb[8].mxu1 %v7372_v58  ;;  %1142 = vmatprep.mubr.bf16.mxu0 %v7386_v4  ;;  %v7568_v41 = vor.u32 %v676_v54, %v555_v43 }
  0x9f   : > { %1608 = vmatprep.mubr.bf16.mxu1 %v7364_v53  ;;  %6033 = vmatpush3.bf16.msra.mxu0 %v6757_v14  ;;  %v666_v14 = vrot.slane %v523_v45, 1  ;;  %v7505_v45 = vsel %vm7492_vm5, %v669_v33, %v737_v8  ;;  %v10042_v33 = vshll.u32 %v7477_v9, 16  ;;  %v5015_v53 = vcombine.low %v7484_v13, %v7484_v13 }
  0xa0   : > { %6034 = vmatprep.subr.bf16.mxu0 %v6763_v25  ;;  %6081 = vmatpush3.bf16.msra.mxu1 %v6777_v17  ;;  %v7488_v17 = vshrl.u32 %v5012_v63, 16 }
  0xa1   : > { %6082 = vmatprep.subr.bf16.mxu1 %v6778_v30  ;;  %v7509_v26 = vor.u32 %v666_v14, %v520_v44  ;;  %v674_v44 = vrot.slane %v551_v40, 1  ;;  %v7542_v40 = vor.u32 %v672_v36, %v541_v11  ;;  %v10043_v11 = vshll.u32 %v7515_v31, 16  ;;  %v7579_v14 = vld [vmem:[%s7324_s19 + $0x68] sm:$0xf] }
  0xa2   : > { %v682_v43 = vrot.slane %v10042_v33, 1 }
  0xa3   : > { %6035 = vmatpush3.bf16.msra.mxu0 %v6763_v25  ;;  %v7501_v25 = vld [vmem:[%s7324_s19 + $0x54] sm:$0xf] }
  0xa4   : > { %6036 = vmatprep.subr.bf16.mxu0 %v6769_v47  ;;  %6083 = vmatpush3.bf16.msra.mxu1 %v6778_v30  ;;  %v10044_v30 = vshrl.u32 %v7477_v9, 16  ;;  %v7526_v37 = vcombine.low %v7484_v13, %v7501_v25 }
  0xa5   : > { %1143 = vmatmul.mubr.bf16.gmra.mrb[12].mxu0 %v7451_v35  ;;  %6084 = vmatprep.subr.bf16.mxu1 %v6781_v52 }
  0xa6   : > { %1609 = vmatmul.mubr.bf16.gmra.mrb[12].mxu1 %v7407_v18  ;;  %1150 = vmatprep.mubr.bf16.mxu0 %v7399_v12  ;;  %v10052_v63 = vshrl.u32 %v7526_v37, 16  ;;  %v10046_v8 = vshll.u32 %v7526_v37, 16 }
  0xa7   : > { %1616 = vmatprep.mubr.bf16.mxu1 %v7386_v4  ;;  %6037 = vmatpush3.bf16.msra.mxu0 %v6769_v47  ;;  %v7546_v47 = vor.u32 %v674_v44, %v548_v24  ;;  %v678_v24 = vrot.slane %v565_v60, 1  ;;  %v7597_v44 = vor.u32 %v680_v1, %v569_v19  ;;  %v567_v1 = vor.u32 %v565_v60, %v7468_v2  ;;  %v7633_v60 = vld [vmem:[%s7324_s19 + $0x78] sm:$0xf]  ;;  %v358_v2 = vld [vmem:[%s7324_s19 + $0x7c] sm:$0xf] }
  0xa8   : > { %6038 = vmatprep.subr.bf16.mxu0 %v6776_v0  ;;  %6085 = vmatpush3.bf16.msra.mxu1 %v6781_v52  ;;  %v7548_v52 = vld [vmem:[#allocation5 + $0x200] sm:$0xff]  }
  0xa9   : > { %6086 = vmatprep.subr.bf16.mxu1 %v6782_v7  ;;  %v7586_v32 = vor.u32 %v678_v24, %v562_v50  ;;  %v7603_v50 = vor.u32 %v682_v43, %v10044_v30  ;;  %v686_v43 = vrot.slane %v10046_v8, 1  ;;  %v7661_v24 = vcombine.low %v7633_v60, %v358_v2 }
  0xab   : > { %6039 = vmatpush3.bf16.msra.mxu0 %v6776_v0  ;;  %v7564_v0 = vcombine.low %v7520_v34, %v7529_v39  ;;  %v7638_v8 = vor.u32 %v686_v43, %v10052_v63  ;;  %v625_v13 = vshrl.u32 %v7661_v24, 16 }
  0xac   : > { %6087 = vmatpush3.bf16.msra.mxu1 %v6782_v7  ;;  %5480 = vmatprep.subr.bf16.mxu0 %v6785_v15  ;;  %v7575_v7 = vsel %vm7356_vm2, %v7443_v48, %v560_v3  ;;  %v7582_v15 = vld [vmem:[%s7324_s19 + $0x6c] sm:$0xf]  ;;  %v7593_v48 = vcombine.low %v7538_v20, %v7556_v57  ;;  %v684_v3 = vrot.slane %v10043_v11, 1  ;;  %v7616_v11 = vld [vmem:[%s7324_s19 + $0x70] sm:$0xf] }
  0xad   : > { %1151 = vmatmul.mubr.bf16.gmra.mrb[16].mxu0 %v7498_v22  ;;  %6120 = vmatprep.subr.bf16.mxu1 %v7548_v52  ;;  %10117 = vst [vmem:[#allocation24_spill] sm:$0xff] %v7575_v7  ;;  %10118 = vst [vmem:[#allocation25_spill] sm:$0xff] %v7582_v15  ;;  %v10047_v36 = vshll.u32 %v7564_v0, 16  ;;  %v597_v54 = vshrl.u32 %v7564_v0, 16 }
  0xae   : > { %1617 = vmatmul.mubr.bf16.gmra.mrb[16].mxu1 %v7451_v35  ;;  %1158 = vmatprep.mubr.bf16.mxu0 %v7420_v27  ;;  %v7609_v33 = vor.u32 %v684_v3, %v10045_v59  ;;  %v7626_v3 = vcombine.low %v7579_v14, %v7582_v15  ;;  %v7629_v59 = vld [vmem:[%s7324_s19 + $0x74] sm:$0xf]  ;;  %v10121_v43 = vshll.u32 %v7593_v48, 16 }
  0xaf   : > { %1624 = vmatprep.mubr.bf16.mxu1 %v7399_v12  ;;  %v688_v30 = vrot.slane %v10047_v36, 1  ;;  %10119 = vst [vmem:[#allocation26_spill] sm:$0xff] %v7629_v59  ;;  %v604_v12 = vshrl.u32 %v7593_v48, 16  ;;  %v7658_v19 = vcombine.low %v7616_v11, %v7629_v59 }
  0xb0   : > { %v690_v63 = vrot.slane %v10121_v43, 1 }
  0xb1   : > { %v7640_v36 = vor.u32 %v688_v30, %v597_v54  ;;  %v611_v30 = vshrl.u32 %v7626_v3, 16  ;;  %v10060_v4 = vshll.u32 %v7658_v19, 16 }
  0xb2   : > { %v7665_v35 = vor.u32 %v690_v63, %v604_v12  ;;  %v10125_v63 = vshll.u32 %v7463_v61, 16 }
  0xb3   : > { %10120 = vst [vmem:[#allocation27_spill] sm:$0xff] %v7640_v36  ;;  %v694_v43 = vrot.slane %v10060_v4, 1  ;;  %v438_v4 = vshrl.u32 %v5015_v53, 16 }
  0xb4   : > { %10123 = vst [vmem:[#allocation28_spill] sm:$0xff] %v7665_v35  ;;  %v10127_v35 = vshrl.u32 %v7477_v9, 16 }
  0xb5   : > { %1159 = vmatmul.mubr.bf16.gmra.mrb[20].mxu0 %v7575_v7 }
  0xb6   : > { %1625 = vmatmul.mubr.bf16.gmra.mrb[20].mxu1 %v7498_v22  ;;  %1166 = vmatprep.mubr.bf16.mxu0 %v7424_v29  ;;  %v7648_v22 = vsel %vm7356_vm2, %v7454_v55, %v567_v1  ;;  %v10122_v55 = vshll.u32 %v7626_v3, 16 }
  0xb7   : > { %1632 = vmatprep.mubr.bf16.mxu1 %v7420_v27  ;;  %v5013_v27 = vcombine.low %v7447_v51, %v7447_v51  ;;  %v5014_v51 = vcombine.low %v7471_v5, %v7471_v5  ;;  %v618_v5 = vshrl.u32 %v7658_v19, 16 }
  0xb8   : > { %v692_v1 = vrot.slane %v10122_v55, 1  ;;  %v574_v55 = vor.u32 %v10125_v63, %v571_v28  ;;  %v578_v28 = vrot.slane %v10127_v35, 7  ;;  %v5017_v63 = vcombine.low %v7538_v20, %v7538_v20 }
  0xb9   : > { %v432_v58 = vshrl.u32 %v5013_v27, 16  ;;  %v435_v27 = vshrl.u32 %v5014_v51, 16  ;;  %v7693_v36 = vor.u32 %v694_v43, %v618_v5  ;;  %v10130_v35 = vshrl.u32 %v7526_v37, 16 }
  0xba   : > { %v7671_v18 = vor.u32 %v692_v1, %v611_v30  ;;  %v5016_v1 = vcombine.low %v7520_v34, %v7520_v34  ;;  %v7700_v59 = vsel %vm7356_vm2, %v7488_v17, %v574_v55  ;;  %v5018_v20 = vcombine.low %v7579_v14, %v7579_v14 }
  0xbb   : > { %10128 = vst [vmem:[#allocation30_spill] sm:$0xff] %v7693_v36  ;;  %v592_v51 = vrot.slane %v10130_v35, 7  ;;  %v599_v36 = vrot.slane %v597_v54, 7  ;;  %v444_v15 = vshrl.u32 %v5017_v63, 16  ;;  %v606_v55 = vrot.slane %v604_v12, 7 }
  0xbc   : > { %10124 = vst [vmem:[#allocation29_spill] sm:$0xff] %v7671_v18  ;;  %v5052_v18 = vcombine.low %v358_v2, %v358_v2  ;;  %v441_v43 = vshrl.u32 %v5016_v1, 16  ;;  %v613_v14 = vrot.slane %v611_v30, 7  ;;  %v620_v1 = vrot.slane %v618_v5, 7 }
  0xbd   : > { %1167 = vmatmul.mubr.bf16.gmra.mrb[24].mxu0 %v7648_v22  ;;  %v10136_v35 = vshll.u32 %v7626_v3, 16 }
  0xbe   : > { %1633 = vmatmul.mubr.bf16.gmra.mrb[24].mxu1 %v7575_v7  ;;  %1174 = vmatprep.mubr.bf16.mxu0 %v7463_v61  ;;  %v10126_v7 = vshll.u32 %v7661_v24, 16  ;;  %v791_v34 = vshll.u32 %v5052_v18, 16 }
  0xbf   : > { %1640 = vmatprep.mubr.bf16.mxu1 %v7424_v29 }
  0xc0   : > { %v696_v38 = vrot.slane %v10126_v7, 1  ;;  %v10129_v7 = vshrl.u32 %v7515_v31, 16  ;;  %v793_v53 = vrot.slane %v791_v34, 4 }
  0xc2   : > { %v697_v29 = vor.u32 %v696_v38, %v625_v13  ;;  %v585_v2 = vrot.slane %v10129_v7, 7  ;;  %v10131_v38 = vshll.u32 %v7477_v9, 16  ;;  %v447_v7 = vshrl.u32 %v5018_v20, 16 }
  0xc4   : > { %v581_v18 = vor.u32 %v10131_v38, %v578_v28  ;;  %v7713_v17 = vsel %vm7492_vm5, %v697_v29, %v793_v53  ;;  %v10132_v29 = vshll.u32 %v7515_v31, 16  ;;  %v10137_v53 = vshll.u32 %v7658_v19, 16 }
  0xc5   : > { %1175 = vmatmul.mubr.bf16.gmra.mrb[28].mxu0 %v7700_v59 }
  0xc6   : > { %1641 = vmatmul.mubr.bf16.gmra.mrb[28].mxu1 %v7648_v22  ;;  %1182 = vmatprep.mubr.bf16.mxu0 %v7477_v9  ;;  %v7720_v54 = vsel %vm7356_vm2, %v432_v58, %v581_v18  ;;  %v588_v28 = vor.u32 %v10132_v29, %v585_v2  ;;  %v10133_v58 = vshll.u32 %v7526_v37, 16  ;;  %v623_v38 = vor.u32 %v10137_v53, %v620_v1  ;;  %v6899_v18 = vld [vmem:[%s7324_s19 + $0xc] sm:$0xf] }
  0xc7   : > { %1648 = vmatprep.mubr.bf16.mxu1 %v7463_v61 }
  0xc8   : > { %v7730_v12 = vsel %vm7356_vm2, %v435_v27, %v588_v28  ;;  %v595_v30 = vor.u32 %v10133_v58, %v592_v51  ;;  %v10134_v27 = vshll.u32 %v7564_v0, 16  ;;  %v616_v51 = vor.u32 %v10136_v35, %v613_v14 }
  0xc9   : > { %v627_v14 = vrot.slane %v625_v13, 7  ;;  %v10138_v28 = vshll.u32 %v7661_v24, 16  ;;  %v5041_v35 = vcombine.low %v7390_v6, %v7390_v6  ;;  %v5042_v6 = vcombine.low %v7403_v16, %v7403_v16 }
  0xca   : > { %v7740_v5 = vsel %vm7356_vm2, %v438_v4, %v595_v30  ;;  %v602_v63 = vor.u32 %v10134_v27, %v599_v36  ;;  %v10135_v4 = vshll.u32 %v7593_v48, 16  ;;  %v7770_v20 = vsel %vm7356_vm2, %v447_v7, %v616_v51  ;;  %v6900_v27 = vld [vmem:[%s7324_s19 + $0x14] sm:$0xf] }
  0xcb   : > { %v630_v58 = vor.u32 %v10138_v28, %v627_v14  ;;  %v6793_v14 = vld [vmem:[#allocation5 + $0x1d0] sm:$0xff]   ;;  %v751_v16 = vshll.u32 %v5042_v6, 16 }
  0xcc   : > { %v7750_v34 = vsel %vm7356_vm2, %v441_v43, %v602_v63  ;;  %v609_v2 = vor.u32 %v10135_v4, %v606_v55  ;;  %v5019_v43 = vcombine.low %v7616_v11, %v7616_v11  ;;  %v5037_v55 = vcombine.low %v6899_v18, %v6899_v18  ;;  %v6804_v18 = vld [vmem:[#allocation5 + $0x208] sm:$0xff]   ;;  %v6794_v28 = vld [vmem:[#allocation5 + $0x190] sm:$0xff]  }
  0xcd   : > { %1183 = vmatmul.mubr.bf16.gmra.mrb[32].mxu0 %v7720_v54  ;;  %v5020_v11 = vcombine.low %v7633_v60, %v7633_v60  ;;  %v5039_v63 = vcombine.low %v6900_v27, %v6900_v27  ;;  %v6798_v27 = vld [vmem:[#allocation5 + $0x198] sm:$0xff]   ;;  %v6820_v6 = vld [vmem:[#allocation5 + $0x230] sm:$0xff]  }
  0xce   : > { %1649 = vmatmul.mubr.bf16.gmra.mrb[32].mxu1 %v7700_v59  ;;  %1190 = vmatprep.mubr.bf16.mxu0 %v7515_v31  ;;  %v7760_v36 = vsel %vm7356_vm2, %v444_v15, %v609_v2  ;;  %v450_v15 = vshrl.u32 %v5019_v43, 16  ;;  %v731_v29 = vshll.u32 %v5037_v55, 16  ;;  %v5040_v2 = vcombine.low %v7380_v62, %v7380_v62  ;;  %v6786_v43 = vld [vmem:[#allocation5 + $0x180] sm:$0xff]   ;;  %v6790_v55 = vld [vmem:[#allocation5 + $0x188] sm:$0xff]  }
  0xcf   : > { %1656 = vmatprep.mubr.bf16.mxu1 %v7477_v9  ;;  %v453_v1 = vshrl.u32 %v5020_v11, 16  ;;  %v739_v4 = vshll.u32 %v5039_v63, 16  ;;  %v5045_v63 = vcombine.low %v7457_v56, %v7457_v56  ;;  %v6807_v56 = vld [vmem:[#allocation5 + $0x1e8] sm:$0xff]  }
  0xd0   : > { %v7783_v7 = vsel %vm7356_vm2, %v450_v15, %v623_v38  ;;  %v733_v30 = vrot.slane %v731_v29, 4  ;;  %v743_v15 = vshll.u32 %v5040_v2, 16  ;;  %v6789_v38 = vld [vmem:[#allocation5 + $0x1c8] sm:$0xff]   ;;  %v6814_v2 = vld [vmem:[#allocation5 + $0x220] sm:$0xff]  }
  0xd1   : > { %v7798_v60 = vsel %vm7356_vm2, %v453_v1, %v630_v58  ;;  %v741_v51 = vrot.slane %v739_v4, 4  ;;  %v6797_v58 = vld [vmem:[#allocation5 + $0x1d8] sm:$0xff]   ;;  %v6801_v4 = vld [vmem:[#allocation5 + $0x1e0] sm:$0xff]  }
  0xd2   : > { %v7803_v13 = vsel %vm7492_vm5, %v7509_v26, %v733_v30  ;;  %v747_v26 = vshll.u32 %v5041_v35, 16  ;;  %v745_v62 = vrot.slane %v743_v15, 4  ;;  %v5044_v30 = vcombine.low %v7441_v46, %v7441_v46  ;;  %v6803_v15 = vld [vmem:[#allocation5 + $0x1a0] sm:$0xff]  }
  0xd3   : > { %v7816_v53 = vsel %vm7492_vm5, %v7533_v42, %v741_v51  ;;  %v5043_v42 = vcombine.low %v7414_v23, %v7414_v23 }
  0xd4   : > { %v749_v11 = vrot.slane %v747_v26, 4  ;;  %v7830_v29 = vsel %vm7492_vm5, %v7542_v40, %v745_v62  ;;  %v753_v40 = vrot.slane %v751_v16, 4  ;;  %v759_v51 = vshll.u32 %v5044_v30, 16  ;;  %v6816_v26 = vld [vmem:[#allocation5 + $0x228] sm:$0xff]   ;;  %v6822_v16 = vld [vmem:[#allocation5 + $0x238] sm:$0xff]  }
  0xd5   : > { %1191 = vmatmul.mubr.bf16.gmra.mrb[36].mxu0 %v7730_v12  ;;  %v755_v23 = vshll.u32 %v5043_v42, 16  ;;  %v6809_v62 = vld [vmem:[#allocation5 + $0x1a8] sm:$0xff]  }
  0xd6   : > { %1657 = vmatmul.mubr.bf16.gmra.mrb[36].mxu1 %v7720_v54  ;;  %1198 = vmatprep.mubr.bf16.mxu0 %v7526_v37  ;;  %v7835_v1 = vsel %vm7492_vm5, %v7546_v47, %v749_v11  ;;  %v7848_v35 = vsel %vm7492_vm5, %v7568_v41, %v753_v40  ;;  %v761_v41 = vrot.slane %v759_v51, 4 }
  0xd7   : > { %1664 = vmatprep.mubr.bf16.mxu1 %v7515_v31  ;;  %v757_v47 = vrot.slane %v755_v23, 4  ;;  %v5049_v23 = vcombine.low %v7556_v57, %v7556_v57 }
  0xd8   : > { %v7866_v11 = vsel %vm7492_vm5, %v7597_v44, %v761_v41 }
  0xd9   : > { %v7853_v46 = vsel %vm7492_vm5, %v7586_v32, %v757_v47  ;;  %v779_v30 = vshll.u32 %v5049_v23, 16  ;;  %v10139_v47 = vld [vmem:[#allocation25_spill] sm:$0xff] }
  0xdd   : > { %1199 = vmatmul.mubr.bf16.gmra.mrb[40].mxu0 %v7740_v5 }
  0xde   : > { %1665 = vmatmul.mubr.bf16.gmra.mrb[40].mxu1 %v7730_v12  ;;  %1206 = vmatprep.mubr.bf16.mxu0 %v7564_v0 }
  0xdf   : > { %1672 = vmatprep.mubr.bf16.mxu1 %v7526_v37 }
  0xe5   : > { %1207 = vmatmul.mubr.bf16.gmra.mrb[44].mxu0 %v7750_v34 }
  0xe6   : > { %1673 = vmatmul.mubr.bf16.gmra.mrb[44].mxu1 %v7740_v5  ;;  %1214 = vmatprep.mubr.bf16.mxu0 %v7593_v48 }
  0xe7   : > { %1680 = vmatprep.mubr.bf16.mxu1 %v7564_v0 }
  0xed   : > { %1215 = vmatmul.mubr.bf16.gmra.mrb[48].mxu0 %v7760_v36 }
  0xee   : > { %1681 = vmatmul.mubr.bf16.gmra.mrb[48].mxu1 %v7750_v34  ;;  %1222 = vmatprep.mubr.bf16.mxu0 %v7626_v3 }
  0xef   : > { %1688 = vmatprep.mubr.bf16.mxu1 %v7593_v48 }
  0xf5   : > { %1223 = vmatmul.mubr.bf16.gmra.mrb[52].mxu0 %v7770_v20 }
  0xf6   : > { %1689 = vmatmul.mubr.bf16.gmra.mrb[52].mxu1 %v7760_v36  ;;  %1230 = vmatprep.mubr.bf16.mxu0 %v7658_v19 }
  0xf7   : > { %1696 = vmatprep.mubr.bf16.mxu1 %v7626_v3 }
  0xfd   : > { %1231 = vmatmul.mubr.bf16.gmra.mrb[56].mxu0 %v7783_v7 }
  0xfe   : > { %1697 = vmatmul.mubr.bf16.gmra.mrb[56].mxu1 %v7770_v20  ;;  %1238 = vmatprep.mubr.bf16.mxu0 %v7661_v24 }
  0xff   : > { %1704 = vmatprep.mubr.bf16.mxu1 %v7658_v19 }
 0x105   : > { %1239 = vmatmul.mubr.bf16.gmra.mrb[60].mxu0 %v7798_v60 }
 0x106   : > { %1705 = vmatmul.mubr.bf16.gmra.mrb[60].mxu1 %v7783_v7  ;;  %6040 = vmatprep.mubr.bf16.mxu0 %v7505_v45 }
 0x107   : > { %6088 = vmatprep.mubr.bf16.mxu1 %v7803_v13 }
 0x10d   : > { %6041 = vmatmul.mubr.bf16.vlgmr.msra.gmra.mrb[64].mxu0 %v7803_v13 }
 0x10e   : > { %6089 = vmatmul.mubr.bf16.vlgmr.msra.gmra.mrb[64].mxu1 %v7505_v45  ;;  %5481 = vmatpush3.bf16.msra.mxu0 %v6786_v43  ;;  %v6808_v45 = vld [vmem:[#allocation5 + $0x210] sm:$0xff]   ;;  %v763_v43 = vshll.u32 %v5045_v63, 16 }
 0x10f   : > { %6044 = vmatprep.mubr.bf16.mxu0 %v7816_v53  ;;  %6092 = vmatprep.mubr.bf16.mxu1 %v7803_v13  ;;  %v10140_v63 = vld [vmem:[#allocation26_spill] sm:$0xff] }
 0x110   : > { %5482 = vmatprep.subr.bf16.mxu0 %v6789_v38  ;;  %6121 = vmatpush3.bf16.msra.mxu1 %v7548_v52  ;;  %v6810_v52 = vld [vmem:[#allocation5 + $0x218] sm:$0xff]   ;;  %v5046_v38 = vcombine.low %v7480_v10, %v7480_v10  ;;  %v765_v32 = vrot.slane %v763_v43, 4  ;;  %v10142_v43 = vld [vmem:[#allocation28_spill] sm:$0xff] }
 0x111   : > { %6122 = vmatprep.subr.bf16.mxu1 %v6804_v18 }
 0x112   : > { %5483 = vmatpush3.bf16.msra.mxu0 %v6790_v55  ;;  %v6813_v55 = vld [vmem:[#allocation5 + $0x1f0] sm:$0xff]   ;;  %v7871_v10 = vsel %vm7492_vm5, %v7603_v50, %v765_v32 }
 0x113   : > { %5484 = vmatprep.subr.bf16.mxu0 %v6793_v14  ;;  %v767_v14 = vshll.u32 %v5046_v38, 16  ;;  %v10143_v38 = vld [vmem:[#allocation29_spill] sm:$0xff] }
 0x114   : > { %6123 = vmatpush3.bf16.msra.mxu1 %v6804_v18  ;;  %v5047_v18 = vcombine.low %v7501_v25, %v7501_v25  ;;  %v6815_v25 = vld [vmem:[#allocation5 + $0x1b0] sm:$0xff]  }
 0x115   : > { %6045 = vmatmul.mubr.bf16.gmra.mrb[68].mxu0 %v7830_v29  ;;  %6124 = vmatprep.subr.bf16.mxu1 %v6808_v45  ;;  %v769_v44 = vrot.slane %v767_v14, 4  ;;  %v10147_v14 = vld [vmem:[#allocation14_spill] sm:$0xff] }
 0x116   : > { %6093 = vmatmul.mubr.bf16.gmra.mrb[68].mxu1 %v7816_v53  ;;  %6048 = vmatprep.mubr.bf16.mxu0 %v7835_v1  ;;  %v771_v42 = vshll.u32 %v5047_v18, 16  ;;  %v10144_v18 = vld [vmem:[#allocation30_spill] sm:$0xff] }
 0x117   : > { %6096 = vmatprep.mubr.bf16.mxu1 %v7830_v29  ;;  %5485 = vmatpush3.bf16.msra.mxu0 %v6794_v28  ;;  %v5048_v28 = vcombine.low %v7529_v39, %v7529_v39 }
 0x118   : > { %5486 = vmatprep.subr.bf16.mxu0 %v6797_v58  ;;  %6125 = vmatpush3.bf16.msra.mxu1 %v6808_v45  ;;  %v6819_v45 = vld [vmem:[#allocation5 + $0x1f8] sm:$0xff]   ;;  %v773_v50 = vrot.slane %v771_v42, 4  ;;  %v10148_v42 = vld [vmem:[#allocation18_spill] sm:$0xff] }
 0x119   : > { %6126 = vmatprep.subr.bf16.mxu1 %v6810_v52  ;;  %v6821_v58 = vld [vmem:[#allocation5 + $0x1b8] sm:$0xff]   ;;  %v775_v40 = vshll.u32 %v5048_v28, 16 }
 0x11a   : > { %v7887_v39 = vsel %vm7492_vm5, %v7638_v8, %v773_v50 }
 0x11b   : > { %5487 = vmatpush3.bf16.msra.mxu0 %v6798_v27  ;;  %v777_v57 = vrot.slane %v775_v40, 4  ;;  %v5050_v27 = vcombine.low %v10139_v47, %v10139_v47 }
 0x11c   : > { %5488 = vmatprep.subr.bf16.mxu0 %v6801_v4  ;;  %6127 = vmatpush3.bf16.msra.mxu1 %v6810_v52  ;;  %v822_v52 = vsel %vm7492_vm5, %v7609_v33, %v769_v44  ;;  %v781_v33 = vrot.slane %v779_v30, 4  ;;  %v5051_v4 = vcombine.low %v10140_v63, %v10140_v63  ;;  %v10152_v30 = vld [vmem:[#allocation23_spill] sm:$0xff] }
 0x11d   : > { %6049 = vmatmul.mubr.bf16.gmra.mrb[72].mxu0 %v7848_v35  ;;  %6128 = vmatprep.subr.bf16.mxu1 %v6814_v2  ;;  %v783_v51 = vshll.u32 %v5050_v27, 16 }
 0x11e   : > { %6097 = vmatmul.mubr.bf16.gmra.mrb[72].mxu1 %v7835_v1  ;;  %6052 = vmatprep.mubr.bf16.mxu0 %v7853_v46 }
 0x11f   : > { %6100 = vmatprep.mubr.bf16.mxu1 %v7848_v35  ;;  %5489 = vmatpush3.bf16.msra.mxu0 %v6803_v15  ;;  %v7901_v15 = vsel %vm7492_vm5, %v10142_v43, %v781_v33 }
 0x120   : > { %5490 = vmatprep.subr.bf16.mxu0 %v6807_v56  ;;  %6129 = vmatpush3.bf16.msra.mxu1 %v6814_v2  ;;  %v10141_v2 = vld [vmem:[#allocation27_spill] sm:$0xff]  ;;  %v787_v56 = vshll.u32 %v5051_v4, 16 }
 0x121   : > { %6130 = vmatprep.subr.bf16.mxu1 %v6816_v26  ;;  %v824_v8 = vsel %vm7492_vm5, %v10141_v2, %v777_v57 }
 0x122   : > { %v789_v41 = vrot.slane %v787_v56, 4 }
 0x123   : > { %5491 = vmatpush3.bf16.msra.mxu0 %v6809_v62 }
 0x124   : > { %5492 = vmatprep.subr.bf16.mxu0 %v6813_v55  ;;  %6131 = vmatpush3.bf16.msra.mxu1 %v6816_v26  ;;  %v785_v26 = vrot.slane %v783_v51, 4  ;;  %v7913_v62 = vsel %vm7492_vm5, %v10144_v18, %v789_v41  ;;  %v10145_v55 = vld [vmem:[#allocation12_spill] sm:$0xff] }
 0x125   : > { %6053 = vmatmul.mubr.bf16.gmra.mrb[76].mxu0 %v7866_v11  ;;  %6132 = vmatprep.subr.bf16.mxu1 %v6820_v6  ;;  %v10154_v41 = vld [vmem:[#allocation24_spill] sm:$0xff] }
 0x126   : > { %6101 = vmatmul.mubr.bf16.gmra.mrb[76].mxu1 %v7853_v46  ;;  %6056 = vmatprep.mubr.bf16.mxu0 %v7871_v10  ;;  %v7908_v32 = vsel %vm7492_vm5, %v10143_v38, %v785_v26 }
 0x127   : > { %6104 = vmatprep.mubr.bf16.mxu1 %v7866_v11  ;;  %5493 = vmatpush3.bf16.msra.mxu0 %v6815_v25  ;;  %v10149_v25 = vld [vmem:[#allocation16_spill] sm:$0xff] }
 0x128   : > { %5494 = vmatprep.subr.bf16.mxu0 %v6819_v45  ;;  %6133 = vmatpush3.bf16.msra.mxu1 %v6820_v6  ;;  %v10146_v6 = vld [vmem:[#allocation15_spill] sm:$0xff]  ;;  %v10150_v45 = vld [vmem:[#allocation21_spill] sm:$0xff] }
 0x129   : > { %6134 = vmatprep.subr.bf16.mxu1 %v6822_v16 }
 0x12b   : > { %5495 = vmatpush3.bf16.msra.mxu0 %v6821_v58 }
 0x12c   : > { %6135 = vmatpush3.bf16.msra.mxu1 %v6822_v16 }
 0x12d   : > { %6057 = vmatmul.mubr.bf16.gmra.mrb[80].mxu0 %v822_v52 }
 0x12e   : > { %6105 = vmatmul.mubr.bf16.gmra.mrb[80].mxu1 %v7871_v10  ;;  %6060 = vmatprep.mubr.bf16.mxu0 %v7887_v39 }
 0x12f   : > { %6108 = vmatprep.mubr.bf16.mxu1 %v822_v52 }
 0x135   : > { %6061 = vmatmul.mubr.bf16.gmra.mrb[84].mxu0 %v824_v8 }
 0x136   : > { %6109 = vmatmul.mubr.bf16.gmra.mrb[84].mxu1 %v7887_v39  ;;  %6064 = vmatprep.mubr.bf16.mxu0 %v7901_v15 }
 0x137   : > { %6112 = vmatprep.mubr.bf16.mxu1 %v824_v8 }
 0x13d   : > { %6065 = vmatmul.mubr.bf16.gmra.mrb[88].mxu0 %v7908_v32 }
 0x13e   : > { %6113 = vmatmul.mubr.bf16.gmra.mrb[88].mxu1 %v7901_v15  ;;  %6068 = vmatprep.mubr.bf16.mxu0 %v7913_v62 }
 0x13f   : > { %6116 = vmatprep.mubr.bf16.mxu1 %v7908_v32 }
 0x145   : > { %6069 = vmatmul.mubr.bf16.gmra.mrb[92].mxu0 %v7713_v17 }
 0x146   : > { %6117 = vmatmul.mubr.bf16.gmra.mrb[92].mxu1 %v7913_v62  ;;  %2099 = vmatprep.mubr.bf16.mxu0 %v10145_v55 }
 0x147   : > { %6136 = vmatprep.mubr.bf16.mxu1 %v7803_v13  ;;  %v10151_v13 = vld [vmem:[#allocation17_spill] sm:$0xff] }
 0x14d   : > { %2100 = vmatmul.mubr.bf16.vlgmr.msra.gmra.mrb[96].mxu0 %v10146_v6 }
 0x14e   : > { %6137 = vmatmul.mubr.bf16.vlgmr.msra.gmra.mrb[64].mxu1 %v7816_v53  ;;  %2107 = vmatprep.mubr.bf16.mxu0 %v10147_v14 }
 0x14f   : > { %6140 = vmatprep.mubr.bf16.mxu1 %v7830_v29 }
 0x155   : > { %2108 = vmatmul.mubr.bf16.gmra.mrb[100].mxu0 %v10148_v42 }
 0x156   : > { %6141 = vmatmul.mubr.bf16.gmra.mrb[68].mxu1 %v7835_v1  ;;  %2115 = vmatprep.mubr.bf16.mxu0 %v10149_v25 }
 0x157   : > { %6144 = vmatprep.mubr.bf16.mxu1 %v7848_v35 }
 0x15d   : > { %2116 = vmatmul.mubr.bf16.gmra.mrb[104].mxu0 %v10150_v45 }
 0x15e   : > { %6145 = vmatmul.mubr.bf16.gmra.mrb[72].mxu1 %v7853_v46  ;;  %2123 = vmatprep.mubr.bf16.mxu0 %v10151_v13 }
 0x15f   : > { %6148 = vmatprep.mubr.bf16.mxu1 %v7866_v11  ;;  %v10153_v11 = vld [vmem:[#allocation19_spill] sm:$0xff] }
 0x160   : > { %v5224_v53 = vpop.f32.mrb[0].mxu0 }
 0x161   : > { %v5225_v16 = vpop.f32.mrb[1].mxu0  ;;  %v5360_v44 = vpop.f32.mrb[0].mxu1 }
 0x162   : > { %v5227_v29 = vpop.f32.mrb[2].mxu0  ;;  %v5361_v28 = vpop.f32.mrb[1].mxu1  ;;  %v7935_v50 = vadd.f32 %v5225_v16, %v5224_v53 }
 0x163   : > { %v5228_v1 = vpop.f32.mrb[3].mxu0  ;;  %v7937_v23 = vadd.f32 %v5361_v28, %v5360_v44  ;;  %v5363_v58 = vpop.f32.mrb[2].mxu1 }
 0x164   : > { %v5364_v35 = vpop.f32.mrb[3].mxu1  ;;  %v7939_v40 = vadd.f32 %v5228_v1, %v5227_v29 }
 0x165   : > { %2124 = vmatmul.mubr.bf16.gmra.mrb[108].mxu0 %v10152_v30  ;;  %v7942_v46 = vadd.f32 %v5364_v35, %v5363_v58 }
 0x166   : > { %6149 = vmatmul.mubr.bf16.gmra.mrb[76].mxu1 %v7871_v10  ;;  %2131 = vmatprep.mubr.bf16.mxu0 %v10153_v11 }
 0x167   : > { %6152 = vmatprep.mubr.bf16.mxu1 %v822_v52  ;;  %v10155_v52 = vld [vmem:[#allocation20_spill] sm:$0xff] }
 0x168   : > { %v5230_v57 = vpop.f32.mrb[4].mxu0 }
 0x169   : > { %v5231_v47 = vpop.f32.mrb[5].mxu0  ;;  %v5366_v27 = vpop.f32.mrb[4].mxu1 }
 0x16a   : > { %v5233_v33 = vpop.f32.mrb[6].mxu0  ;;  %v5367_v63 = vpop.f32.mrb[5].mxu1  ;;  %v7946_v4 = vadd.f32 %v5231_v47, %v5230_v57 }
 0x16b   : > { %v5234_v2 = vpop.f32.mrb[7].mxu0  ;;  %v7948_v51 = vadd.f32 %v5367_v63, %v5366_v27  ;;  %v5369_v43 = vpop.f32.mrb[6].mxu1 }
 0x16c   : > { %v5370_v56 = vpop.f32.mrb[7].mxu1  ;;  %v7950_v26 = vadd.f32 %v5234_v2, %v5233_v33 }
 0x16d   : > { %2132 = vmatmul.mubr.bf16.gmra.mrb[112].mxu0 %v10154_v41  ;;  %v7953_v10 = vadd.f32 %v5370_v56, %v5369_v43 }
 0x16e   : > { %6153 = vmatmul.mubr.bf16.gmra.mrb[80].mxu1 %v7887_v39  ;;  %2139 = vmatprep.mubr.bf16.mxu0 %v10155_v52 }
 0x16f   : > { %6156 = vmatprep.mubr.bf16.mxu1 %v824_v8 }
 0x170   : > { %v5236_v38 = vpop.f32.mrb[8].mxu0 }
 0x171   : > { %v5237_v18 = vpop.f32.mrb[9].mxu0  ;;  %v5372_v55 = vpop.f32.mrb[8].mxu1 }
 0x172   : > { %v5239_v6 = vpop.f32.mrb[10].mxu0  ;;  %v5373_v14 = vpop.f32.mrb[9].mxu1  ;;  %v7957_v42 = vadd.f32 %v5237_v18, %v5236_v38 }
 0x173   : > { %v5240_v25 = vpop.f32.mrb[11].mxu0  ;;  %v7959_v45 = vadd.f32 %v5373_v14, %v5372_v55  ;;  %v5375_v13 = vpop.f32.mrb[10].mxu1 }
 0x174   : > { %v5376_v53 = vpop.f32.mrb[11].mxu1  ;;  %v7961_v16 = vadd.f32 %v5240_v25, %v5239_v6 }
 0x175   : > { %2140 = vmatmul.mubr.bf16.gmra.mrb[116].mxu0 %v7648_v22  ;;  %v7964_v39 = vadd.f32 %v5376_v53, %v5375_v13 }
 0x176   : > { %6157 = vmatmul.mubr.bf16.gmra.mrb[84].mxu1 %v7901_v15  ;;  %2147 = vmatprep.mubr.bf16.mxu0 %v7463_v61 }
 0x177   : > { %6160 = vmatprep.mubr.bf16.mxu1 %v7908_v32 }
 0x178   : > { %v5242_v8 = vpop.f32.mrb[12].mxu0 }
 0x179   : > { %v5243_v44 = vpop.f32.mrb[13].mxu0  ;;  %v5378_v29 = vpop.f32.mrb[12].mxu1 }
 0x17a   : > { %v5245_v28 = vpop.f32.mrb[14].mxu0  ;;  %v5379_v1 = vpop.f32.mrb[13].mxu1  ;;  %v7969_v58 = vadd.f32 %v5243_v44, %v5242_v8 }
 0x17b   : > { %v5246_v35 = vpop.f32.mrb[15].mxu0  ;;  %v7971_v30 = vadd.f32 %v5379_v1, %v5378_v29  ;;  %v5381_v11 = vpop.f32.mrb[14].mxu1 }
 0x17c   : > { %v5382_v22 = vpop.f32.mrb[15].mxu1  ;;  %v7973_v57 = vadd.f32 %v5246_v35, %v5245_v28 }
 0x17d   : > { %2148 = vmatmul.mubr.bf16.gmra.mrb[120].mxu0 %v7700_v59  ;;  %v7976_v15 = vadd.f32 %v5382_v22, %v5381_v11 }
 0x17e   : > { %6161 = vmatmul.mubr.bf16.gmra.mrb[88].mxu1 %v7913_v62  ;;  %2155 = vmatprep.mubr.bf16.mxu0 %v7477_v9 }
 0x17f   : > { %6164 = vmatprep.mubr.bf16.mxu1 %v7713_v17 }
 0x180   : > { %v5248_v61 = vpop.f32.mrb[16].mxu0 }
 0x181   : > { %v5249_v32 = vpop.f32.mrb[17].mxu0  ;;  %v5384_v47 = vpop.f32.mrb[16].mxu1 }
 0x182   : > { %v5251_v27 = vpop.f32.mrb[18].mxu0  ;;  %v5385_v33 = vpop.f32.mrb[17].mxu1  ;;  %v7981_v63 = vadd.f32 %v5249_v32, %v5248_v61 }
 0x183   : > { %v5252_v2 = vpop.f32.mrb[19].mxu0  ;;  %v7983_v43 = vadd.f32 %v5385_v33, %v5384_v47  ;;  %v5387_v56 = vpop.f32.mrb[18].mxu1 }
 0x184   : > { %v5388_v59 = vpop.f32.mrb[19].mxu1  ;;  %v7985_v41 = vadd.f32 %v5252_v2, %v5251_v27 }
 0x185   : > { %2156 = vmatmul.mubr.bf16.gmra.mrb[124].mxu0 %v7720_v54  ;;  %v7988_v52 = vadd.f32 %v5388_v59, %v5387_v56 }
 0x186   : > { %6165 = vmatmul.mubr.bf16.gmra.mrb[92].mxu1 %v7913_v62  ;;  %2163 = vmatprep.mubr.bf16.mxu0 %v7515_v31 }
 0x188   : > { %v5254_v9 = vpop.f32.mrb[20].mxu0 }
 0x189   : > { %v5255_v17 = vpop.f32.mrb[21].mxu0  ;;  %v5390_v38 = vpop.f32.mrb[20].mxu1 }
 0x18a   : > { %v5257_v18 = vpop.f32.mrb[22].mxu0  ;;  %v5391_v55 = vpop.f32.mrb[21].mxu1  ;;  %v7992_v6 = vadd.f32 %v5255_v17, %v5254_v9 }
 0x18b   : > { %v5258_v14 = vpop.f32.mrb[23].mxu0  ;;  %v7994_v25 = vadd.f32 %v5391_v55, %v5390_v38  ;;  %v5393_v13 = vpop.f32.mrb[22].mxu1 }
 0x18c   : > { %v5394_v53 = vpop.f32.mrb[23].mxu1  ;;  %v7996_v8 = vadd.f32 %v5258_v14, %v5257_v18 }
 0x18d   : > { %2164 = vmatmul.mubr.bf16.gmra.mrb[128].mxu0 %v7730_v12  ;;  %v7999_v54 = vadd.f32 %v5394_v53, %v5393_v13 }
 0x18e   : > { %2171 = vmatprep.mubr.bf16.mxu0 %v7526_v37 }
 0x190   : > { %v5260_v31 = vpop.f32.mrb[24].mxu0 }
 0x191   : > { %v5261_v62 = vpop.f32.mrb[25].mxu0  ;;  %v5396_v44 = vpop.f32.mrb[24].mxu1 }
 0x192   : > { %v5263_v29 = vpop.f32.mrb[26].mxu0  ;;  %v5397_v28 = vpop.f32.mrb[25].mxu1  ;;  %v8002_v1 = vadd.f32 %v5261_v62, %v5260_v31 }
 0x193   : > { %v5264_v35 = vpop.f32.mrb[27].mxu0  ;;  %v8004_v11 = vadd.f32 %v5397_v28, %v5396_v44  ;;  %v5399_v22 = vpop.f32.mrb[26].mxu1 }
 0x194   : > { %v5400_v61 = vpop.f32.mrb[27].mxu1  ;;  %v8006_v32 = vadd.f32 %v5264_v35, %v5263_v29 }
 0x195   : > { %2172 = vmatmul.mubr.bf16.gmra.mrb[132].mxu0 %v7740_v5  ;;  %v8009_v12 = vadd.f32 %v5400_v61, %v5399_v22 }
 0x196   : > { %2179 = vmatprep.mubr.bf16.mxu0 %v7564_v0 }
 0x198   : > { %v5266_v37 = vpop.f32.mrb[28].mxu0 }
 0x199   : > { %v5267_v47 = vpop.f32.mrb[29].mxu0  ;;  %v5402_v27 = vpop.f32.mrb[28].mxu1 }
 0x19a   : > { %v5269_v33 = vpop.f32.mrb[30].mxu0  ;;  %v5403_v2 = vpop.f32.mrb[29].mxu1  ;;  %v8012_v56 = vadd.f32 %v5267_v47, %v5266_v37 }
 0x19b   : > { %v5270_v59 = vpop.f32.mrb[31].mxu0  ;;  %v8014_v9 = vadd.f32 %v5403_v2, %v5402_v27  ;;  %v5405_v17 = vpop.f32.mrb[30].mxu1 }
 0x19c   : > { %v5406_v38 = vpop.f32.mrb[31].mxu1  ;;  %v8016_v18 = vadd.f32 %v5270_v59, %v5269_v33 }
 0x19d   : > { %2180 = vmatmul.mubr.bf16.gmra.mrb[136].mxu0 %v7750_v34  ;;  %v8019_v5 = vadd.f32 %v5406_v38, %v5405_v17 }
 0x19e   : > { %2187 = vmatprep.mubr.bf16.mxu0 %v7593_v48 }
 0x1a0   : > { %v5272_v0 = vpop.f32.mrb[32].mxu0 }
 0x1a1   : > { %v5273_v55 = vpop.f32.mrb[33].mxu0  ;;  %v5408_v14 = vpop.f32.mrb[32].mxu1 }
 0x1a2   : > { %v8022_v13 = vadd.f32 %v5273_v55, %v5272_v0  ;;  %v5275_v53 = vpop.f32.mrb[34].mxu0  ;;  %v5409_v31 = vpop.f32.mrb[33].mxu1 }
 0x1a3   : > { %v5276_v62 = vpop.f32.mrb[35].mxu0  ;;  %v8024_v44 = vadd.f32 %v5409_v31, %v5408_v14  ;;  %v5411_v29 = vpop.f32.mrb[34].mxu1 }
 0x1a4   : > { %v8026_v28 = vadd.f32 %v5276_v62, %v5275_v53  ;;  %v5412_v35 = vpop.f32.mrb[35].mxu1 }
 0x1a5   : > { %2188 = vmatmul.mubr.bf16.gmra.mrb[140].mxu0 %v7760_v36  ;;  %v8029_v34 = vadd.f32 %v5412_v35, %v5411_v29 }
 0x1a6   : > { %2195 = vmatprep.mubr.bf16.mxu0 %v7626_v3 }
 0x1a8   : > { %v5278_v48 = vpop.f32.mrb[36].mxu0 }
 0x1a9   : > { %v5279_v22 = vpop.f32.mrb[37].mxu0  ;;  %v5414_v61 = vpop.f32.mrb[36].mxu1 }
 0x1aa   : > { %v8032_v37 = vadd.f32 %v5279_v22, %v5278_v48  ;;  %v5281_v47 = vpop.f32.mrb[38].mxu0  ;;  %v5415_v27 = vpop.f32.mrb[37].mxu1 }
 0x1ab   : > { %v5282_v33 = vpop.f32.mrb[39].mxu0  ;;  %v8034_v2 = vadd.f32 %v5415_v27, %v5414_v61  ;;  %v5417_v59 = vpop.f32.mrb[38].mxu1 }
 0x1ac   : > { %v8036_v17 = vadd.f32 %v5282_v33, %v5281_v47  ;;  %v5418_v38 = vpop.f32.mrb[39].mxu1 }
 0x1ad   : > { %2196 = vmatmul.mubr.bf16.gmra.mrb[144].mxu0 %v7770_v20  ;;  %v8039_v36 = vadd.f32 %v5418_v38, %v5417_v59 }
 0x1ae   : > { %2203 = vmatprep.mubr.bf16.mxu0 %v7658_v19 }
 0x1b0   : > { %v5284_v3 = vpop.f32.mrb[40].mxu0 }
 0x1b1   : > { %v5285_v0 = vpop.f32.mrb[41].mxu0  ;;  %v5420_v55 = vpop.f32.mrb[40].mxu1 }
 0x1b2   : > { %v8042_v14 = vadd.f32 %v5285_v0, %v5284_v3  ;;  %v5287_v53 = vpop.f32.mrb[42].mxu0  ;;  %v5421_v31 = vpop.f32.mrb[41].mxu1 }
 0x1b3   : > { %v5288_v62 = vpop.f32.mrb[43].mxu0  ;;  %v8044_v29 = vadd.f32 %v5421_v31, %v5420_v55  ;;  %v5423_v35 = vpop.f32.mrb[42].mxu1 }
 0x1b4   : > { %v8046_v48 = vadd.f32 %v5288_v62, %v5287_v53  ;;  %v5424_v22 = vpop.f32.mrb[43].mxu1 }
 0x1b5   : > { %2204 = vmatmul.mubr.bf16.gmra.mrb[148].mxu0 %v7783_v7  ;;  %v8049_v20 = vadd.f32 %v5424_v22, %v5423_v35 }
 0x1b6   : > { %10156 = vst [vmem:[#allocation25_spill] sm:$0xff] %v8046_v48  ;;  %2211 = vmatprep.mubr.bf16.mxu0 %v7661_v24 }
 0x1b7   : > { %10157 = vst [vmem:[#allocation26_spill] sm:$0xff] %v8049_v20 }
 0x1b8   : > { %v5290_v61 = vpop.f32.mrb[44].mxu0 }
 0x1b9   : > { %v5291_v47 = vpop.f32.mrb[45].mxu0  ;;  %v5426_v27 = vpop.f32.mrb[44].mxu1 }
 0x1ba   : > { %v8052_v33 = vadd.f32 %v5291_v47, %v5290_v61  ;;  %v5293_v59 = vpop.f32.mrb[46].mxu0  ;;  %v5427_v38 = vpop.f32.mrb[45].mxu1 }
 0x1bb   : > { %v5294_v3 = vpop.f32.mrb[47].mxu0  ;;  %v8054_v0 = vadd.f32 %v5427_v38, %v5426_v27  ;;  %v5429_v55 = vpop.f32.mrb[46].mxu1 }
 0x1bc   : > { %v8056_v53 = vadd.f32 %v5294_v3, %v5293_v59  ;;  %v5430_v31 = vpop.f32.mrb[47].mxu1 }
 0x1bd   : > { %2212 = vmatmul.mubr.bf16.gmra.mrb[152].mxu0 %v7798_v60  ;;  %v8059_v62 = vadd.f32 %v5430_v31, %v5429_v55 }
 0x1be   : > { %2219 = vmatprep.mubr.bf16.mxu0 %v7658_v19 }
 0x1bf   : > { %10158 = vst [vmem:[#allocation27_spill] sm:$0xff] %v8059_v62 }
 0x1c0   : > { %v5296_v24 = vpop.f32.mrb[48].mxu0 }
 0x1c1   : > { %v5297_v35 = vpop.f32.mrb[49].mxu0  ;;  %v5432_v22 = vpop.f32.mrb[48].mxu1 }
 0x1c2   : > { %v8062_v61 = vadd.f32 %v5297_v35, %v5296_v24  ;;  %v5299_v47 = vpop.f32.mrb[50].mxu0  ;;  %v5433_v49 = vpop.f32.mrb[49].mxu1 }
 0x1c3   : > { %v5300_v21 = vpop.f32.mrb[51].mxu0  ;;  %v8064_v27 = vadd.f32 %v5433_v49, %v5432_v22  ;;  %v5435_v38 = vpop.f32.mrb[50].mxu1 }
 0x1c4   : > { %10159 = vst [vmem:[#allocation28_spill] sm:$0xff] %v8062_v61  ;;  %v8066_v59 = vadd.f32 %v5300_v21, %v5299_v47  ;;  %v5436_v3 = vpop.f32.mrb[51].mxu1 }
 0x1c5   : > { %10160 = vst [vmem:[#allocation29_spill] sm:$0xff] %v8064_v27  ;;  %2220 = vmatmul.mubr.bf16.gmra.mrb[156].mxu0 %v7783_v7  ;;  %v8069_v60 = vadd.f32 %v5436_v3, %v5435_v38 }
 0x1c6   : > { %10161 = vst [vmem:[#allocation30_spill] sm:$0xff] %v8066_v59 }
 0x1c7   : > { %10162 = vst [vmem:[#allocation12_spill] sm:$0xff] %v8069_v60 }
 0x1c8   : > { %v5302_v55 = vpop.f32.mrb[52].mxu0 }
 0x1c9   : > { %v5303_v19 = vpop.f32.mrb[53].mxu0  ;;  %v5438_v31 = vpop.f32.mrb[52].mxu1 }
 0x1ca   : > { %v8071_v20 = vadd.f32 %v5303_v19, %v5302_v55  ;;  %v5305_v24 = vpop.f32.mrb[54].mxu0  ;;  %v5439_v35 = vpop.f32.mrb[53].mxu1 }
 0x1cb   : > { %v5306_v61 = vpop.f32.mrb[55].mxu0  ;;  %v8073_v62 = vadd.f32 %v5439_v35, %v5438_v31  ;;  %v5441_v49 = vpop.f32.mrb[54].mxu1 }
 0x1cc   : > { %10163 = vst [vmem:[#allocation15_spill] sm:$0xff] %v8071_v20  ;;  %v8075_v22 = vadd.f32 %v5306_v61, %v5305_v24  ;;  %v5442_v21 = vpop.f32.mrb[55].mxu1 }
 0x1cd   : > { %10164 = vst [vmem:[#allocation14_spill] sm:$0xff] %v8073_v62  ;;  %v8077_v47 = vadd.f32 %v5442_v21, %v5441_v49 }
 0x1ce   : > { %10165 = vst [vmem:[#allocation18_spill] sm:$0xff] %v8075_v22 }
 0x1cf   : > { %10166 = vst [vmem:[#allocation16_spill] sm:$0xff] %v8077_v47 }
 0x1d0   : > { %v5308_v59 = vpop.f32.mrb[56].mxu0 }
 0x1d1   : > { %v5309_v7 = vpop.f32.mrb[57].mxu0  ;;  %v5444_v38 = vpop.f32.mrb[56].mxu1 }
 0x1d2   : > { %v8079_v3 = vadd.f32 %v5309_v7, %v5308_v59  ;;  %v5311_v60 = vpop.f32.mrb[58].mxu0  ;;  %v5445_v27 = vpop.f32.mrb[57].mxu1 }
 0x1d3   : > { %v5312_v55 = vpop.f32.mrb[59].mxu0  ;;  %v8081_v19 = vadd.f32 %v5445_v27, %v5444_v38  ;;  %v5447_v20 = vpop.f32.mrb[58].mxu1 }
 0x1d4   : > { %10167 = vst [vmem:[#allocation21_spill] sm:$0xff] %v8079_v3  ;;  %v8083_v48 = vadd.f32 %v5312_v55, %v5311_v60  ;;  %v5448_v31 = vpop.f32.mrb[59].mxu1 }
 0x1d5   : > { %v8085_v35 = vadd.f32 %v5448_v31, %v5447_v20 }
 0x1d7   : > { %10168 = vst [vmem:[#allocation17_spill] sm:$0xff] %v8085_v35 }
 0x1d8   : > { %v5314_v61 = vpop.f32.mrb[60].mxu0 }
 0x1d9   : > { %v5315_v24 = vpop.f32.mrb[61].mxu0  ;;  %v5450_v49 = vpop.f32.mrb[60].mxu1 }
 0x1da   : > { %v8087_v21 = vadd.f32 %v5315_v24, %v5314_v61  ;;  %v5317_v47 = vpop.f32.mrb[62].mxu0  ;;  %v5451_v22 = vpop.f32.mrb[61].mxu1 }
 0x1db   : > { %v5318_v59 = vpop.f32.mrb[63].mxu0  ;;  %v8089_v7 = vadd.f32 %v5451_v22, %v5450_v49  ;;  %v5453_v3 = vpop.f32.mrb[62].mxu1 }
 0x1dc   : > { %v8091_v62 = vadd.f32 %v5318_v59, %v5317_v47  ;;  %v5454_v27 = vpop.f32.mrb[63].mxu1 }
 0x1dd   : > { %v8093_v38 = vadd.f32 %v5454_v27, %v5453_v3 }
 0x1e0   : > { %v6042_v60 = vpop.f32.mrb[64].mxu0 }
 0x1e1   : > { %v1290_v20 = vadd.f32 %v6042_v60, %v7946_v4  ;;  %v1281_v55 = vpop.f32.mrb[65].mxu0 }
 0x1e2   : > { %v1282_v31 = vadd.f32 %v7935_v50, %v1281_v55  ;;  %v6043_v35 = vpop.f32.mrb[66].mxu0 }
 0x1e3   : > { %v8098_v61 = vadd.f32 %v7948_v51, %v1290_v20  ;;  %v1293_v24 = vadd.f32 %v6043_v35, %v7950_v26  ;;  %v1284_v22 = vpop.f32.mrb[67].mxu0 }
 0x1e4   : > { %v8102_v49 = vadd.f32 %v7937_v23, %v1282_v31  ;;  %v1285_v47 = vadd.f32 %v7939_v40, %v1284_v22 }
 0x1e5   : > { %v8106_v3 = vadd.f32 %v7953_v10, %v1293_v24 }
 0x1e6   : > { %v8109_v4 = vadd.f32 %v7942_v46, %v1285_v47 }
 0x1e8   : > { %v6046_v59 = vpop.f32.mrb[68].mxu0 }
 0x1e9   : > { %v1306_v50 = vadd.f32 %v6046_v59, %v7969_v58  ;;  %v1297_v27 = vpop.f32.mrb[69].mxu0 }
 0x1ea   : > { %v1298_v51 = vadd.f32 %v7957_v42, %v1297_v27  ;;  %v6047_v60 = vpop.f32.mrb[70].mxu0 }
 0x1eb   : > { %v8114_v26 = vadd.f32 %v7971_v30, %v1306_v50  ;;  %v1309_v23 = vadd.f32 %v6047_v60, %v7973_v57  ;;  %v1300_v35 = vpop.f32.mrb[71].mxu0 }
 0x1ec   : > { %v8118_v40 = vadd.f32 %v7959_v45, %v1298_v51  ;;  %v1301_v10 = vadd.f32 %v7961_v16, %v1300_v35 }
 0x1ed   : > { %v8122_v46 = vadd.f32 %v7976_v15, %v1309_v23 }
 0x1ee   : > { %v8125_v58 = vadd.f32 %v7964_v39, %v1301_v10 }
 0x1f0   : > { %v6050_v20 = vpop.f32.mrb[72].mxu0 }
 0x1f1   : > { %v1322_v42 = vadd.f32 %v6050_v20, %v7992_v6  ;;  %v1313_v55 = vpop.f32.mrb[73].mxu0 }
 0x1f2   : > { %v1314_v30 = vadd.f32 %v7981_v63, %v1313_v55  ;;  %v6051_v31 = vpop.f32.mrb[74].mxu0 }
 0x1f3   : > { %v8130_v57 = vadd.f32 %v7994_v25, %v1322_v42  ;;  %v1325_v45 = vadd.f32 %v6051_v31, %v7996_v8  ;;  %v1316_v24 = vpop.f32.mrb[75].mxu0  ;;  %v10171_v31 = vld [vmem:[#allocation26_spill] sm:$0xff] }
 0x1f4   : > { %v8134_v16 = vadd.f32 %v7983_v43, %v1314_v30  ;;  %v1317_v15 = vadd.f32 %v7985_v41, %v1316_v24 }
 0x1f5   : > { %v8138_v39 = vadd.f32 %v7999_v54, %v1325_v45 }
 0x1f6   : > { %v8141_v6 = vadd.f32 %v7988_v52, %v1317_v15 }
 0x1f8   : > { %v6054_v22 = vpop.f32.mrb[76].mxu0 }
 0x1f9   : > { %v1338_v63 = vadd.f32 %v6054_v22, %v8012_v56  ;;  %v1329_v47 = vpop.f32.mrb[77].mxu0 }
 0x1fa   : > { %v1330_v25 = vadd.f32 %v8002_v1, %v1329_v47  ;;  %v6055_v59 = vpop.f32.mrb[78].mxu0 }
 0x1fb   : > { %v8146_v8 = vadd.f32 %v8014_v9, %v1338_v63  ;;  %v1341_v43 = vadd.f32 %v6055_v59, %v8016_v18  ;;  %v1332_v50 = vpop.f32.mrb[79].mxu0 }
 0x1fc   : > { %v8150_v41 = vadd.f32 %v8004_v11, %v1330_v25  ;;  %v1333_v54 = vadd.f32 %v8006_v32, %v1332_v50 }
 0x1fd   : > { %v8154_v52 = vadd.f32 %v8019_v5, %v1341_v43  ;;  %v10176_v43 = vld [vmem:[#allocation29_spill] sm:$0xff] }
 0x1fe   : > { %v8157_v56 = vadd.f32 %v8009_v12, %v1333_v54  ;;  %v10177_v54 = vld [vmem:[#allocation30_spill] sm:$0xff] }
 0x200   : > { %v6058_v27 = vpop.f32.mrb[80].mxu0 }
 0x201   : > { %v1354_v1 = vadd.f32 %v6058_v27, %v8032_v37  ;;  %v1345_v51 = vpop.f32.mrb[81].mxu0 }
 0x202   : > { %v1346_v9 = vadd.f32 %v8022_v13, %v1345_v51  ;;  %v6059_v60 = vpop.f32.mrb[82].mxu0 }
 0x203   : > { %v8162_v18 = vadd.f32 %v8034_v2, %v1354_v1  ;;  %v1357_v11 = vadd.f32 %v6059_v60, %v8036_v17  ;;  %v1348_v23 = vpop.f32.mrb[83].mxu0  ;;  %v10178_v1 = vld [vmem:[#allocation16_spill] sm:$0xff] }
 0x204   : > { %v8166_v32 = vadd.f32 %v8024_v44, %v1346_v9  ;;  %v1349_v5 = vadd.f32 %v8026_v28, %v1348_v23  ;;  %v10179_v9 = vld [vmem:[#allocation12_spill] sm:$0xff] }
 0x205   : > { %v8170_v12 = vadd.f32 %v8039_v36, %v1357_v11  ;;  %v10169_v36 = vld [vmem:[#allocation25_spill] sm:$0xff] }
 0x206   : > { %v8173_v37 = vadd.f32 %v8029_v34, %v1349_v5  ;;  %v10170_v34 = vld [vmem:[#allocation27_spill] sm:$0xff] }
 0x208   : > { %v6062_v35 = vpop.f32.mrb[84].mxu0 }
 0x209   : > { %v1370_v13 = vadd.f32 %v6062_v35, %v8052_v33  ;;  %v1361_v10 = vpop.f32.mrb[85].mxu0  ;;  %v10180_v35 = vld [vmem:[#allocation21_spill] sm:$0xff] }
 0x20a   : > { %v1362_v2 = vadd.f32 %v8042_v14, %v1361_v10  ;;  %v6063_v20 = vpop.f32.mrb[86].mxu0  ;;  %v10172_v14 = vld [vmem:[#allocation15_spill] sm:$0xff] }
 0x20b   : > { %v8178_v17 = vadd.f32 %v8054_v0, %v1370_v13  ;;  %v1373_v44 = vadd.f32 %v6063_v20, %v8056_v53  ;;  %v1364_v42 = vpop.f32.mrb[87].mxu0  ;;  %v10173_v0 = vld [vmem:[#allocation28_spill] sm:$0xff]  ;;  %v10174_v53 = vld [vmem:[#allocation14_spill] sm:$0xff] }
 0x20c   : > { %v8182_v28 = vadd.f32 %v8044_v29, %v1362_v2  ;;  %v1365_v55 = vadd.f32 %v10169_v36, %v1364_v42  ;;  %v10175_v29 = vld [vmem:[#allocation18_spill] sm:$0xff] }
 0x20d   : > { %v8186_v30 = vadd.f32 %v10170_v34, %v1373_v44  ;;  %v10181_v34 = vld [vmem:[#allocation17_spill] sm:$0xff] }
 0x20e   : > { %v8189_v33 = vadd.f32 %v10171_v31, %v1365_v55 }
 0x210   : > { %v6066_v45 = vpop.f32.mrb[88].mxu0 }
 0x211   : > { %v1386_v24 = vadd.f32 %v6066_v45, %v10172_v14  ;;  %v1377_v15 = vpop.f32.mrb[89].mxu0 }
 0x212   : > { %v1378_v22 = vadd.f32 %v10173_v0, %v1377_v15  ;;  %v6067_v63 = vpop.f32.mrb[90].mxu0 }
 0x213   : > { %v8194_v47 = vadd.f32 %v10174_v53, %v1386_v24  ;;  %v1389_v25 = vadd.f32 %v6067_v63, %v10175_v29  ;;  %v1380_v59 = vpop.f32.mrb[91].mxu0 }
 0x214   : > { %v8198_v50 = vadd.f32 %v10176_v43, %v1378_v22  ;;  %v1381_v27 = vadd.f32 %v10177_v54, %v1380_v59 }
 0x215   : > { %v8202_v51 = vadd.f32 %v10178_v1, %v1389_v25 }
 0x216   : > { %v8205_v60 = vadd.f32 %v10179_v9, %v1381_v27 }
 0x218   : > { %v6070_v11 = vpop.f32.mrb[92].mxu0 }
 0x219   : > { %v1402_v23 = vadd.f32 %v6070_v11, %v8087_v21  ;;  %v1393_v5 = vpop.f32.mrb[93].mxu0 }
 0x21a   : > { %v1394_v13 = vadd.f32 %v10180_v35, %v1393_v5  ;;  %v6071_v10 = vpop.f32.mrb[94].mxu0 }
 0x21b   : > { %v8210_v2 = vadd.f32 %v8089_v7, %v1402_v23  ;;  %v1405_v20 = vadd.f32 %v6071_v10, %v8091_v62  ;;  %v1396_v44 = vpop.f32.mrb[95].mxu0 }
 0x21c   : > { %v8214_v42 = vadd.f32 %v8081_v19, %v1394_v13  ;;  %v1397_v36 = vadd.f32 %v8083_v48, %v1396_v44 }
 0x21d   : > { %v8218_v55 = vadd.f32 %v8093_v38, %v1405_v20 }
 0x21e   : > { %v8221_v21 = vadd.f32 %v10181_v34, %v1397_v36 }
 0x220   : > { %v5496_v31 = vpop.f32.mrb[96].mxu0 }
 0x221   : > { %v6138_v45 = vpop.f32.mrb[64].mxu1  ;;  %v5497_v14 = vpop.f32.mrb[97].mxu0 }
 0x222   : > { %v5498_v24 = vadd.f32 %v5497_v14, %v5496_v31  ;;  %v2262_v7 = vpop.f32.mrb[65].mxu1  ;;  %v5499_v15 = vpop.f32.mrb[98].mxu0 }
 0x223   : > { %v6139_v0 = vpop.f32.mrb[66].mxu1  ;;  %v5500_v62 = vpop.f32.mrb[99].mxu0 }
 0x224   : > { %v6318_v22 = vadd.f32 %v5498_v24, %v8102_v49  ;;  %v5501_v19 = vadd.f32 %v5500_v62, %v5499_v15  ;;  %v2265_v63 = vpop.f32.mrb[67].mxu1 }
 0x226   : > { %v8224_v53 = vadd.f32 %v6318_v22, %v2262_v7  ;;  %v6326_v48 = vadd.f32 %v5501_v19, %v8109_v4 }
 0x228   : > { %v8227_v38 = vadd.f32 %v6326_v48, %v2265_v63  ;;  %v5502_v29 = vpop.f32.mrb[100].mxu0 }
 0x229   : > { %v6142_v25 = vpop.f32.mrb[68].mxu1  ;;  %v5503_v59 = vpop.f32.mrb[101].mxu0 }
 0x22a   : > { %v5504_v43 = vadd.f32 %v5503_v59, %v5502_v29  ;;  %v2278_v54 = vpop.f32.mrb[69].mxu1  ;;  %v5505_v27 = vpop.f32.mrb[102].mxu0 }
 0x22b   : > { %v6143_v1 = vpop.f32.mrb[70].mxu1  ;;  %v5506_v9 = vpop.f32.mrb[103].mxu0 }
 0x22c   : > { %v6314_v11 = vadd.f32 %v5504_v43, %v8098_v61  ;;  %v5507_v23 = vadd.f32 %v5506_v9, %v5505_v27  ;;  %v2281_v49 = vpop.f32.mrb[71].mxu1  ;;  %v2421_v9 = vadd.f32 %v8227_v38, %v8224_v53 }
 0x22e   : > { %v8230_v5 = vadd.f32 %v6314_v11, %v6138_v45  ;;  %v6322_v35 = vadd.f32 %v5507_v23, %v8106_v3 }
 0x230   : > { %v8233_v13 = vadd.f32 %v6322_v35, %v6139_v0  ;;  %v5508_v4 = vpop.f32.mrb[104].mxu0 }
 0x231   : > { %v6146_v10 = vpop.f32.mrb[72].mxu1  ;;  %v5509_v20 = vpop.f32.mrb[105].mxu0 }
 0x232   : > { %v5510_v44 = vadd.f32 %v5509_v20, %v5508_v4  ;;  %v2294_v36 = vpop.f32.mrb[73].mxu1  ;;  %v5511_v34 = vpop.f32.mrb[106].mxu0  ;;  %v2422_v4 = vadd.f32 %v8230_v5, %v2421_v9 }
 0x233   : > { %v6147_v31 = vpop.f32.mrb[74].mxu1  ;;  %v5512_v14 = vpop.f32.mrb[107].mxu0 }
 0x234   : > { %v6334_v24 = vadd.f32 %v5510_v44, %v8118_v40  ;;  %v5513_v7 = vadd.f32 %v5512_v14, %v5511_v34  ;;  %v2297_v61 = vpop.f32.mrb[75].mxu1 }
 0x236   : > { %v8236_v15 = vadd.f32 %v6334_v24, %v2278_v54  ;;  %v6342_v45 = vadd.f32 %v5513_v7, %v8125_v58 }
 0x238   : > { %v8239_v62 = vadd.f32 %v6342_v45, %v2281_v49  ;;  %v5514_v3 = vpop.f32.mrb[108].mxu0 }
 0x239   : > { %v8241_v0 = vpop.f32.mrb[76].mxu1  ;;  %v5515_v22 = vpop.f32.mrb[109].mxu0 }
 0x23a   : > { %v5516_v19 = vadd.f32 %v5515_v22, %v5514_v3  ;;  %v2310_v63 = vpop.f32.mrb[77].mxu1  ;;  %v5517_v48 = vpop.f32.mrb[110].mxu0 }
 0x23b   : > { %v8243_v29 = vpop.f32.mrb[78].mxu1  ;;  %v5518_v59 = vpop.f32.mrb[111].mxu0 }
 0x23c   : > { %v6330_v40 = vadd.f32 %v5516_v19, %v8114_v26  ;;  %v5519_v43 = vadd.f32 %v5518_v59, %v5517_v48  ;;  %v2313_v27 = vpop.f32.mrb[79].mxu1 }
 0x23e   : > { %v8246_v54 = vadd.f32 %v6330_v40, %v6142_v25  ;;  %v6338_v58 = vadd.f32 %v5519_v43, %v8122_v46 }
 0x240   : > { %v8251_v11 = vadd.f32 %v6338_v58, %v6143_v1  ;;  %v5520_v23 = vpop.f32.mrb[112].mxu0  ;;  %v2423_v1 = vadd.f32 %v8233_v13, %v2422_v4 }
 0x241   : > { %v8253_v49 = vpop.f32.mrb[80].mxu1  ;;  %v5521_v35 = vpop.f32.mrb[113].mxu0 }
 0x242   : > { %v5522_v20 = vadd.f32 %v5521_v35, %v5520_v23  ;;  %v8256_v44 = vpop.f32.mrb[81].mxu1  ;;  %v5523_v26 = vpop.f32.mrb[114].mxu0  ;;  %v2424_v3 = vadd.f32 %v8236_v15, %v2423_v1 }
 0x243   : > { %v8258_v34 = vpop.f32.mrb[82].mxu1  ;;  %v5524_v25 = vpop.f32.mrb[115].mxu0 }
 0x244   : > { %v6350_v46 = vadd.f32 %v5522_v20, %v8134_v16  ;;  %v5525_v14 = vadd.f32 %v5524_v25, %v5523_v26  ;;  %v8261_v24 = vpop.f32.mrb[83].mxu1 }
 0x246   : > { %v8264_v7 = vadd.f32 %v6350_v46, %v2294_v36  ;;  %v6358_v45 = vadd.f32 %v5525_v14, %v8141_v6  ;;  %v2425_v36 = vadd.f32 %v8239_v62, %v2424_v3 }
 0x248   : > { %v8268_v22 = vadd.f32 %v6358_v45, %v2297_v61  ;;  %v5526_v19 = vpop.f32.mrb[116].mxu0  ;;  %v2426_v61 = vadd.f32 %v8246_v54, %v2425_v36 }
 0x249   : > { %v8270_v48 = vpop.f32.mrb[84].mxu1  ;;  %v5527_v59 = vpop.f32.mrb[117].mxu0 }
 0x24a   : > { %v5528_v40 = vadd.f32 %v5527_v59, %v5526_v19  ;;  %v8272_v43 = vpop.f32.mrb[85].mxu1  ;;  %v5529_v16 = vpop.f32.mrb[118].mxu0  ;;  %v2427_v1 = vadd.f32 %v8251_v11, %v2426_v61 }
 0x24b   : > { %v8274_v58 = vpop.f32.mrb[86].mxu1  ;;  %v5530_v9 = vpop.f32.mrb[119].mxu0 }
 0x24c   : > { %v6346_v23 = vadd.f32 %v5528_v40, %v8130_v57  ;;  %v5531_v6 = vadd.f32 %v5530_v9, %v5529_v16  ;;  %v8278_v35 = vpop.f32.mrb[87].mxu1 }
 0x24e   : > { %v8281_v4 = vadd.f32 %v6346_v23, %v6146_v10  ;;  %v6354_v20 = vadd.f32 %v5531_v6, %v8138_v39  ;;  %v2428_v10 = vadd.f32 %v8264_v7, %v2427_v1 }
 0x250   : > { %10182 = vst [vmem:[#allocation23_spill] sm:$0xff] %v8281_v4  ;;  %v8284_v26 = vadd.f32 %v6354_v20, %v6147_v31  ;;  %v5532_v25 = vpop.f32.mrb[120].mxu0  ;;  %v2429_v36 = vadd.f32 %v8268_v22, %v2428_v10 }
 0x251   : > { %v8286_v46 = vpop.f32.mrb[88].mxu1  ;;  %v5533_v14 = vpop.f32.mrb[121].mxu0 }
 0x252   : > { %v5534_v45 = vadd.f32 %v5533_v14, %v5532_v25  ;;  %v8289_v3 = vpop.f32.mrb[89].mxu1  ;;  %v5535_v57 = vpop.f32.mrb[122].mxu0  ;;  %v2430_v25 = vadd.f32 %v8281_v4, %v2429_v36 }
 0x253   : > { %v8291_v19 = vpop.f32.mrb[90].mxu1  ;;  %v5536_v59 = vpop.f32.mrb[123].mxu0 }
 0x254   : > { %v6366_v40 = vadd.f32 %v5534_v45, %v8150_v41  ;;  %v5537_v39 = vadd.f32 %v5536_v59, %v5535_v57  ;;  %v8295_v31 = vpop.f32.mrb[91].mxu1 }
 0x256   : > { %v8297_v16 = vadd.f32 %v6366_v40, %v2310_v63  ;;  %v6374_v9 = vadd.f32 %v5537_v39, %v8157_v56 }
 0x258   : > { %v8301_v23 = vadd.f32 %v6374_v9, %v2313_v27  ;;  %v5538_v6 = vpop.f32.mrb[124].mxu0  ;;  %v2431_v27 = vadd.f32 %v8284_v26, %v2430_v25 }
 0x259   : > { %v8303_v61 = vpop.f32.mrb[92].mxu1  ;;  %v5539_v20 = vpop.f32.mrb[125].mxu0 }
 0x25a   : > { %v5540_v14 = vadd.f32 %v5539_v20, %v5538_v6  ;;  %v8306_v1 = vpop.f32.mrb[93].mxu1  ;;  %v5541_v41 = vpop.f32.mrb[126].mxu0  ;;  %v2432_v39 = vadd.f32 %v8297_v16, %v2431_v27 }
 0x25b   : > { %v8308_v45 = vpop.f32.mrb[94].mxu1  ;;  %v5542_v63 = vpop.f32.mrb[127].mxu0 }
 0x25c   : > { %v6362_v57 = vadd.f32 %v5540_v14, %v8146_v8  ;;  %v5543_v56 = vadd.f32 %v5542_v63, %v5541_v41  ;;  %v8311_v59 = vpop.f32.mrb[95].mxu1  ;;  %v2433_v14 = vadd.f32 %v8301_v23, %v2432_v39 }
 0x25e   : > { %v8315_v10 = vadd.f32 %v6362_v57, %v8241_v0  ;;  %v6370_v40 = vadd.f32 %v5543_v56, %v8154_v52 }
 0x260   : > { %v8320_v9 = vadd.f32 %v6370_v40, %v8243_v29  ;;  %v5544_v36 = vpop.f32.mrb[128].mxu0  ;;  %v2434_v0 = vadd.f32 %v8315_v10, %v2433_v14 }
 0x261   : > { %v5545_v6 = vpop.f32.mrb[129].mxu0 }
 0x262   : > { %v5546_v20 = vadd.f32 %v5545_v6, %v5544_v36  ;;  %v5547_v4 = vpop.f32.mrb[130].mxu0  ;;  %v2435_v27 = vadd.f32 %v8320_v9, %v2434_v0 }
 0x263   : > { %v5548_v8 = vpop.f32.mrb[131].mxu0 }
 0x264   : > { %v6382_v41 = vadd.f32 %v5546_v20, %v8166_v32  ;;  %v5549_v25 = vadd.f32 %v5548_v8, %v5547_v4 }
 0x266   : > { %v8326_v63 = vadd.f32 %v6382_v41, %v8256_v44  ;;  %v6390_v52 = vadd.f32 %v5549_v25, %v8173_v37 }
 0x268   : > { %v8330_v29 = vadd.f32 %v6390_v52, %v8261_v24  ;;  %v5550_v57 = vpop.f32.mrb[132].mxu0  ;;  %v2436_v32 = vadd.f32 %v8326_v63, %v2435_v27 }
 0x269   : > { %v5551_v56 = vpop.f32.mrb[133].mxu0 }
 0x26a   : > { %v5552_v40 = vadd.f32 %v5551_v56, %v5550_v57  ;;  %v5553_v36 = vpop.f32.mrb[134].mxu0  ;;  %v2437_v24 = vadd.f32 %v8330_v29, %v2436_v32 }
 0x26b   : > { %v5554_v39 = vpop.f32.mrb[135].mxu0 }
 0x26c   : > { %v6378_v4 = vadd.f32 %v5552_v40, %v8162_v18  ;;  %v5555_v6 = vadd.f32 %v5554_v39, %v5553_v36 }
 0x26e   : > { %v8336_v44 = vadd.f32 %v6378_v4, %v8253_v49  ;;  %v6386_v37 = vadd.f32 %v5555_v6, %v8170_v12 }
 0x270   : > { %v8341_v20 = vadd.f32 %v6386_v37, %v8258_v34  ;;  %v5556_v8 = vpop.f32.mrb[136].mxu0  ;;  %v2438_v41 = vadd.f32 %v8336_v44, %v2437_v24 }
 0x271   : > { %v5557_v14 = vpop.f32.mrb[137].mxu0 }
 0x272   : > { %v5558_v25 = vadd.f32 %v5557_v14, %v5556_v8  ;;  %v5559_v0 = vpop.f32.mrb[138].mxu0  ;;  %v2439_v49 = vadd.f32 %v8341_v20, %v2438_v41 }
 0x273   : > { %v5560_v52 = vpop.f32.mrb[139].mxu0 }
 0x274   : > { %v6398_v18 = vadd.f32 %v5558_v25, %v8182_v28  ;;  %v5561_v57 = vadd.f32 %v5560_v52, %v5559_v0 }
 0x276   : > { %v8347_v56 = vadd.f32 %v6398_v18, %v8272_v43  ;;  %v6406_v12 = vadd.f32 %v5561_v57, %v8189_v33 }
 0x278   : > { %v2440_v34 = vadd.f32 %v8347_v56, %v2439_v49  ;;  %v8352_v27 = vadd.f32 %v6406_v12, %v8278_v35  ;;  %v5562_v40 = vpop.f32.mrb[140].mxu0 }
 0x279   : > { %v5563_v36 = vpop.f32.mrb[141].mxu0 }
 0x27a   : > { %v2441_v39 = vadd.f32 %v8352_v27, %v2440_v34  ;;  %v5564_v32 = vadd.f32 %v5563_v36, %v5562_v40  ;;  %v5565_v4 = vpop.f32.mrb[142].mxu0 }
 0x27b   : > { %v5566_v28 = vpop.f32.mrb[143].mxu0 }
 0x27c   : > { %v6394_v6 = vadd.f32 %v5564_v32, %v8178_v17  ;;  %v5567_v37 = vadd.f32 %v5566_v28, %v5565_v4 }
 0x27e   : > { %v8357_v43 = vadd.f32 %v6394_v6, %v8270_v48  ;;  %v6402_v33 = vadd.f32 %v5567_v37, %v8186_v30 }
 0x280   : > { %v2442_v24 = vadd.f32 %v8357_v43, %v2441_v39  ;;  %v8362_v35 = vadd.f32 %v6402_v33, %v8274_v58  ;;  %v5568_v8 = vpop.f32.mrb[144].mxu0 }
 0x281   : > { %v5569_v14 = vpop.f32.mrb[145].mxu0 }
 0x282   : > { %v2443_v41 = vadd.f32 %v8362_v35, %v2442_v24  ;;  %v5570_v25 = vadd.f32 %v5569_v14, %v5568_v8  ;;  %v5571_v0 = vpop.f32.mrb[146].mxu0 }
 0x283   : > { %v5572_v52 = vpop.f32.mrb[147].mxu0 }
 0x284   : > { %v6414_v17 = vadd.f32 %v5570_v25, %v8198_v50  ;;  %v5573_v18 = vadd.f32 %v5572_v52, %v5571_v0 }
 0x286   : > { %v8367_v48 = vadd.f32 %v6414_v17, %v8289_v3  ;;  %v6422_v30 = vadd.f32 %v5573_v18, %v8205_v60 }
 0x288   : > { %v2444_v57 = vadd.f32 %v8367_v48, %v2443_v41  ;;  %v8372_v58 = vadd.f32 %v6422_v30, %v8295_v31  ;;  %v5574_v49 = vpop.f32.mrb[148].mxu0 }
 0x289   : > { %v5575_v12 = vpop.f32.mrb[149].mxu0 }
 0x28a   : > { %v2445_v34 = vadd.f32 %v8372_v58, %v2444_v57  ;;  %v5576_v40 = vadd.f32 %v5575_v12, %v5574_v49  ;;  %v5577_v36 = vpop.f32.mrb[150].mxu0 }
 0x28b   : > { %v5578_v39 = vpop.f32.mrb[151].mxu0 }
 0x28c   : > { %v6410_v50 = vadd.f32 %v5576_v40, %v8194_v47  ;;  %v5579_v32 = vadd.f32 %v5578_v39, %v5577_v36  ;;  %v6823_v40 = vld [vmem:[#allocation7 + $0x100] sm:$0xff]  }
 0x28d   : > { %v6824_v39 = vld [vmem:[#allocation7 + $0xc0] sm:$0xff]   ;;  %5616 = vmatprep.subr.bf16.mxu0 %v6823_v40 }
 0x28e   : > { %v8377_v3 = vadd.f32 %v6410_v50, %v8286_v46  ;;  %v6418_v60 = vadd.f32 %v5579_v32, %v8202_v51  ;;  %v6825_v50 = vld [vmem:[#allocation7 + $0x140] sm:$0xff]   ;;  %5617 = vmatpush3.bf16.msra.mxu0 %v6824_v39  ;;  %v6846_v39 = vld [vmem:[#allocation7 + $0xf8] sm:$0xff]  }
 0x28f   : > { %6168 = vmatprep.subr.bf16.mxu1 %v6825_v50 }
 0x290   : > { %v2446_v4 = vadd.f32 %v8377_v3, %v2445_v34  ;;  %v8382_v31 = vadd.f32 %v6418_v60, %v8291_v19  ;;  %v5580_v28 = vpop.f32.mrb[152].mxu0  ;;  %6169 = vmatpush3.bf16.msra.mxu1 %v6825_v50 }
 0x291   : > { %v5581_v6 = vpop.f32.mrb[153].mxu0 }
 0x292   : > { %v2447_v37 = vadd.f32 %v8382_v31, %v2446_v4  ;;  %v5582_v33 = vadd.f32 %v5581_v6, %v5580_v28  ;;  %v5583_v24 = vpop.f32.mrb[154].mxu0  ;;  %v6826_v4 = vld [vmem:[#allocation7 + $0x148] sm:$0xff]   ;;  %v6829_v28 = vld [vmem:[#allocation7 + $0x150] sm:$0xff]  }
 0x293   : > { %v5584_v8 = vpop.f32.mrb[155].mxu0  ;;  %6170 = vmatprep.subr.bf16.mxu1 %v6826_v4  ;;  %v6832_v6 = vld [vmem:[#allocation7 + $0xd0] sm:$0xff]  }
 0x294   : > { %v6430_v47 = vadd.f32 %v5582_v33, %v8214_v42  ;;  %v5585_v14 = vadd.f32 %v5584_v8, %v5583_v24  ;;  %6171 = vmatpush3.bf16.msra.mxu1 %v6826_v4  ;;  %v6835_v33 = vld [vmem:[#allocation7 + $0x118] sm:$0xff]  }
 0x295   : > { %6172 = vmatprep.subr.bf16.mxu1 %v6829_v28  ;;  %v6830_v24 = vld [vmem:[#allocation7 + $0x158] sm:$0xff]  }
 0x296   : > { %v8387_v46 = vadd.f32 %v6430_v47, %v8306_v1  ;;  %v6438_v51 = vadd.f32 %v5585_v14, %v8221_v21  ;;  %v6836_v8 = vld [vmem:[#allocation7 + $0xd8] sm:$0xff]   ;;  %v6837_v14 = vld [vmem:[#allocation7 + $0x120] sm:$0xff]  }
 0x298   : > { %v2448_v41 = vadd.f32 %v8387_v46, %v2447_v37  ;;  %v8392_v19 = vadd.f32 %v6438_v51, %v8311_v59  ;;  %v5586_v25 = vpop.f32.mrb[156].mxu0  ;;  %6173 = vmatpush3.bf16.msra.mxu1 %v6829_v28  ;;  %v6833_v51 = vld [vmem:[#allocation7 + $0x160] sm:$0xff]  }
 0x299   : > { %v5587_v0 = vpop.f32.mrb[157].mxu0  ;;  %6174 = vmatprep.subr.bf16.mxu1 %v6830_v24 }
 0x29a   : > { %v2449_v52 = vadd.f32 %v8392_v19, %v2448_v41  ;;  %v5588_v17 = vadd.f32 %v5587_v0, %v5586_v25  ;;  %v5589_v18 = vpop.f32.mrb[158].mxu0  ;;  %v6838_v41 = vld [vmem:[#allocation7 + $0xe0] sm:$0xff]  }
 0x29b   : > { %v5590_v30 = vpop.f32.mrb[159].mxu0 }
 0x29c   : > { %v6426_v42 = vadd.f32 %v5588_v17, %v8210_v2  ;;  %v5591_v57 = vadd.f32 %v5590_v30, %v5589_v18  ;;  %v6827_v2 = vld [vmem:[#allocation7 + $0x108] sm:$0xff]   ;;  %6175 = vmatpush3.bf16.msra.mxu1 %v6830_v24 }
 0x29d   : > { %5618 = vmatprep.subr.bf16.mxu0 %v6827_v2  ;;  %6176 = vmatprep.subr.bf16.mxu1 %v6833_v51 }
 0x29e   : > { %v6427_v1 = vadd.f32 %v6426_v42, %v8303_v61  ;;  %v6434_v49 = vadd.f32 %v5591_v57, %v8218_v55  ;;  %v6828_v61 = vld [vmem:[#allocation7 + $0xc8] sm:$0xff]   ;;  %v6842_v57 = vld [vmem:[#allocation7 + $0x130] sm:$0xff]  }
 0x29f   : > { %5619 = vmatpush3.bf16.msra.mxu0 %v6828_v61  ;;  %v6834_v42 = vld [vmem:[#allocation7 + $0x168] sm:$0xff]  }
 0x2a0   : > { %v2450_v21 = vadd.f32 %v6427_v1, %v2449_v52  ;;  %v6435_v12 = vadd.f32 %v6434_v49, %v8308_v45  ;;  %v6831_v45 = vld [vmem:[#allocation7 + $0x110] sm:$0xff]   ;;  %6177 = vmatpush3.bf16.msra.mxu1 %v6833_v51 }
 0x2a1   : > { %5620 = vmatprep.subr.bf16.mxu0 %v6831_v45  ;;  %6178 = vmatprep.subr.bf16.mxu1 %v6834_v42 }
 0x2a2   : > { %v2451_v34 = vadd.f32 %v6435_v12, %v2450_v21  ;;  %v6839_v21 = vld [vmem:[#allocation7 + $0x170] sm:$0xff]  }
 0x2a3   : > { %5621 = vmatpush3.bf16.msra.mxu0 %v6832_v6 }
 0x2a4   : > { %v2452_v59 = vrot.slane %v2451_v34, 4  ;;  %5622 = vmatprep.subr.bf16.mxu0 %v6835_v33  ;;  %6179 = vmatpush3.bf16.msra.mxu1 %v6834_v42  ;;  %v10183_v33 = vld [vmem:[#allocation23_spill] sm:$0xff] }
 0x2a5   : > { %6180 = vmatprep.subr.bf16.mxu1 %v6839_v21 }
 0x2a6   : > { %v2453_v36 = vadd.f32 %v2452_v59, %v2451_v34  ;;  %v6844_v34 = vld [vmem:[#allocation7 + $0x178] sm:$0xff]  }
 0x2a7   : > { %5623 = vmatpush3.bf16.msra.mxu0 %v6836_v8  ;;  %v6845_v59 = vld [vmem:[#allocation7 + $0x138] sm:$0xff]  }
 0x2a8   : > { %v2454_v32 = vrot.slane %v2453_v36, 2  ;;  %5624 = vmatprep.subr.bf16.mxu0 %v6837_v14  ;;  %6181 = vmatpush3.bf16.msra.mxu1 %v6839_v21 }
 0x2a9   : > { %6182 = vmatprep.subr.bf16.mxu1 %v6844_v34 }
 0x2aa   : > { %v2455_v60 = vadd.f32 %v2454_v32, %v2453_v36 }
 0x2ab   : > { %5625 = vmatpush3.bf16.msra.mxu0 %v6838_v41 }
 0x2ac   : > { %v2456_v55 = vrot.slane %v2455_v60, 1  ;;  %6183 = vmatpush3.bf16.msra.mxu1 %v6844_v34 }
 0x2ae   : > { %v2457_v37 = vadd.f32 %v2456_v55, %v2455_v60  ;;  %v8491_v55 = vld [vmem:[#allocation7 + $0x80] sm:$0xff]  }
 0x2af   : > { %6216 = vmatprep.subr.bf16.mxu1 %v8491_v55 }
 0x2b0   : > { %v8399_v47 = vmul.f32 0.00390625, %v2457_v37 }
 0x2b2   : > { %v8403_v25 = vsub.f32 %v8347_v56, %v8399_v47  ;;  %v8407_v0 = vsub.f32 %v8352_v27, %v8399_v47  ;;  %v8411_v52 = vsub.f32 %v8357_v43, %v8399_v47  ;;  %v8415_v17 = vsub.f32 %v8362_v35, %v8399_v47 }
 0x2b3   : > { %v8419_v18 = vsub.f32 %v8367_v48, %v8399_v47  ;;  %v8423_v56 = vsub.f32 %v8372_v58, %v8399_v47  ;;  %v8427_v27 = vsub.f32 %v8377_v3, %v8399_v47  ;;  %v8431_v43 = vsub.f32 %v8382_v31, %v8399_v47  ;;  %v6840_v3 = vld [vmem:[#allocation7 + $0x128] sm:$0xff]  }
 0x2b4   : > { %v8435_v35 = vsub.f32 %v8387_v46, %v8399_v47  ;;  %v8439_v48 = vsub.f32 %v8392_v19, %v8399_v47  ;;  %v8442_v58 = vsub.f32 %v6427_v1, %v8399_v47  ;;  %v8445_v30 = vsub.f32 %v6435_v12, %v8399_v47  ;;  %v6841_v19 = vld [vmem:[#allocation7 + $0xe8] sm:$0xff]   ;;  %5626 = vmatprep.subr.bf16.mxu0 %v6840_v3 }
 0x2b5   : > { %v8449_v31 = vsub.f32 %v8224_v53, %v8399_v47  ;;  %v8453_v46 = vsub.f32 %v8227_v38, %v8399_v47  ;;  %v8457_v1 = vsub.f32 %v8230_v5, %v8399_v47  ;;  %5627 = vmatpush3.bf16.msra.mxu0 %v6841_v19  ;;  %v6843_v38 = vld [vmem:[#allocation7 + $0xf0] sm:$0xff]   ;;  %v8465_v12 = vsub.f32 %v8233_v13, %v8399_v47 }
 0x2b6   : > { %5628 = vmatprep.subr.bf16.mxu0 %v6842_v57  ;;  %v8469_v5 = vsub.f32 %v8236_v15, %v8399_v47  ;;  %v8475_v13 = vsub.f32 %v8239_v62, %v8399_v47  ;;  %v8481_v15 = vsub.f32 %v8246_v54, %v8399_v47  ;;  %v8487_v4 = vsub.f32 %v8251_v11, %v8399_v47 }
 0x2b7   : > { %v2492_v49 = vmul.f32 %v8449_v31, %v8449_v31  ;;  %v2493_v53 = vmul.f32 %v8453_v46, %v8453_v46  ;;  %v2494_v40 = vmul.f32 %v8457_v1, %v8457_v1  ;;  %v2495_v50 = vmul.f32 %v8465_v12, %v8465_v12 }
 0x2b8   : > { %v2496_v2 = vmul.f32 %v8469_v5, %v8469_v5  ;;  %v2497_v62 = vmul.f32 %v8475_v13, %v8475_v13  ;;  %v8495_v45 = vsub.f32 %v8264_v7, %v8399_v47  ;;  %v2498_v54 = vmul.f32 %v8481_v15, %v8481_v15 }
 0x2b9   : > { %v2524_v36 = vadd.f32 %v2493_v53, %v2492_v49  ;;  %5629 = vmatpush3.bf16.msra.mxu0 %v6843_v38  ;;  %v8502_v11 = vsub.f32 %v8268_v22, %v8399_v47  ;;  %v2499_v6 = vmul.f32 %v8487_v4, %v8487_v4  ;;  %v8508_v24 = vsub.f32 %v10183_v33, %v8399_v47 }
 0x2ba   : > { %5630 = vmatprep.subr.bf16.mxu0 %v6845_v59  ;;  %v2500_v7 = vmul.f32 %v8495_v45, %v8495_v45  ;;  %v8514_v14 = vsub.f32 %v8284_v26, %v8399_v47  ;;  %v8520_v41 = vsub.f32 %v8297_v16, %v8399_v47  ;;  %v8526_v19 = vsub.f32 %v8301_v23, %v8399_v47 }
 0x2bb   : > { %v2525_v32 = vadd.f32 %v2524_v36, %v2494_v40  ;;  %v2501_v22 = vmul.f32 %v8502_v11, %v8502_v11  ;;  %v2502_v3 = vmul.f32 %v8508_v24, %v8508_v24  ;;  %v8532_v49 = vsub.f32 %v8315_v10, %v8399_v47 }
 0x2bc   : > { %v2503_v26 = vmul.f32 %v8514_v14, %v8514_v14  ;;  %v2504_v16 = vmul.f32 %v8520_v41, %v8520_v41  ;;  %v8538_v21 = vsub.f32 %v8320_v9, %v8399_v47  ;;  %v2505_v23 = vmul.f32 %v8526_v19, %v8526_v19 }
 0x2bd   : > { %v2526_v60 = vadd.f32 %v2525_v32, %v2495_v50  ;;  %5631 = vmatpush3.bf16.msra.mxu0 %v6846_v39  ;;  %v8544_v34 = vsub.f32 %v8326_v63, %v8399_v47  ;;  %v2506_v10 = vmul.f32 %v8532_v49, %v8532_v49  ;;  %v8550_v40 = vsub.f32 %v8330_v29, %v8399_v47 }
 0x2be   : > { %v2507_v9 = vmul.f32 %v8538_v21, %v8538_v21  ;;  %v8556_v39 = vsub.f32 %v8336_v44, %v8399_v47  ;;  %v8562_v32 = vsub.f32 %v8341_v20, %v8399_v47  ;;  %v2513_v20 = vmul.f32 %v8407_v0, %v8407_v0 }
 0x2bf   : > { %v2527_v61 = vadd.f32 %v2526_v60, %v2496_v2  ;;  %v2508_v63 = vmul.f32 %v8544_v34, %v8544_v34  ;;  %v2509_v29 = vmul.f32 %v8550_v40, %v8550_v40  ;;  %v2515_v33 = vmul.f32 %v8415_v17, %v8415_v17 }
 0x2c0   : > { %v2510_v60 = vmul.f32 %v8556_v39, %v8556_v39  ;;  %v2511_v44 = vmul.f32 %v8562_v32, %v8562_v32 }
 0x2c1   : > { %v2528_v28 = vadd.f32 %v2527_v61, %v2497_v62 }
 0x2c3   : > { %v2529_v37 = vadd.f32 %v2528_v28, %v2498_v54  ;;  %v2512_v54 = vmul.f32 %v8403_v25, %v8403_v25 }
 0x2c5   : > { %v2530_v8 = vadd.f32 %v2529_v37, %v2499_v6  ;;  %v2514_v6 = vmul.f32 %v8411_v52, %v8411_v52 }
 0x2c7   : > { %v2531_v51 = vadd.f32 %v2530_v8, %v2500_v7  ;;  %v2516_v8 = vmul.f32 %v8419_v18, %v8419_v18 }
 0x2c9   : > { %v2532_v42 = vadd.f32 %v2531_v51, %v2501_v22  ;;  %v2517_v51 = vmul.f32 %v8423_v56, %v8423_v56 }
 0x2cb   : > { %v2533_v57 = vadd.f32 %v2532_v42, %v2502_v3  ;;  %v2518_v42 = vmul.f32 %v8427_v27, %v8427_v27 }
 0x2cd   : > { %v2534_v53 = vadd.f32 %v2533_v57, %v2503_v26  ;;  %v2519_v57 = vmul.f32 %v8431_v43, %v8431_v43 }
 0x2cf   : > { %v2535_v38 = vadd.f32 %v2534_v53, %v2504_v16  ;;  %v2520_v53 = vmul.f32 %v8435_v35, %v8435_v35 }
 0x2d1   : > { %v2536_v59 = vadd.f32 %v2535_v38, %v2505_v23  ;;  %v2521_v38 = vmul.f32 %v8439_v48, %v8439_v48 }
 0x2d3   : > { %v2537_v36 = vadd.f32 %v2536_v59, %v2506_v10  ;;  %v2522_v59 = vmul.f32 %v8442_v58, %v8442_v58 }
 0x2d5   : > { %v2538_v50 = vadd.f32 %v2537_v36, %v2507_v9  ;;  %v2523_v36 = vmul.f32 %v8445_v30, %v8445_v30 }
 0x2d7   : > { %v2539_v2 = vadd.f32 %v2538_v50, %v2508_v63 }
 0x2d9   : > { %v2540_v62 = vadd.f32 %v2539_v2, %v2509_v29  ;;  %v6855_v2 = vld [vmem:[#allocation7 + $0x40] sm:$0xff]  }
 0x2da   : > { %5752 = vmatprep.subr.bf16.mxu0 %v6855_v2 }
 0x2db   : > { %v2541_v61 = vadd.f32 %v2540_v62, %v2510_v60 }
 0x2dd   : > { %v2542_v28 = vadd.f32 %v2541_v61, %v2511_v44 }
 0x2df   : > { %v2543_v47 = vadd.f32 %v2542_v28, %v2512_v54 }
 0x2e1   : > { %v2544_v37 = vadd.f32 %v2543_v47, %v2513_v20 }
 0x2e3   : > { %v2545_v7 = vadd.f32 %v2544_v37, %v2514_v6  ;;  %v8601_v37 = vld [vmem:[%s10032_s2] ss:$0 sm:$0xff] }
 0x2e5   : > { %v2546_v22 = vadd.f32 %v2545_v7, %v2515_v33 }
 0x2e7   : > { %v2547_v3 = vadd.f32 %v2546_v22, %v2516_v8 }
 0x2e9   : > { %v2548_v26 = vadd.f32 %v2547_v3, %v2517_v51  ;;  %v8617_v3 = vld [vmem:[%s10033_s3] ss:$0 sm:$0xff] }
 0x2eb   : > { %v2549_v16 = vadd.f32 %v2548_v26, %v2518_v42 }
 0x2ed   : > { %v2550_v23 = vadd.f32 %v2549_v16, %v2519_v57 }
 0x2ef   : > { %v2551_v10 = vadd.f32 %v2550_v23, %v2520_v53 }
 0x2f1   : > { %v2552_v9 = vadd.f32 %v2551_v10, %v2521_v38 }
 0x2f3   : > { %v2553_v63 = vadd.f32 %v2552_v9, %v2522_v59 }
 0x2f5   : > { %v2554_v50 = vadd.f32 %v2553_v63, %v2523_v36 }
 0x2f7   : > { %v2555_v29 = vrot.slane %v2554_v50, 4 }
 0x2f9   : > { %v2556_v60 = vadd.f32 %v2555_v29, %v2554_v50 }
 0x2fb   : > { %v2557_v62 = vrot.slane %v2556_v60, 2 }
 0x2fd   : > { %v2558_v44 = vadd.f32 %v2557_v62, %v2556_v60 }
 0x2ff   : > { %v2559_v61 = vrot.slane %v2558_v44, 1 }
 0x301   : > { %v2560_v54 = vadd.f32 %v2559_v61, %v2558_v44 }
 0x303   : > { %v2561_v28 = vmul.f32 0.00390625, %v2560_v54 }
 0x305   : > { %v2562_v20 = vadd.f32 1e-05, %v2561_v28 }
 0x307   : > { %6895 = vrsqrt.f32 %v2562_v20 }
 0x311   : > { %v8594_v47 = vpop.eup %6895 }
 0x312   : > { %v2595_v6 = vmul.f32 %v8594_v47, %v8445_v30  ;;  %v2566_v33 = vmul.f32 %v8594_v47, %v8457_v1  ;;  %v2567_v7 = vmul.f32 %v8594_v47, %v8465_v12  ;;  %v2568_v8 = vmul.f32 %v8594_v47, %v8469_v5 }
 0x313   : > { %v2569_v22 = vmul.f32 %v8594_v47, %v8475_v13  ;;  %v2564_v30 = vmul.f32 %v8594_v47, %v8449_v31  ;;  %v2565_v1 = vmul.f32 %v8594_v47, %v8453_v46  ;;  %v2570_v12 = vmul.f32 %v8594_v47, %v8481_v15 }
 0x314   : > { %v2634_v51 = vmul.f32 %v8601_v37, %v2595_v6  ;;  %v2571_v5 = vmul.f32 %v8594_v47, %v8487_v4  ;;  %v2572_v13 = vmul.f32 %v8594_v47, %v8495_v45  ;;  %v2573_v31 = vmul.f32 %v8594_v47, %v8502_v11 }
 0x315   : > { %v2574_v42 = vmul.f32 %v8594_v47, %v8508_v24  ;;  %v2575_v26 = vmul.f32 %v8594_v47, %v8514_v14  ;;  %v2576_v46 = vmul.f32 %v8594_v47, %v8520_v41  ;;  %v2605_v15 = vmul.f32 %v8601_v37, %v2566_v33 }
 0x316   : > { %v2606_v57 = vmul.f32 %v8601_v37, %v2567_v7  ;;  %v2607_v4 = vmul.f32 %v8601_v37, %v2568_v8  ;;  %v2608_v45 = vmul.f32 %v8601_v37, %v2569_v22  ;;  %v8640_v16 = vadd.f32 %v8617_v3, %v2634_v51 }
 0x317   : > { %v2577_v11 = vmul.f32 %v8594_v47, %v8526_v19  ;;  %v2578_v24 = vmul.f32 %v8594_v47, %v8532_v49  ;;  %v2579_v14 = vmul.f32 %v8594_v47, %v8538_v21  ;;  %v2580_v41 = vmul.f32 %v8594_v47, %v8544_v34 }
 0x318   : > { %v2581_v53 = vmul.f32 %v8594_v47, %v8550_v40  ;;  %v2582_v23 = vmul.f32 %v8594_v47, %v8556_v39  ;;  %v8656_v38 = vmul.f32 %v8594_v47, %v8562_v32  ;;  %v2603_v19 = vmul.f32 %v8601_v37, %v2564_v30 }
 0x319   : > { %v2604_v49 = vmul.f32 %v8601_v37, %v2565_v1  ;;  %v2609_v10 = vmul.f32 %v8601_v37, %v2570_v12  ;;  %v2610_v21 = vmul.f32 %v8601_v37, %v2571_v5  ;;  %v2644_v34 = vadd.f32 %v8617_v3, %v2605_v15 }
 0x31a   : > { %v2645_v59 = vadd.f32 %v8617_v3, %v2606_v57  ;;  %v2646_v40 = vadd.f32 %v8617_v3, %v2607_v4  ;;  %v2647_v39 = vadd.f32 %v8617_v3, %v2608_v45  ;;  %v2705_v9 = vmax.f32 %v8640_v16, 0.0 }
 0x31b   : > { %v8669_v32 = vmul.f32 %v8594_v47, %v8403_v25  ;;  %v2611_v36 = vmul.f32 %v8601_v37, %v2572_v13  ;;  %v2612_v63 = vmul.f32 %v8601_v37, %v2573_v31  ;;  %v8675_v50 = vmul.f32 %v8594_v47, %v8407_v0 }
 0x31c   : > { %v8679_v29 = vmul.f32 %v8594_v47, %v8411_v52  ;;  %v8683_v2 = vmul.f32 %v8594_v47, %v8415_v17  ;;  %v8687_v25 = vmul.f32 %v8594_v47, %v8419_v18  ;;  %v2642_v60 = vadd.f32 %v8617_v3, %v2603_v19 }
 0x31d   : > { %v2643_v62 = vadd.f32 %v8617_v3, %v2604_v49  ;;  %v2648_v44 = vadd.f32 %v8617_v3, %v2609_v10  ;;  %v2649_v0 = vadd.f32 %v8617_v3, %v2610_v21  ;;  %v2676_v61 = vmax.f32 %v2644_v34, 0.0 }
 0x31e   : > { %v2677_v54 = vmax.f32 %v2645_v59, 0.0  ;;  %v2678_v52 = vmax.f32 %v2646_v40, 0.0  ;;  %v2679_v28 = vmax.f32 %v2647_v39, 0.0  ;;  %v8695_v17 = vmul.f32 %v8594_v47, %v8423_v56 }
 0x31f   : > { %v8699_v18 = vmul.f32 %v8594_v47, %v8427_v27  ;;  %v2650_v20 = vadd.f32 %v8617_v3, %v2611_v36  ;;  %v2651_v6 = vadd.f32 %v8617_v3, %v2612_v63  ;;  %v8705_v33 = vmul.f32 %v8594_v47, %v8431_v43 }
 0x320   : > { %v2592_v7 = vmul.f32 %v8594_v47, %v8435_v35  ;;  %v2613_v8 = vmul.f32 %v8601_v37, %v2574_v42  ;;  %v2614_v56 = vmul.f32 %v8601_v37, %v2575_v26  ;;  %v2615_v22 = vmul.f32 %v8601_v37, %v2576_v46 }
 0x321   : > { %v2616_v27 = vmul.f32 %v8601_v37, %v2577_v11  ;;  %v2674_v51 = vmax.f32 %v2642_v60, 0.0  ;;  %v2675_v30 = vmax.f32 %v2643_v62, 0.0  ;;  %v2680_v1 = vmax.f32 %v2648_v44, 0.0 }
 0x322   : > { %v2681_v12 = vmax.f32 %v2649_v0, 0.0  ;;  %v8713_v5 = vpack.c.bf16 %v2677_v54, %v2676_v61  ;;  %v8715_v13 = vpack.c.bf16 %v2679_v28, %v2678_v52  ;;  %v2593_v43 = vmul.f32 %v8594_v47, %v8439_v48 }
 0x323   : > { %v2594_v35 = vmul.f32 %v8594_v47, %v8442_v58  ;;  %v2682_v31 = vmax.f32 %v2650_v20, 0.0  ;;  %v2683_v42 = vmax.f32 %v2651_v6, 0.0  ;;  %v2617_v26 = vmul.f32 %v8601_v37, %v2578_v24 }
 0x324   : > { %v2618_v46 = vmul.f32 %v8601_v37, %v2579_v14  ;;  %v2619_v15 = vmul.f32 %v8601_v37, %v2580_v41  ;;  %v2652_v57 = vadd.f32 %v8617_v3, %v2613_v8  ;;  %v2620_v4 = vmul.f32 %v8601_v37, %v2581_v53  ;;  %v6860_v8 = vld [vmem:[#allocation7 + $0x188] sm:$0xff]  }
 0x325   : > { %v2653_v45 = vadd.f32 %v8617_v3, %v2614_v56  ;;  %v2654_v11 = vadd.f32 %v8617_v3, %v2615_v22  ;;  %v8728_v48 = vpack.c.bf16 %v2675_v30, %v2674_v51  ;;  %v2655_v58 = vadd.f32 %v8617_v3, %v2616_v27  ;;  %v6888_v27 = vld [vmem:[#allocation7 + $0x208] sm:$0xff]  }
 0x326   : > { %v8731_v47 = vpack.c.bf16 %v2681_v12, %v2680_v1  ;;  %v2787_v24 = vshll.u32 %v8713_v5, 16  ;;  %v8735_v14 = vshll.u32 %v8715_v13, 16  ;;  %v8738_v41 = vmul.f32 %v8601_v37, %v2582_v23  ;;  %v6848_v1 = vld [vmem:[#allocation7 + $0x88] sm:$0xff]  }
 0x327   : > { %v8740_v19 = vpack.c.bf16 %v2683_v42, %v2682_v31  ;;  %3235 = vmatprep.mubr.bf16.mxu0 %v8728_v48  ;;  %v2726_v53 = vshrl.u32 %v8728_v48, 16  ;;  %v2791_v49 = vshll.u32 %v8728_v48, 16  ;;  %v2684_v10 = vmax.f32 %v2652_v57, 0.0 }
 0x328   : > { %10184 = vst [vmem:[#allocation19_spill] sm:$0xff] %v8731_v47  ;;  %v8746_v21 = vshrl.u32 %v8713_v5, 16  ;;  %v2882_v34 = vrot.slane %v2787_v24, 1  ;;  %v2886_v59 = vrot.slane %v8735_v14, 1  ;;  %v2685_v40 = vmax.f32 %v2653_v45, 0.0 }
 0x329   : > { %v2790_v39 = vrot.slane %v2726_v53, 7  ;;  %v2884_v36 = vrot.slane %v2791_v49, 1  ;;  %v8750_v23 = vshrl.u32 %v8715_v13, 16  ;;  %v2686_v63 = vmax.f32 %v2654_v11, 0.0 }
 0x32a   : > { %v2687_v60 = vmax.f32 %v2655_v58, 0.0  ;;  %v2883_v62 = vor.u32 %v2882_v34, %v8746_v21  ;;  %v8754_v44 = vshll.u32 %v8731_v47, 16  ;;  %v8758_v52 = vshll.u32 %v8740_v19, 16 }
 0x32b   : > { %v2793_v0 = vor.u32 %v2791_v49, %v2790_v39  ;;  %v2885_v61 = vor.u32 %v2884_v36, %v2726_v53  ;;  %v2887_v54 = vor.u32 %v2886_v59, %v8750_v23  ;;  %v2622_v28 = vmul.f32 %v8601_v37, %v8656_v38  ;;  %v6849_v59 = vld [vmem:[#allocation7 + $0x90] sm:$0xff]  }
 0x32c   : > { %v2631_v20 = vmul.f32 %v8601_v37, %v2592_v7  ;;  %v2632_v6 = vmul.f32 %v8601_v37, %v2593_v43  ;;  %v8766_v56 = vsel %vm7492_vm5, %v2883_v62, %v2787_v24  ;;  %v2656_v22 = vadd.f32 %v8617_v3, %v2617_v26  ;;  %v6856_v7 = vld [vmem:[#allocation7] sm:$0xff]   ;;  %v6861_v26 = vld [vmem:[#allocation7 + $0x48] sm:$0xff]   ;;  %v6867_v36 = vld [vmem:[#allocation7 + $0x50] sm:$0xff]  }
 0x32d   : > { %v8771_v51 = vsel %vm7356_vm2, %v2726_v53, %v2793_v0  ;;  %v8775_v30 = vsel %vm7492_vm5, %v2885_v61, %v2791_v49  ;;  %v2786_v38 = vrot.slane %v8746_v21, 7  ;;  %v2657_v12 = vadd.f32 %v8617_v3, %v2618_v46 }
 0x32e   : > { %10187 = vst [vmem:[#allocation24_spill] sm:$0xff] %v8771_v51  ;;  %v2658_v43 = vadd.f32 %v8617_v3, %v2619_v15  ;;  %v8780_v31 = vpack.c.bf16 %v2685_v40, %v2684_v10  ;;  %3236 = vmatmul.mubr.bf16.vlgmr.msra.gmra.mrb[160].mxu0 %v8771_v51  ;;  %6184 = vmatprep.mubr.bf16.mxu1 %v8775_v30  ;;  %v2888_v42 = vrot.slane %v8754_v44, 1  ;;  %v2890_v15 = vrot.slane %v8758_v52, 1 }
 0x32f   : > { %v2659_v57 = vadd.f32 %v8617_v3, %v2620_v4  ;;  %v8786_v45 = vpack.c.bf16 %v2687_v60, %v2686_v63  ;;  %3243 = vmatprep.mubr.bf16.mxu0 %v8713_v5  ;;  %6185 = vmatmul.mubr.bf16.vlgmr.msra.gmra.mrb[96].mxu1 %v8766_v56  ;;  %v8793_v46 = vsel %vm7492_vm5, %v2887_v54, %v8735_v14  ;;  %v8804_v53 = vshrl.u32 %v8731_v47, 16 }
 0x330   : > { %v2623_v11 = vmul.f32 %v8601_v37, %v8669_v32  ;;  %v2624_v58 = vmul.f32 %v8601_v37, %v8675_v50  ;;  %v2633_v4 = vmul.f32 %v8601_v37, %v2594_v35  ;;  %6188 = vmatprep.mubr.bf16.mxu1 %v8793_v46  ;;  %6217 = vmatpush3.bf16.msra.mxu1 %v8491_v55  ;;  %v8809_v32 = vshrl.u32 %v8740_v19, 16  ;;  %v6862_v50 = vld [vmem:[#allocation7 + $0x8] sm:$0xff]  }
 0x331   : > { %10188 = vst [vmem:[#allocation20_spill] sm:$0xff] %v8786_v45  ;;  %v2670_v49 = vadd.f32 %v8617_v3, %v2631_v20  ;;  %v2671_v10 = vadd.f32 %v8617_v3, %v2632_v6  ;;  %v2789_v34 = vor.u32 %v2787_v24, %v2786_v38  ;;  %6218 = vmatprep.subr.bf16.mxu1 %v6848_v1  ;;  %v2688_v35 = vmax.f32 %v2656_v22, 0.0 }
 0x332   : > { %5753 = vmatpush3.bf16.msra.mxu0 %v6856_v7  ;;  %v2689_v40 = vmax.f32 %v2657_v12, 0.0  ;;  %v2889_v39 = vor.u32 %v2888_v42, %v8804_v53  ;;  %v8813_v55 = vshll.u32 %v8780_v31, 16  ;;  %v2690_v63 = vmax.f32 %v2658_v43, 0.0  ;;  %v6850_v7 = vld [vmem:[#allocation7 + $0x98] sm:$0xff]  }
 0x333   : > { %5754 = vmatprep.subr.bf16.mxu0 %v6861_v26  ;;  %v2691_v60 = vmax.f32 %v2659_v57, 0.0  ;;  %v2891_v24 = vor.u32 %v2890_v15, %v8809_v32  ;;  %v8817_v62 = vshll.u32 %v8786_v45, 16  ;;  %v2625_v0 = vmul.f32 %v8601_v37, %v8679_v29 }
 0x334   : > { %v8823_v61 = vadd.f32 %v8617_v3, %v8738_v41  ;;  %v2661_v54 = vadd.f32 %v8617_v3, %v2622_v28  ;;  %v2672_v20 = vadd.f32 %v8617_v3, %v2633_v4  ;;  %6219 = vmatpush3.bf16.msra.mxu1 %v6848_v1  ;;  %v8828_v6 = vadd.f32 %v8617_v3, %v2623_v11  ;;  %v6868_v41 = vld [vmem:[#allocation7 + $0x10] sm:$0xff]  }
 0x335   : > { %v2702_v22 = vmax.f32 %v2670_v49, 0.0  ;;  %v8833_v38 = vsel %vm7356_vm2, %v8746_v21, %v2789_v34  ;;  %v2794_v29 = vrot.slane %v8750_v23, 7  ;;  %6220 = vmatprep.subr.bf16.mxu1 %v6849_v59  ;;  %v2703_v12 = vmax.f32 %v2671_v10, 0.0  ;;  %v6873_v21 = vld [vmem:[#allocation7 + $0x58] sm:$0xff]  }
 0x336   : > { %5755 = vmatpush3.bf16.msra.mxu0 %v6862_v50  ;;  %v8836_v28 = vpack.c.bf16 %v2689_v40, %v2688_v35  ;;  %v8842_v1 = vsel %vm7492_vm5, %v2889_v39, %v8754_v44  ;;  %v2892_v43 = vrot.slane %v8813_v55, 1  ;;  %v2663_v42 = vadd.f32 %v8617_v3, %v2624_v58 }
 0x337   : > { %3244 = vmatmul.mubr.bf16.gmra.mrb[164].mxu0 %v8833_v38  ;;  %5756 = vmatprep.subr.bf16.mxu0 %v6867_v36  ;;  %v8846_v26 = vpack.c.bf16 %v2691_v60, %v2690_v63  ;;  %v8853_v57 = vsel %vm7492_vm5, %v2891_v24, %v8758_v52  ;;  %v2894_v15 = vrot.slane %v8817_v62, 1  ;;  %v2626_v11 = vmul.f32 %v8601_v37, %v8683_v2  ;;  %v6851_v2 = vld [vmem:[#allocation7 + $0xa0] sm:$0xff]  }
 0x338   : > { %3251 = vmatprep.mubr.bf16.mxu0 %v8715_v13  ;;  %6189 = vmatmul.mubr.bf16.gmra.mrb[100].mxu1 %v8842_v1  ;;  %v2627_v4 = vmul.f32 %v8601_v37, %v8687_v25  ;;  %v2704_v58 = vmax.f32 %v2672_v20, 0.0  ;;  %v8862_v49 = vshrl.u32 %v8780_v31, 16  ;;  %v2628_v10 = vmul.f32 %v8601_v37, %v8695_v17  ;;  %v6874_v25 = vld [vmem:[#allocation7 + $0x18] sm:$0xff]   ;;  %v6875_v17 = vld [vmem:[#allocation7 + $0x60] sm:$0xff]  }
 0x339   : > { %6192 = vmatprep.mubr.bf16.mxu1 %v8853_v57  ;;  %6221 = vmatpush3.bf16.msra.mxu1 %v6849_v59  ;;  %v2692_v34 = vmax.f32 %v8823_v61, 0.0  ;;  %v2797_v50 = vor.u32 %v8735_v14, %v2794_v29  ;;  %v8869_v35 = vshrl.u32 %v8786_v45, 16  ;;  %v2693_v40 = vmax.f32 %v2661_v54, 0.0 }
 0x33a   : > { %6222 = vmatprep.subr.bf16.mxu1 %v6850_v7  ;;  %5757 = vmatpush3.bf16.msra.mxu0 %v6868_v41  ;;  %v8871_v39 = vpack.c.bf16 %v2703_v12, %v2702_v22  ;;  %v2893_v36 = vor.u32 %v2892_v43, %v8862_v49  ;;  %v8875_v59 = vshll.u32 %v8836_v28, 16  ;;  %v2694_v63 = vmax.f32 %v8828_v6, 0.0  ;;  %v6879_v43 = vld [vmem:[#allocation7 + $0x68] sm:$0xff]  }
 0x33b   : > { %5758 = vmatprep.subr.bf16.mxu0 %v6873_v21  ;;  %v2695_v14 = vmax.f32 %v2663_v42, 0.0  ;;  %v2895_v60 = vor.u32 %v2894_v15, %v8869_v35  ;;  %v8880_v24 = vshll.u32 %v8846_v26, 16  ;;  %v2629_v61 = vmul.f32 %v8601_v37, %v8699_v18 }
 0x33c   : > { %v2664_v54 = vadd.f32 %v8617_v3, %v2625_v0  ;;  %v2665_v20 = vadd.f32 %v8617_v3, %v2626_v11  ;;  %v8888_v22 = vpack.c.bf16 %v2705_v9, %v2704_v58  ;;  %v8891_v6 = vadd.f32 %v8617_v3, %v2627_v4  ;;  %v6852_v0 = vld [vmem:[#allocation7 + $0xa8] sm:$0xff]  }
 0x33d   : > { %6223 = vmatpush3.bf16.msra.mxu1 %v6850_v7  ;;  %v8894_v29 = vadd.f32 %v8617_v3, %v2628_v10  ;;  %v8899_v41 = vsel %vm7356_vm2, %v8750_v23, %v2797_v50  ;;  %v2798_v18 = vrot.slane %v8804_v53, 7  ;;  %v6876_v7 = vld [vmem:[#allocation7 + $0x20] sm:$0xff]   ;;  %v8902_v16 = vpack.c.bf16 %v2693_v40, %v2692_v34 }
 0x33e   : > { %10189 = vst [vmem:[#allocation25_spill] sm:$0xff] %v8899_v41  ;;  %6224 = vmatprep.subr.bf16.mxu1 %v6851_v2  ;;  %5759 = vmatpush3.bf16.msra.mxu0 %v6874_v25  ;;  %v8908_v9 = vsel %vm7492_vm5, %v2893_v36, %v8813_v55  ;;  %v2896_v12 = vrot.slane %v8875_v59, 1  ;;  %v8912_v23 = vshrl.u32 %v8871_v39, 16  ;;  %v8914_v21 = vpack.c.bf16 %v2695_v14, %v2694_v63 }
 0x33f   : > { %3252 = vmatmul.mubr.bf16.gmra.mrb[168].mxu0 %v8899_v41  ;;  %5760 = vmatprep.subr.bf16.mxu0 %v6875_v17  ;;  %v8921_v42 = vsel %vm7492_vm5, %v2895_v60, %v8817_v62  ;;  %v2898_v15 = vrot.slane %v8880_v24, 1  ;;  %v8925_v11 = vshrl.u32 %v8888_v22, 16  ;;  %v2630_v4 = vmul.f32 %v8601_v37, %v8705_v33  ;;  %v6853_v17 = vld [vmem:[#allocation7 + $0xb0] sm:$0xff]   ;;  %v6880_v37 = vld [vmem:[#allocation7 + $0x28] sm:$0xff]  }
 0x340   : > { %3259 = vmatprep.mubr.bf16.mxu0 %v8731_v47  ;;  %6193 = vmatmul.mubr.bf16.gmra.mrb[104].mxu1 %v8908_v9  ;;  %v2696_v58 = vmax.f32 %v2664_v54, 0.0  ;;  %v2697_v10 = vmax.f32 %v2665_v20, 0.0  ;;  %v8931_v34 = vshrl.u32 %v8836_v28, 16  ;;  %v2698_v50 = vmax.f32 %v8891_v6, 0.0  ;;  %v6881_v60 = vld [vmem:[#allocation7 + $0x70] sm:$0xff]  }
 0x341   : > { %6196 = vmatprep.mubr.bf16.mxu1 %v8921_v42  ;;  %6225 = vmatpush3.bf16.msra.mxu1 %v6851_v2  ;;  %v2699_v25 = vmax.f32 %v8894_v29, 0.0  ;;  %v2801_v40 = vor.u32 %v8754_v44, %v2798_v18  ;;  %v8937_v36 = vshrl.u32 %v8846_v26, 16  ;;  %v8941_v63 = vshll.u32 %v8902_v16, 16  ;;  %v6882_v41 = vld [vmem:[#allocation7 + $0x30] sm:$0xff]  }
 0x342   : > { %6226 = vmatprep.subr.bf16.mxu1 %v6852_v0  ;;  %5761 = vmatpush3.bf16.msra.mxu0 %v6876_v7  ;;  %v2897_v33 = vor.u32 %v2896_v12, %v8931_v34  ;;  %v8944_v2 = vshll.u32 %v8871_v39, 16  ;;  %v2842_v14 = vrot.slane %v8912_v23, 7  ;;  %v8949_v54 = vshll.u32 %v8914_v21, 16 }
 0x343   : > { %5762 = vmatprep.subr.bf16.mxu0 %v6879_v43  ;;  %v2899_v44 = vor.u32 %v2898_v15, %v8937_v36  ;;  %v8952_v20 = vshll.u32 %v8888_v22, 16  ;;  %v2846_v6 = vrot.slane %v8925_v11, 7  ;;  %v2668_v29 = vadd.f32 %v8617_v3, %v2629_v61  ;;  %v6854_v15 = vld [vmem:[#allocation7 + $0xb8] sm:$0xff]  }
 0x344   : > { %v2845_v18 = vor.u32 %v8944_v2, %v2842_v14  ;;  %v2669_v7 = vadd.f32 %v8617_v3, %v2630_v4  ;;  %v8961_v12 = vsel %vm7356_vm2, %v8804_v53, %v2801_v40  ;;  %v2802_v43 = vrot.slane %v8809_v32, 7  ;;  %v6886_v14 = vld [vmem:[#allocation7 + $0x38] sm:$0xff]  }
 0x345   : > { %6227 = vmatpush3.bf16.msra.mxu1 %v6852_v0  ;;  %v2849_v47 = vor.u32 %v8952_v20, %v2846_v6  ;;  %v8965_v51 = vpack.c.bf16 %v2697_v10, %v2696_v58  ;;  %v8971_v3 = vsel %vm7492_vm5, %v2897_v33, %v8875_v59  ;;  %v2900_v53 = vrot.slane %v8941_v63, 1  ;;  %v6885_v0 = vld [vmem:[#allocation7 + $0x78] sm:$0xff]   ;;  %v6857_v33 = vld [vmem:[#allocation7 + $0x1c0] sm:$0xff]  }
 0x346   : > { %6228 = vmatprep.subr.bf16.mxu1 %v6853_v17  ;;  %5763 = vmatpush3.bf16.msra.mxu0 %v6880_v37  ;;  %v8977_v61 = vsel %vm7356_vm2, %v8912_v23, %v2845_v18  ;;  %v8979_v4 = vpack.c.bf16 %v2699_v25, %v2698_v50  ;;  %v8986_v58 = vsel %vm7492_vm5, %v2899_v44, %v8880_v24  ;;  %v2902_v10 = vrot.slane %v8949_v54, 1 }
 0x347   : > { %3260 = vmatmul.mubr.bf16.gmra.mrb[172].mxu0 %v8961_v12  ;;  %5764 = vmatprep.subr.bf16.mxu0 %v6881_v60  ;;  %v8992_v40 = vsel %vm7356_vm2, %v8925_v11, %v2849_v47  ;;  %v8996_v50 = vshrl.u32 %v8902_v16, 16  ;;  %v2805_v25 = vor.u32 %v8758_v52, %v2802_v43  ;;  %v9000_v37 = vshrl.u32 %v8914_v21, 16 }
 0x348   : > { %3267 = vmatprep.mubr.bf16.mxu0 %v8740_v19  ;;  %6197 = vmatmul.mubr.bf16.gmra.mrb[108].mxu1 %v8971_v3  ;;  %v2700_v60 = vmax.f32 %v2668_v29, 0.0  ;;  %v2701_v44 = vmax.f32 %v2669_v7, 0.0  ;;  %v9004_v6 = vshll.u32 %v8965_v51, 16 }
 0x349   : > { %6200 = vmatprep.mubr.bf16.mxu1 %v8986_v58  ;;  %6229 = vmatpush3.bf16.msra.mxu1 %v6853_v17  ;;  %v2901_v47 = vor.u32 %v2900_v53, %v8996_v50  ;;  %v2903_v18 = vor.u32 %v2902_v10, %v9000_v37  ;;  %v9008_v17 = vshll.u32 %v8979_v4, 16  ;;  %v9013_v52 = vsel %vm7356_vm2, %v8809_v32, %v2805_v25 }
 0x34a   : > { %6230 = vmatprep.subr.bf16.mxu1 %v6854_v15  ;;  %5765 = vmatpush3.bf16.msra.mxu0 %v6882_v41  ;;  %v2806_v41 = vrot.slane %v8862_v49, 7  ;;  %v9016_v29 = vpack.c.bf16 %v2701_v44, %v2700_v60  ;;  %v2904_v43 = vrot.slane %v9004_v6, 1  ;;  %v9035_v53 = vshrl.u32 %v8965_v51, 16 }
 0x34b   : > { %5766 = vmatprep.subr.bf16.mxu0 %v6885_v0  ;;  %v9022_v7 = vsel %vm7492_vm5, %v2901_v47, %v8941_v63  ;;  %v9030_v32 = vsel %vm7492_vm5, %v2903_v18, %v8949_v54  ;;  %v9039_v10 = vshrl.u32 %v8979_v4, 16  ;;  %v2810_v44 = vrot.slane %v8869_v35, 7 }
 0x34c   : > { %v2809_v0 = vor.u32 %v8813_v55, %v2806_v41  ;;  %v2905_v25 = vor.u32 %v2904_v43, %v9035_v53  ;;  %v2910_v18 = vrot.slane %v8944_v2, 1  ;;  %v9069_v41 = vshrl.u32 %v9016_v29, 16 }
 0x34d   : > { %6231 = vmatpush3.bf16.msra.mxu1 %v6854_v15  ;;  %v2906_v15 = vrot.slane %v9008_v17, 1  ;;  %v2813_v43 = vor.u32 %v8817_v62, %v2810_v44  ;;  %v2912_v62 = vrot.slane %v8952_v20, 1 }
 0x34e   : > { %5888 = vmatprep.subr.bf16.mxu1 %v6857_v33  ;;  %5767 = vmatpush3.bf16.msra.mxu0 %v6886_v14  ;;  %v9043_v33 = vshll.u32 %v9016_v29, 16  ;;  %v9049_v60 = vsel %vm7356_vm2, %v8862_v49, %v2809_v0  ;;  %v9056_v55 = vsel %vm7492_vm5, %v2905_v25, %v9004_v6  ;;  %v2911_v0 = vor.u32 %v2910_v18, %v8912_v23 }
 0x34f   : > { %3268 = vmatmul.mubr.bf16.gmra.mrb[176].mxu0 %v9013_v52  ;;  %v2907_v14 = vor.u32 %v2906_v15, %v9039_v10  ;;  %v9077_v25 = vsel %vm7356_vm2, %v8869_v35, %v2813_v43  ;;  %v2913_v44 = vor.u32 %v2912_v62, %v8925_v11  ;;  %v2818_v18 = vrot.slane %v8937_v36, 7  ;;  %v6858_v11 = vld [vmem:[#allocation7 + $0x180] sm:$0xff]   ;;  %v6865_v62 = vld [vmem:[#allocation7 + $0x1d8] sm:$0xff]  }
 0x350   : > { %3275 = vmatprep.mubr.bf16.mxu0 %v8780_v31  ;;  %6201 = vmatmul.mubr.bf16.gmra.mrb[112].mxu1 %v9022_v7  ;;  %v2908_v47 = vrot.slane %v9043_v33, 1  ;;  %v9092_v35 = vsel %vm7492_vm5, %v2911_v0, %v8944_v2  ;;  %v2822_v43 = vrot.slane %v8996_v50, 7 }
 0x351   : > { %6204 = vmatprep.mubr.bf16.mxu1 %v9030_v32  ;;  %v9064_v49 = vsel %vm7492_vm5, %v2907_v14, %v9008_v17  ;;  %v2814_v14 = vrot.slane %v8931_v34, 7  ;;  %v9107_v2 = vsel %vm7492_vm5, %v2913_v44, %v8952_v20  ;;  %v6863_v20 = vld [vmem:[#allocation7 + $0x1d0] sm:$0xff]  }
 0x352   : > { %v2909_v15 = vor.u32 %v2908_v47, %v9069_v41 }
 0x353   : > { %v2817_v23 = vor.u32 %v8875_v59, %v2814_v14  ;;  %v2821_v59 = vor.u32 %v8880_v24, %v2818_v18  ;;  %v2825_v24 = vor.u32 %v8941_v63, %v2822_v43  ;;  %v2826_v14 = vrot.slane %v9000_v37, 7  ;;  %v6877_v43 = vld [vmem:[#allocation7 + $0x1f0] sm:$0xff]  }
 0x354   : > { %v2830_v18 = vrot.slane %v9035_v53, 7 }
 0x355   : > { %v9100_v47 = vsel %vm7356_vm2, %v8931_v34, %v2817_v23  ;;  %v9116_v34 = vsel %vm7356_vm2, %v8937_v36, %v2821_v59  ;;  %v6864_v36 = vld [vmem:[#allocation7 + $0x190] sm:$0xff]   ;;  %v9127_v0 = vsel %vm7356_vm2, %v8996_v50, %v2825_v24  ;;  %v2829_v63 = vor.u32 %v8949_v54, %v2826_v14  ;;  %v6869_v23 = vld [vmem:[#allocation7 + $0x1e0] sm:$0xff]   ;;  %v6871_v59 = vld [vmem:[#allocation7 + $0x1e8] sm:$0xff]  }
 0x356   : > { %v6870_v50 = vld [vmem:[#allocation7 + $0x1a0] sm:$0xff]   ;;  %v6872_v54 = vld [vmem:[#allocation7 + $0x1a8] sm:$0xff]   ;;  %v6883_v24 = vld [vmem:[#allocation7 + $0x1f8] sm:$0xff]   ;;  %v2838_v14 = vrot.slane %v9069_v41, 7 }
 0x357   : > { %3276 = vmatmul.mubr.bf16.gmra.mrb[180].mxu0 %v9049_v60  ;;  %v9138_v44 = vsel %vm7356_vm2, %v9000_v37, %v2829_v63  ;;  %v6878_v37 = vld [vmem:[#allocation7 + $0x1b0] sm:$0xff]   ;;  %v10192_v63 = vld [vmem:[#allocation19_spill] sm:$0xff] }
 0x358   : > { %3283 = vmatprep.mubr.bf16.mxu0 %v8786_v45  ;;  %6205 = vmatmul.mubr.bf16.gmra.mrb[116].mxu1 %v9056_v55  ;;  %v9084_v45 = vsel %vm7492_vm5, %v2909_v15, %v9043_v33  ;;  %v6859_v15 = vld [vmem:[#allocation7 + $0x1c8] sm:$0xff]  }
 0x359   : > { %6208 = vmatprep.mubr.bf16.mxu1 %v9064_v49 }
 0x35f   : > { %3284 = vmatmul.mubr.bf16.gmra.mrb[184].mxu0 %v9077_v25 }
 0x360   : > { %3291 = vmatprep.mubr.bf16.mxu0 %v8836_v28  ;;  %6209 = vmatmul.mubr.bf16.gmra.mrb[120].mxu1 %v9084_v45 }
 0x361   : > { %6212 = vmatprep.mubr.bf16.mxu1 %v9092_v35 }
 0x367   : > { %3292 = vmatmul.mubr.bf16.gmra.mrb[188].mxu0 %v9100_v47 }
 0x368   : > { %3299 = vmatprep.mubr.bf16.mxu0 %v8846_v26  ;;  %6213 = vmatmul.mubr.bf16.gmra.mrb[124].mxu1 %v9107_v2 }
 0x369   : > { %6232 = vmatprep.mubr.bf16.mxu1 %v8766_v56 }
 0x36f   : > { %3300 = vmatmul.mubr.bf16.gmra.mrb[192].mxu0 %v9116_v34 }
 0x370   : > { %3307 = vmatprep.mubr.bf16.mxu0 %v8902_v16  ;;  %6233 = vmatmul.mubr.bf16.vlgmr.msra.gmra.mrb[96].mxu1 %v8775_v30  ;;  %v6866_v30 = vld [vmem:[#allocation7 + $0x198] sm:$0xff]  }
 0x371   : > { %6236 = vmatprep.mubr.bf16.mxu1 %v8766_v56  ;;  %5889 = vmatpush3.bf16.msra.mxu1 %v6858_v11  ;;  %v2833_v11 = vor.u32 %v9004_v6, %v2830_v18  ;;  %v6884_v6 = vld [vmem:[#allocation7 + $0x1b8] sm:$0xff]  }
 0x372   : > { %5890 = vmatprep.subr.bf16.mxu1 %v6859_v15 }
 0x373   : > { %v9149_v15 = vsel %vm7356_vm2, %v9035_v53, %v2833_v11 }
 0x375   : > { %5891 = vmatpush3.bf16.msra.mxu1 %v6860_v8  ;;  %v2834_v8 = vrot.slane %v9039_v10, 7 }
 0x376   : > { %5892 = vmatprep.subr.bf16.mxu1 %v6863_v20 }
 0x377   : > { %3308 = vmatmul.mubr.bf16.gmra.mrb[196].mxu0 %v9127_v0  ;;  %v2837_v20 = vor.u32 %v9008_v17, %v2834_v8  ;;  %v2841_v17 = vor.u32 %v9043_v33, %v2838_v14  ;;  %v6890_v33 = vld [vmem:[#allocation7 + $0x218] sm:$0xff]  }
 0x378   : > { %3315 = vmatprep.mubr.bf16.mxu0 %v8914_v21  ;;  %6237 = vmatmul.mubr.bf16.gmra.mrb[100].mxu1 %v8793_v46 }
 0x379   : > { %6240 = vmatprep.mubr.bf16.mxu1 %v8842_v1  ;;  %5893 = vmatpush3.bf16.msra.mxu1 %v6864_v36  ;;  %v6887_v36 = vld [vmem:[#allocation7 + $0x200] sm:$0xff]   ;;  %v9160_v53 = vsel %vm7356_vm2, %v9039_v10, %v2837_v20  ;;  %v6889_v10 = vld [vmem:[#allocation7 + $0x210] sm:$0xff]  }
 0x37a   : > { %5894 = vmatprep.subr.bf16.mxu1 %v6865_v62  ;;  %v9171_v62 = vsel %vm7356_vm2, %v9069_v41, %v2841_v17  ;;  %v10190_v41 = vld [vmem:[#allocation24_spill] sm:$0xff] }
 0x37d   : > { %5895 = vmatpush3.bf16.msra.mxu1 %v6866_v30  ;;  %v10191_v30 = vld [vmem:[#allocation25_spill] sm:$0xff] }
 0x37e   : > { %5896 = vmatprep.subr.bf16.mxu1 %v6869_v23  ;;  %v6892_v23 = vld [vmem:[#allocation7 + $0x228] sm:$0xff]  }
 0x37f   : > { %3316 = vmatmul.mubr.bf16.gmra.mrb[200].mxu0 %v9138_v44 }
 0x380   : > { %3323 = vmatprep.mubr.bf16.mxu0 %v8965_v51  ;;  %6241 = vmatmul.mubr.bf16.gmra.mrb[104].mxu1 %v8853_v57 }
 0x381   : > { %6244 = vmatprep.mubr.bf16.mxu1 %v8908_v9  ;;  %5897 = vmatpush3.bf16.msra.mxu1 %v6870_v50  ;;  %v6894_v50 = vld [vmem:[#allocation7 + $0x238] sm:$0xff]  }
 0x382   : > { %5898 = vmatprep.subr.bf16.mxu1 %v6871_v59 }
 0x385   : > { %5899 = vmatpush3.bf16.msra.mxu1 %v6872_v54 }
 0x386   : > { %5900 = vmatprep.subr.bf16.mxu1 %v6877_v43 }
 0x387   : > { %3324 = vmatmul.mubr.bf16.gmra.mrb[204].mxu0 %v9149_v15 }
 0x388   : > { %3331 = vmatprep.mubr.bf16.mxu0 %v8979_v4  ;;  %6245 = vmatmul.mubr.bf16.gmra.mrb[108].mxu1 %v8921_v42 }
 0x389   : > { %6248 = vmatprep.mubr.bf16.mxu1 %v8971_v3  ;;  %5901 = vmatpush3.bf16.msra.mxu1 %v6878_v37 }
 0x38a   : > { %5902 = vmatprep.subr.bf16.mxu1 %v6883_v24 }
 0x38d   : > { %5903 = vmatpush3.bf16.msra.mxu1 %v6884_v6 }
 0x38e   : > { %6264 = vmatprep.subr.bf16.mxu1 %v6887_v36 }
 0x38f   : > { %3332 = vmatmul.mubr.bf16.gmra.mrb[208].mxu0 %v9160_v53 }
 0x390   : > { %3339 = vmatprep.mubr.bf16.mxu0 %v9016_v29  ;;  %6249 = vmatmul.mubr.bf16.gmra.mrb[112].mxu1 %v8986_v58 }
 0x391   : > { %6252 = vmatprep.mubr.bf16.mxu1 %v9022_v7 }
 0x397   : > { %3340 = vmatmul.mubr.bf16.gmra.mrb[212].mxu0 %v9171_v62 }
 0x398   : > { %3347 = vmatprep.mubr.bf16.mxu0 %v8871_v39  ;;  %6253 = vmatmul.mubr.bf16.gmra.mrb[116].mxu1 %v9030_v32 }
 0x399   : > { %6256 = vmatprep.mubr.bf16.mxu1 %v9056_v55 }
 0x39f   : > { %3348 = vmatmul.mubr.bf16.gmra.mrb[216].mxu0 %v8977_v61 }
 0x3a0   : > { %3355 = vmatprep.mubr.bf16.mxu0 %v8888_v22  ;;  %6257 = vmatmul.mubr.bf16.gmra.mrb[120].mxu1 %v9064_v49 }
 0x3a1   : > { %6260 = vmatprep.mubr.bf16.mxu1 %v9084_v45 }
 0x3a7   : > { %3356 = vmatmul.mubr.bf16.gmra.mrb[220].mxu0 %v8992_v40 }
 0x3a8   : > { %3701 = vmatprep.mubr.bf16.mxu0 %v8713_v5  ;;  %6261 = vmatmul.mubr.bf16.gmra.mrb[124].mxu1 %v9092_v35 }
 0x3a9   : > { %4216 = vmatprep.mubr.bf16.mxu1 %v8713_v5 }
 0x3af   : > { %3702 = vmatmul.mubr.bf16.vlgmr.msra.gmra.mrb[224].mxu0 %v8833_v38 }
 0x3b0   : > { %3709 = vmatprep.mubr.bf16.mxu0 %v8728_v48  ;;  %4217 = vmatmul.mubr.bf16.vlgmr.msra.gmra.mrb[128].mxu1 %v8833_v38  ;;  %v6891_v48 = vld [vmem:[#allocation7 + $0x220] sm:$0xff]  }
 0x3b1   : > { %4224 = vmatprep.mubr.bf16.mxu1 %v8715_v13  ;;  %6265 = vmatpush3.bf16.msra.mxu1 %v6887_v36 }
 0x3b2   : > { %6266 = vmatprep.subr.bf16.mxu1 %v6888_v27 }
 0x3b5   : > { %6267 = vmatpush3.bf16.msra.mxu1 %v6888_v27 }
 0x3b6   : > { %6268 = vmatprep.subr.bf16.mxu1 %v6889_v10 }
 0x3b7   : > { %3710 = vmatmul.mubr.bf16.gmra.mrb[228].mxu0 %v10190_v41 }
 0x3b8   : > { %3717 = vmatprep.mubr.bf16.mxu0 %v8713_v5  ;;  %4225 = vmatmul.mubr.bf16.gmra.mrb[132].mxu1 %v10191_v30  ;;  %v6893_v5 = vld [vmem:[#allocation7 + $0x230] sm:$0xff]  }
 0x3b9   : > { %4232 = vmatprep.mubr.bf16.mxu1 %v10192_v63  ;;  %6269 = vmatpush3.bf16.msra.mxu1 %v6889_v10 }
 0x3ba   : > { %6270 = vmatprep.subr.bf16.mxu1 %v6890_v33 }
 0x3bd   : > { %6271 = vmatpush3.bf16.msra.mxu1 %v6890_v33 }
 0x3be   : > { %6272 = vmatprep.subr.bf16.mxu1 %v6891_v48 }
 0x3bf   : > { %3718 = vmatmul.mubr.bf16.gmra.mrb[232].mxu0 %v8833_v38 }
 0x3c0   : > { %3725 = vmatprep.mubr.bf16.mxu0 %v8715_v13  ;;  %4233 = vmatmul.mubr.bf16.gmra.mrb[136].mxu1 %v8961_v12  ;;  %v10193_v13 = vld [vmem:[#allocation20_spill] sm:$0xff] }
 0x3c1   : > { %4240 = vmatprep.mubr.bf16.mxu1 %v8740_v19  ;;  %6273 = vmatpush3.bf16.msra.mxu1 %v6891_v48 }
 0x3c2   : > { %6274 = vmatprep.subr.bf16.mxu1 %v6892_v23 }
 0x3c5   : > { %6275 = vmatpush3.bf16.msra.mxu1 %v6892_v23 }
 0x3c6   : > { %6276 = vmatprep.subr.bf16.mxu1 %v6893_v5 }
 0x3c7   : > { %3726 = vmatmul.mubr.bf16.gmra.mrb[236].mxu0 %v10191_v30 }
 0x3c8   : > { %3733 = vmatprep.mubr.bf16.mxu0 %v10192_v63  ;;  %4241 = vmatmul.mubr.bf16.gmra.mrb[140].mxu1 %v9013_v52 }
 0x3c9   : > { %4248 = vmatprep.mubr.bf16.mxu1 %v8780_v31  ;;  %6277 = vmatpush3.bf16.msra.mxu1 %v6893_v5 }
 0x3ca   : > { %6278 = vmatprep.subr.bf16.mxu1 %v6894_v50 }
 0x3cd   : > { %6279 = vmatpush3.bf16.msra.mxu1 %v6894_v50 }
 0x3cf   : > { %3734 = vmatmul.mubr.bf16.gmra.mrb[240].mxu0 %v8961_v12 }
 0x3d0   : > { %3741 = vmatprep.mubr.bf16.mxu0 %v8740_v19  ;;  %4249 = vmatmul.mubr.bf16.gmra.mrb[144].mxu1 %v9049_v60 }
 0x3d1   : > { %4256 = vmatprep.mubr.bf16.mxu1 %v10193_v13 }
 0x3d7   : > { %3742 = vmatmul.mubr.bf16.gmra.mrb[244].mxu0 %v9013_v52 }
 0x3d8   : > { %3749 = vmatprep.mubr.bf16.mxu0 %v8780_v31  ;;  %4257 = vmatmul.mubr.bf16.gmra.mrb[148].mxu1 %v9077_v25 }
 0x3d9   : > { %4264 = vmatprep.mubr.bf16.mxu1 %v8836_v28 }
 0x3df   : > { %3750 = vmatmul.mubr.bf16.gmra.mrb[248].mxu0 %v9049_v60 }
 0x3e0   : > { %3757 = vmatprep.mubr.bf16.mxu0 %v10193_v13  ;;  %4265 = vmatmul.mubr.bf16.gmra.mrb[152].mxu1 %v9100_v47 }
 0x3e1   : > { %4272 = vmatprep.mubr.bf16.mxu1 %v8846_v26 }
 0x3e7   : > { %3758 = vmatmul.mubr.bf16.gmra.mrb[252].mxu0 %v9077_v25 }
 0x3e8   : > { %3765 = vmatprep.mubr.bf16.mxu0 %v8836_v28  ;;  %4273 = vmatmul.mubr.bf16.gmra.mrb[156].mxu1 %v9116_v34 }
 0x3e9   : > { %4280 = vmatprep.mubr.bf16.mxu1 %v8902_v16 }
 0x3ef   : > { %3766 = vmatmul.mubr.bf16.gmra.mrb[0].mxu0 %v9100_v47 }
 0x3f0   : > { %3773 = vmatprep.mubr.bf16.mxu0 %v8846_v26  ;;  %4281 = vmatmul.mubr.bf16.gmra.mrb[160].mxu1 %v9127_v0 }
 0x3f1   : > { %4288 = vmatprep.mubr.bf16.mxu1 %v8914_v21 }
 0x3f7   : > { %3774 = vmatmul.mubr.bf16.gmra.mrb[4].mxu0 %v9116_v34 }
 0x3f8   : > { %3781 = vmatprep.mubr.bf16.mxu0 %v8902_v16  ;;  %4289 = vmatmul.mubr.bf16.gmra.mrb[164].mxu1 %v9138_v44 }
 0x3f9   : > { %4296 = vmatprep.mubr.bf16.mxu1 %v8965_v51 }
 0x3ff   : > { %3782 = vmatmul.mubr.bf16.gmra.mrb[8].mxu0 %v9127_v0 }
 0x400   : > { %3789 = vmatprep.mubr.bf16.mxu0 %v8914_v21  ;;  %4297 = vmatmul.mubr.bf16.gmra.mrb[168].mxu1 %v9149_v15 }
 0x401   : > { %4304 = vmatprep.mubr.bf16.mxu1 %v8979_v4  ;;  %v5632_v19 = vpop.f32.mrb[160].mxu0 }
 0x402   : > { %v5633_v31 = vpop.f32.mrb[161].mxu0 }
 0x403   : > { %v9229_v38 = vadd.f32 %v5633_v31, %v5632_v19  ;;  %v5635_v28 = vpop.f32.mrb[162].mxu0 }
 0x404   : > { %v5636_v26 = vpop.f32.mrb[163].mxu0 }
 0x405   : > { %v9231_v12 = vadd.f32 %v5636_v26, %v5635_v28 }
 0x407   : > { %3790 = vmatmul.mubr.bf16.gmra.mrb[12].mxu0 %v9138_v44 }
 0x408   : > { %3797 = vmatprep.mubr.bf16.mxu0 %v8965_v51  ;;  %4305 = vmatmul.mubr.bf16.gmra.mrb[172].mxu1 %v9160_v53 }
 0x409   : > { %4312 = vmatprep.mubr.bf16.mxu1 %v9016_v29 }
 0x40a   : > { %v5638_v16 = vpop.f32.mrb[164].mxu0 }
 0x40b   : > { %v5639_v21 = vpop.f32.mrb[165].mxu0 }
 0x40c   : > { %v9237_v52 = vadd.f32 %v5639_v21, %v5638_v16  ;;  %v5641_v60 = vpop.f32.mrb[166].mxu0 }
 0x40d   : > { %v5642_v25 = vpop.f32.mrb[167].mxu0 }
 0x40e   : > { %v9239_v47 = vadd.f32 %v5642_v25, %v5641_v60 }
 0x40f   : > { %3798 = vmatmul.mubr.bf16.gmra.mrb[16].mxu0 %v9149_v15 }
 0x410   : > { %3805 = vmatprep.mubr.bf16.mxu0 %v8979_v4  ;;  %4313 = vmatmul.mubr.bf16.gmra.mrb[176].mxu1 %v9171_v62 }
 0x411   : > { %4320 = vmatprep.mubr.bf16.mxu1 %v8871_v39 }
 0x412   : > { %v5644_v51 = vpop.f32.mrb[168].mxu0 }
 0x413   : > { %v5645_v34 = vpop.f32.mrb[169].mxu0 }
 0x414   : > { %v9245_v0 = vadd.f32 %v5645_v34, %v5644_v51  ;;  %v5647_v44 = vpop.f32.mrb[170].mxu0 }
 0x415   : > { %v5648_v18 = vpop.f32.mrb[171].mxu0 }
 0x416   : > { %v9247_v59 = vadd.f32 %v5648_v18, %v5647_v44 }
 0x417   : > { %3806 = vmatmul.mubr.bf16.gmra.mrb[20].mxu0 %v9160_v53 }
 0x418   : > { %3813 = vmatprep.mubr.bf16.mxu0 %v9016_v29  ;;  %4321 = vmatmul.mubr.bf16.gmra.mrb[180].mxu1 %v8977_v61 }
 0x419   : > { %4328 = vmatprep.mubr.bf16.mxu1 %v8888_v22 }
 0x41a   : > { %v5650_v4 = vpop.f32.mrb[172].mxu0 }
 0x41b   : > { %v5651_v54 = vpop.f32.mrb[173].mxu0 }
 0x41c   : > { %v9253_v11 = vadd.f32 %v5651_v54, %v5650_v4  ;;  %v5653_v43 = vpop.f32.mrb[174].mxu0 }
 0x41d   : > { %v5654_v37 = vpop.f32.mrb[175].mxu0 }
 0x41e   : > { %v9255_v15 = vadd.f32 %v5654_v37, %v5653_v43 }
 0x41f   : > { %3814 = vmatmul.mubr.bf16.gmra.mrb[24].mxu0 %v9171_v62 }
 0x420   : > { %3821 = vmatprep.mubr.bf16.mxu0 %v8871_v39  ;;  %4329 = vmatmul.mubr.bf16.gmra.mrb[184].mxu1 %v8992_v40 }
 0x421   : > { %4336 = vmatprep.mubr.bf16.mxu1 %v8871_v39 }
 0x422   : > { %v5656_v29 = vpop.f32.mrb[176].mxu0 }
 0x423   : > { %v5657_v8 = vpop.f32.mrb[177].mxu0 }
 0x424   : > { %v9261_v24 = vadd.f32 %v5657_v8, %v5656_v29  ;;  %v5659_v22 = vpop.f32.mrb[178].mxu0 }
 0x425   : > { %v5660_v6 = vpop.f32.mrb[179].mxu0 }
 0x426   : > { %v9263_v20 = vadd.f32 %v5660_v6, %v5659_v22 }
 0x427   : > { %3822 = vmatmul.mubr.bf16.gmra.mrb[28].mxu0 %v8977_v61 }
 0x428   : > { %4337 = vmatmul.mubr.bf16.gmra.mrb[188].mxu1 %v8977_v61 }
 0x429   : > { %6280 = vmatprep.mubr.bf16.mxu1 %v8766_v56 }
 0x42a   : > { %v5662_v36 = vpop.f32.mrb[180].mxu0 }
 0x42b   : > { %v5663_v53 = vpop.f32.mrb[181].mxu0 }
 0x42c   : > { %v9268_v14 = vadd.f32 %v5663_v53, %v5662_v36  ;;  %v5665_v40 = vpop.f32.mrb[182].mxu0 }
 0x42d   : > { %v5666_v39 = vpop.f32.mrb[183].mxu0 }
 0x42e   : > { %v9270_v17 = vadd.f32 %v5666_v39, %v5665_v40 }
 0x430   : > { %6281 = vmatmul.mubr.bf16.vlgmr.msra.gmra.mrb[96].mxu1 %v8793_v46 }
 0x431   : > { %6284 = vmatprep.mubr.bf16.mxu1 %v8842_v1 }
 0x432   : > { %v5668_v62 = vpop.f32.mrb[184].mxu0 }
 0x433   : > { %v5669_v27 = vpop.f32.mrb[185].mxu0 }
 0x434   : > { %v9274_v10 = vadd.f32 %v5669_v27, %v5668_v62  ;;  %v5671_v33 = vpop.f32.mrb[186].mxu0 }
 0x435   : > { %v5672_v61 = vpop.f32.mrb[187].mxu0 }
 0x436   : > { %v9276_v41 = vadd.f32 %v5672_v61, %v5671_v33 }
 0x438   : > { %6285 = vmatmul.mubr.bf16.gmra.mrb[100].mxu1 %v8853_v57 }
 0x439   : > { %6288 = vmatprep.mubr.bf16.mxu1 %v8908_v9 }
 0x43a   : > { %v5674_v56 = vpop.f32.mrb[188].mxu0 }
 0x43b   : > { %v5675_v30 = vpop.f32.mrb[189].mxu0 }
 0x43c   : > { %v9280_v63 = vadd.f32 %v5675_v30, %v5674_v56  ;;  %v5677_v48 = vpop.f32.mrb[190].mxu0 }
 0x43d   : > { %v5678_v46 = vpop.f32.mrb[191].mxu0 }
 0x43e   : > { %v9282_v23 = vadd.f32 %v5678_v46, %v5677_v48 }
 0x440   : > { %6289 = vmatmul.mubr.bf16.gmra.mrb[104].mxu1 %v8921_v42 }
 0x441   : > { %6292 = vmatprep.mubr.bf16.mxu1 %v8971_v3 }
 0x442   : > { %v5680_v1 = vpop.f32.mrb[192].mxu0 }
 0x443   : > { %v5681_v5 = vpop.f32.mrb[193].mxu0 }
 0x444   : > { %v9286_v50 = vadd.f32 %v5681_v5, %v5680_v1  ;;  %v5683_v13 = vpop.f32.mrb[194].mxu0 }
 0x445   : > { %v5684_v57 = vpop.f32.mrb[195].mxu0 }
 0x446   : > { %v9288_v19 = vadd.f32 %v5684_v57, %v5683_v13 }
 0x448   : > { %6293 = vmatmul.mubr.bf16.gmra.mrb[108].mxu1 %v8986_v58 }
 0x449   : > { %6296 = vmatprep.mubr.bf16.mxu1 %v9022_v7 }
 0x44a   : > { %v5686_v9 = vpop.f32.mrb[196].mxu0 }
 0x44b   : > { %v5687_v31 = vpop.f32.mrb[197].mxu0 }
 0x44c   : > { %v9292_v28 = vadd.f32 %v5687_v31, %v5686_v9  ;;  %v5689_v26 = vpop.f32.mrb[198].mxu0 }
 0x44d   : > { %v5690_v42 = vpop.f32.mrb[199].mxu0 }
 0x44e   : > { %v9294_v16 = vadd.f32 %v5690_v42, %v5689_v26 }
 0x450   : > { %6297 = vmatmul.mubr.bf16.gmra.mrb[112].mxu1 %v9030_v32 }
 0x451   : > { %6300 = vmatprep.mubr.bf16.mxu1 %v9056_v55 }
 0x452   : > { %v5692_v3 = vpop.f32.mrb[200].mxu0 }
 0x453   : > { %v5693_v21 = vpop.f32.mrb[201].mxu0 }
 0x454   : > { %v9298_v60 = vadd.f32 %v5693_v21, %v5692_v3  ;;  %v5695_v25 = vpop.f32.mrb[202].mxu0 }
 0x455   : > { %v5696_v58 = vpop.f32.mrb[203].mxu0 }
 0x456   : > { %v9300_v51 = vadd.f32 %v5696_v58, %v5695_v25 }
 0x458   : > { %6301 = vmatmul.mubr.bf16.gmra.mrb[116].mxu1 %v9064_v49 }
 0x459   : > { %6304 = vmatprep.mubr.bf16.mxu1 %v9084_v45 }
 0x45a   : > { %v5698_v7 = vpop.f32.mrb[204].mxu0 }
 0x45b   : > { %v5699_v34 = vpop.f32.mrb[205].mxu0 }
 0x45c   : > { %v9304_v44 = vadd.f32 %v5699_v34, %v5698_v7  ;;  %v5701_v18 = vpop.f32.mrb[206].mxu0 }
 0x45d   : > { %v5702_v32 = vpop.f32.mrb[207].mxu0 }
 0x45e   : > { %v9306_v4 = vadd.f32 %v5702_v32, %v5701_v18 }
 0x460   : > { %6305 = vmatmul.mubr.bf16.gmra.mrb[120].mxu1 %v9092_v35 }
 0x461   : > { %6308 = vmatprep.mubr.bf16.mxu1 %v9107_v2 }
 0x462   : > { %v5704_v55 = vpop.f32.mrb[208].mxu0 }
 0x463   : > { %v5705_v54 = vpop.f32.mrb[209].mxu0 }
 0x464   : > { %v9310_v43 = vadd.f32 %v5705_v54, %v5704_v55  ;;  %v5707_v37 = vpop.f32.mrb[210].mxu0 }
 0x465   : > { %v5708_v49 = vpop.f32.mrb[211].mxu0 }
 0x466   : > { %v9312_v29 = vadd.f32 %v5708_v49, %v5707_v37 }
 0x468   : > { %6309 = vmatmul.mubr.bf16.gmra.mrb[124].mxu1 %v9092_v35 }
 0x46a   : > { %v5710_v45 = vpop.f32.mrb[212].mxu0 }
 0x46b   : > { %v5711_v8 = vpop.f32.mrb[213].mxu0 }
 0x46c   : > { %v9315_v22 = vadd.f32 %v5711_v8, %v5710_v45  ;;  %v5713_v6 = vpop.f32.mrb[214].mxu0 }
 0x46d   : > { %v5714_v36 = vpop.f32.mrb[215].mxu0 }
 0x46e   : > { %v9317_v53 = vadd.f32 %v5714_v36, %v5713_v6 }
 0x472   : > { %v5716_v40 = vpop.f32.mrb[216].mxu0 }
 0x473   : > { %v5717_v2 = vpop.f32.mrb[217].mxu0 }
 0x474   : > { %v9319_v39 = vadd.f32 %v5717_v2, %v5716_v40  ;;  %v5719_v62 = vpop.f32.mrb[218].mxu0 }
 0x475   : > { %v5720_v27 = vpop.f32.mrb[219].mxu0 }
 0x476   : > { %v9321_v33 = vadd.f32 %v5720_v27, %v5719_v62 }
 0x47a   : > { %v5722_v61 = vpop.f32.mrb[220].mxu0 }
 0x47b   : > { %v5723_v56 = vpop.f32.mrb[221].mxu0 }
 0x47c   : > { %v9323_v30 = vadd.f32 %v5723_v56, %v5722_v61  ;;  %v5725_v35 = vpop.f32.mrb[222].mxu0 }
 0x47d   : > { %v5726_v48 = vpop.f32.mrb[223].mxu0 }
 0x47e   : > { %v9325_v46 = vadd.f32 %v5726_v48, %v5725_v35 }
 0x482   : > { %v5768_v1 = vpop.f32.mrb[224].mxu0 }
 0x483   : > { %v5769_v5 = vpop.f32.mrb[225].mxu0  ;;  %v5904_v13 = vpop.f32.mrb[128].mxu1 }
 0x484   : > { %v5770_v57 = vadd.f32 %v5769_v5, %v5768_v1  ;;  %v5771_v9 = vpop.f32.mrb[226].mxu0  ;;  %v5905_v31 = vpop.f32.mrb[129].mxu1 }
 0x485   : > { %v5906_v26 = vadd.f32 %v5905_v31, %v5904_v13  ;;  %v5772_v42 = vpop.f32.mrb[227].mxu0  ;;  %v5907_v3 = vpop.f32.mrb[130].mxu1 }
 0x486   : > { %v6443_v21 = vadd.f32 %v5770_v57, %v9229_v38  ;;  %v5773_v25 = vadd.f32 %v5772_v42, %v5771_v9  ;;  %v5908_v58 = vpop.f32.mrb[131].mxu1 }
 0x487   : > { %v5909_v7 = vadd.f32 %v5908_v58, %v5907_v3 }
 0x488   : > { %v6449_v34 = vadd.f32 %v5773_v25, %v9231_v12  ;;  %v9329_v18 = vadd.f32 %v6443_v21, %v5906_v26 }
 0x48a   : > { %v5774_v32 = vpop.f32.mrb[228].mxu0  ;;  %v9331_v55 = vadd.f32 %v6449_v34, %v5909_v7 }
 0x48b   : > { %v5775_v54 = vpop.f32.mrb[229].mxu0  ;;  %v5910_v37 = vpop.f32.mrb[132].mxu1 }
 0x48c   : > { %v5776_v49 = vadd.f32 %v5775_v54, %v5774_v32  ;;  %v5777_v45 = vpop.f32.mrb[230].mxu0  ;;  %v5911_v8 = vpop.f32.mrb[133].mxu1 }
 0x48d   : > { %v5912_v6 = vadd.f32 %v5911_v8, %v5910_v37  ;;  %v5778_v36 = vpop.f32.mrb[231].mxu0  ;;  %v5913_v40 = vpop.f32.mrb[134].mxu1 }
 0x48e   : > { %v6440_v38 = vadd.f32 %v5776_v49, %v9237_v52  ;;  %v5779_v2 = vadd.f32 %v5778_v36, %v5777_v45  ;;  %v5914_v62 = vpop.f32.mrb[135].mxu1 }
 0x48f   : > { %v5915_v27 = vadd.f32 %v5914_v62, %v5913_v40 }
 0x490   : > { %v6446_v12 = vadd.f32 %v5779_v2, %v9239_v47  ;;  %v9335_v61 = vadd.f32 %v6440_v38, %v5912_v6 }
 0x492   : > { %v5780_v56 = vpop.f32.mrb[232].mxu0  ;;  %v9337_v35 = vadd.f32 %v6446_v12, %v5915_v27 }
 0x493   : > { %v5781_v48 = vpop.f32.mrb[233].mxu0  ;;  %v5916_v1 = vpop.f32.mrb[136].mxu1 }
 0x494   : > { %v5782_v5 = vadd.f32 %v5781_v48, %v5780_v56  ;;  %v5783_v13 = vpop.f32.mrb[234].mxu0  ;;  %v5917_v57 = vpop.f32.mrb[137].mxu1 }
 0x495   : > { %v5918_v9 = vadd.f32 %v5917_v57, %v5916_v1  ;;  %v5784_v31 = vpop.f32.mrb[235].mxu0  ;;  %v5919_v26 = vpop.f32.mrb[138].mxu1 }
 0x496   : > { %v6455_v52 = vadd.f32 %v5782_v5, %v9245_v0  ;;  %v5785_v42 = vadd.f32 %v5784_v31, %v5783_v13  ;;  %v5920_v3 = vpop.f32.mrb[139].mxu1 }
 0x497   : > { %v5921_v21 = vadd.f32 %v5920_v3, %v5919_v26 }
 0x498   : > { %v6461_v47 = vadd.f32 %v5785_v42, %v9247_v59  ;;  %v9341_v25 = vadd.f32 %v6455_v52, %v5918_v9 }
 0x49a   : > { %v5786_v58 = vpop.f32.mrb[236].mxu0  ;;  %v9343_v7 = vadd.f32 %v6461_v47, %v5921_v21 }
 0x49b   : > { %v5787_v34 = vpop.f32.mrb[237].mxu0  ;;  %v5922_v32 = vpop.f32.mrb[140].mxu1 }
 0x49c   : > { %v5788_v54 = vadd.f32 %v5787_v34, %v5786_v58  ;;  %v5789_v37 = vpop.f32.mrb[238].mxu0  ;;  %v5923_v49 = vpop.f32.mrb[141].mxu1 }
 0x49d   : > { %v5924_v45 = vadd.f32 %v5923_v49, %v5922_v32  ;;  %v5790_v8 = vpop.f32.mrb[239].mxu0  ;;  %v5925_v6 = vpop.f32.mrb[142].mxu1 }
 0x49e   : > { %v6452_v0 = vadd.f32 %v5788_v54, %v9253_v11  ;;  %v5791_v36 = vadd.f32 %v5790_v8, %v5789_v37  ;;  %v5926_v40 = vpop.f32.mrb[143].mxu1 }
 0x49f   : > { %v5927_v38 = vadd.f32 %v5926_v40, %v5925_v6 }
 0x4a0   : > { %v6458_v59 = vadd.f32 %v5791_v36, %v9255_v15  ;;  %v9347_v2 = vadd.f32 %v6452_v0, %v5924_v45 }
 0x4a2   : > { %v5792_v62 = vpop.f32.mrb[240].mxu0  ;;  %v9349_v27 = vadd.f32 %v6458_v59, %v5927_v38 }
 0x4a3   : > { %v5793_v12 = vpop.f32.mrb[241].mxu0  ;;  %v5928_v56 = vpop.f32.mrb[144].mxu1 }
 0x4a4   : > { %v5794_v48 = vadd.f32 %v5793_v12, %v5792_v62  ;;  %v5795_v1 = vpop.f32.mrb[242].mxu0  ;;  %v5929_v5 = vpop.f32.mrb[145].mxu1 }
 0x4a5   : > { %v5930_v13 = vadd.f32 %v5929_v5, %v5928_v56  ;;  %v5796_v57 = vpop.f32.mrb[243].mxu0  ;;  %v5931_v9 = vpop.f32.mrb[146].mxu1 }
 0x4a6   : > { %v6467_v11 = vadd.f32 %v5794_v48, %v9261_v24  ;;  %v5797_v31 = vadd.f32 %v5796_v57, %v5795_v1  ;;  %v5932_v26 = vpop.f32.mrb[147].mxu1 }
 0x4a7   : > { %v5933_v52 = vadd.f32 %v5932_v26, %v5931_v9 }
 0x4a8   : > { %v6473_v15 = vadd.f32 %v5797_v31, %v9263_v20  ;;  %v9353_v42 = vadd.f32 %v6467_v11, %v5930_v13 }
 0x4aa   : > { %v5798_v3 = vpop.f32.mrb[244].mxu0  ;;  %v9355_v21 = vadd.f32 %v6473_v15, %v5933_v52 }
 0x4ab   : > { %v5799_v47 = vpop.f32.mrb[245].mxu0  ;;  %v5934_v58 = vpop.f32.mrb[148].mxu1 }
 0x4ac   : > { %v5800_v34 = vadd.f32 %v5799_v47, %v5798_v3  ;;  %v5801_v32 = vpop.f32.mrb[246].mxu0  ;;  %v5935_v54 = vpop.f32.mrb[149].mxu1 }
 0x4ad   : > { %v5936_v37 = vadd.f32 %v5935_v54, %v5934_v58  ;;  %v5802_v49 = vpop.f32.mrb[247].mxu0  ;;  %v5937_v45 = vpop.f32.mrb[150].mxu1 }
 0x4ae   : > { %v6464_v24 = vadd.f32 %v5800_v34, %v9268_v14  ;;  %v5803_v8 = vadd.f32 %v5802_v49, %v5801_v32  ;;  %v5938_v6 = vpop.f32.mrb[151].mxu1 }
 0x4af   : > { %v5939_v0 = vadd.f32 %v5938_v6, %v5937_v45 }
 0x4b0   : > { %v6470_v20 = vadd.f32 %v5803_v8, %v9270_v17  ;;  %v9359_v36 = vadd.f32 %v6464_v24, %v5936_v37 }
 0x4b2   : > { %v5804_v40 = vpop.f32.mrb[248].mxu0  ;;  %v9361_v38 = vadd.f32 %v6470_v20, %v5939_v0 }
 0x4b3   : > { %v5805_v59 = vpop.f32.mrb[249].mxu0  ;;  %v5940_v62 = vpop.f32.mrb[152].mxu1 }
 0x4b4   : > { %v5806_v12 = vadd.f32 %v5805_v59, %v5804_v40  ;;  %v5807_v56 = vpop.f32.mrb[250].mxu0  ;;  %v5941_v48 = vpop.f32.mrb[153].mxu1 }
 0x4b5   : > { %v5942_v1 = vadd.f32 %v5941_v48, %v5940_v62  ;;  %v5808_v5 = vpop.f32.mrb[251].mxu0  ;;  %v5943_v13 = vpop.f32.mrb[154].mxu1 }
 0x4b6   : > { %v6479_v14 = vadd.f32 %v5806_v12, %v9274_v10  ;;  %v5809_v57 = vadd.f32 %v5808_v5, %v5807_v56  ;;  %v5944_v9 = vpop.f32.mrb[155].mxu1 }
 0x4b7   : > { %v5945_v11 = vadd.f32 %v5944_v9, %v5943_v13 }
 0x4b8   : > { %v6485_v17 = vadd.f32 %v5809_v57, %v9276_v41  ;;  %v9365_v31 = vadd.f32 %v6479_v14, %v5942_v1 }
 0x4ba   : > { %v5810_v26 = vpop.f32.mrb[252].mxu0  ;;  %v9367_v52 = vadd.f32 %v6485_v17, %v5945_v11 }
 0x4bb   : > { %v5811_v15 = vpop.f32.mrb[253].mxu0  ;;  %v5946_v3 = vpop.f32.mrb[156].mxu1 }
 0x4bc   : > { %v5812_v47 = vadd.f32 %v5811_v15, %v5810_v26  ;;  %v5813_v58 = vpop.f32.mrb[254].mxu0  ;;  %v5947_v34 = vpop.f32.mrb[157].mxu1 }
 0x4bd   : > { %v5948_v32 = vadd.f32 %v5947_v34, %v5946_v3  ;;  %v5814_v54 = vpop.f32.mrb[255].mxu0  ;;  %v5949_v37 = vpop.f32.mrb[158].mxu1 }
 0x4be   : > { %v6476_v10 = vadd.f32 %v5812_v47, %v9280_v63  ;;  %v5815_v49 = vadd.f32 %v5814_v54, %v5813_v58  ;;  %v5950_v45 = vpop.f32.mrb[159].mxu1 }
 0x4bf   : > { %v5951_v24 = vadd.f32 %v5950_v45, %v5949_v37 }
 0x4c0   : > { %v6482_v41 = vadd.f32 %v5815_v49, %v9282_v23  ;;  %v9371_v8 = vadd.f32 %v6476_v10, %v5948_v32 }
 0x4c2   : > { %v5816_v6 = vpop.f32.mrb[0].mxu0  ;;  %v9373_v0 = vadd.f32 %v6482_v41, %v5951_v24 }
 0x4c3   : > { %v5817_v20 = vpop.f32.mrb[1].mxu0  ;;  %v5952_v40 = vpop.f32.mrb[160].mxu1 }
 0x4c4   : > { %v5818_v59 = vadd.f32 %v5817_v20, %v5816_v6  ;;  %v5819_v62 = vpop.f32.mrb[2].mxu0  ;;  %v5953_v12 = vpop.f32.mrb[161].mxu1 }
 0x4c5   : > { %v5954_v56 = vadd.f32 %v5953_v12, %v5952_v40  ;;  %v5820_v48 = vpop.f32.mrb[3].mxu0  ;;  %v5955_v1 = vpop.f32.mrb[162].mxu1 }
 0x4c6   : > { %v6491_v63 = vadd.f32 %v5818_v59, %v9286_v50  ;;  %v5821_v5 = vadd.f32 %v5820_v48, %v5819_v62  ;;  %v5956_v13 = vpop.f32.mrb[163].mxu1 }
 0x4c7   : > { %v5957_v14 = vadd.f32 %v5956_v13, %v5955_v1 }
 0x4c8   : > { %v6497_v23 = vadd.f32 %v5821_v5, %v9288_v19  ;;  %v9377_v57 = vadd.f32 %v6491_v63, %v5954_v56 }
 0x4ca   : > { %v5822_v9 = vpop.f32.mrb[4].mxu0  ;;  %v9379_v11 = vadd.f32 %v6497_v23, %v5957_v14 }
 0x4cb   : > { %v5823_v17 = vpop.f32.mrb[5].mxu0  ;;  %v5958_v26 = vpop.f32.mrb[164].mxu1 }
 0x4cc   : > { %v5824_v15 = vadd.f32 %v5823_v17, %v5822_v9  ;;  %v5825_v3 = vpop.f32.mrb[6].mxu0  ;;  %v5959_v47 = vpop.f32.mrb[165].mxu1 }
 0x4cd   : > { %v5960_v58 = vadd.f32 %v5959_v47, %v5958_v26  ;;  %v5826_v34 = vpop.f32.mrb[7].mxu0  ;;  %v5961_v32 = vpop.f32.mrb[166].mxu1 }
 0x4ce   : > { %v6488_v50 = vadd.f32 %v5824_v15, %v9292_v28  ;;  %v5827_v54 = vadd.f32 %v5826_v34, %v5825_v3  ;;  %v5962_v37 = vpop.f32.mrb[167].mxu1 }
 0x4cf   : > { %v5963_v10 = vadd.f32 %v5962_v37, %v5961_v32 }
 0x4d0   : > { %v6494_v19 = vadd.f32 %v5827_v54, %v9294_v16  ;;  %v9383_v49 = vadd.f32 %v6488_v50, %v5960_v58 }
 0x4d2   : > { %v5828_v45 = vpop.f32.mrb[8].mxu0  ;;  %v9385_v24 = vadd.f32 %v6494_v19, %v5963_v10 }
 0x4d3   : > { %v5829_v41 = vpop.f32.mrb[9].mxu0  ;;  %v5964_v6 = vpop.f32.mrb[168].mxu1 }
 0x4d4   : > { %v5830_v20 = vadd.f32 %v5829_v41, %v5828_v45  ;;  %v5831_v40 = vpop.f32.mrb[10].mxu0  ;;  %v5965_v59 = vpop.f32.mrb[169].mxu1 }
 0x4d5   : > { %v5966_v62 = vadd.f32 %v5965_v59, %v5964_v6  ;;  %v5832_v12 = vpop.f32.mrb[11].mxu0  ;;  %v5967_v56 = vpop.f32.mrb[170].mxu1 }
 0x4d6   : > { %v6503_v28 = vadd.f32 %v5830_v20, %v9298_v60  ;;  %v5833_v48 = vadd.f32 %v5832_v12, %v5831_v40  ;;  %v5968_v1 = vpop.f32.mrb[171].mxu1 }
 0x4d7   : > { %v5969_v63 = vadd.f32 %v5968_v1, %v5967_v56 }
 0x4d8   : > { %v6509_v16 = vadd.f32 %v5833_v48, %v9300_v51  ;;  %v9389_v5 = vadd.f32 %v6503_v28, %v5966_v62 }
 0x4da   : > { %v5834_v13 = vpop.f32.mrb[12].mxu0  ;;  %v9391_v14 = vadd.f32 %v6509_v16, %v5969_v63 }
 0x4db   : > { %v5835_v23 = vpop.f32.mrb[13].mxu0  ;;  %v5970_v9 = vpop.f32.mrb[172].mxu1 }
 0x4dc   : > { %v5836_v17 = vadd.f32 %v5835_v23, %v5834_v13  ;;  %v5837_v26 = vpop.f32.mrb[14].mxu0  ;;  %v5971_v15 = vpop.f32.mrb[173].mxu1 }
 0x4dd   : > { %v5972_v3 = vadd.f32 %v5971_v15, %v5970_v9  ;;  %v5838_v47 = vpop.f32.mrb[15].mxu0  ;;  %v5973_v58 = vpop.f32.mrb[174].mxu1 }
 0x4de   : > { %v6500_v60 = vadd.f32 %v5836_v17, %v9304_v44  ;;  %v5839_v34 = vadd.f32 %v5838_v47, %v5837_v26  ;;  %v5974_v32 = vpop.f32.mrb[175].mxu1 }
 0x4df   : > { %v5975_v50 = vadd.f32 %v5974_v32, %v5973_v58 }
 0x4e0   : > { %v6506_v51 = vadd.f32 %v5839_v34, %v9306_v4  ;;  %v9395_v54 = vadd.f32 %v6500_v60, %v5972_v3 }
 0x4e2   : > { %v5840_v37 = vpop.f32.mrb[16].mxu0  ;;  %v9397_v10 = vadd.f32 %v6506_v51, %v5975_v50 }
 0x4e3   : > { %v5841_v19 = vpop.f32.mrb[17].mxu0  ;;  %v5976_v45 = vpop.f32.mrb[176].mxu1 }
 0x4e4   : > { %v5842_v41 = vadd.f32 %v5841_v19, %v5840_v37  ;;  %v5843_v6 = vpop.f32.mrb[18].mxu0  ;;  %v5977_v20 = vpop.f32.mrb[177].mxu1 }
 0x4e5   : > { %v5978_v40 = vadd.f32 %v5977_v20, %v5976_v45  ;;  %v5844_v59 = vpop.f32.mrb[19].mxu0  ;;  %v5979_v62 = vpop.f32.mrb[178].mxu1 }
 0x4e6   : > { %v6515_v44 = vadd.f32 %v5842_v41, %v9310_v43  ;;  %v5845_v12 = vadd.f32 %v5844_v59, %v5843_v6  ;;  %v5980_v56 = vpop.f32.mrb[179].mxu1 }
 0x4e7   : > { %v5981_v28 = vadd.f32 %v5980_v56, %v5979_v62 }
 0x4e8   : > { %v6521_v4 = vadd.f32 %v5845_v12, %v9312_v29  ;;  %v9401_v48 = vadd.f32 %v6515_v44, %v5978_v40 }
 0x4ea   : > { %v5846_v1 = vpop.f32.mrb[20].mxu0  ;;  %v9403_v63 = vadd.f32 %v6521_v4, %v5981_v28 }
 0x4eb   : > { %v5847_v16 = vpop.f32.mrb[21].mxu0  ;;  %v5982_v13 = vpop.f32.mrb[180].mxu1 }
 0x4ec   : > { %v5848_v23 = vadd.f32 %v5847_v16, %v5846_v1  ;;  %v5849_v9 = vpop.f32.mrb[22].mxu0  ;;  %v5983_v17 = vpop.f32.mrb[181].mxu1 }
 0x4ed   : > { %v5984_v26 = vadd.f32 %v5983_v17, %v5982_v13  ;;  %v5850_v15 = vpop.f32.mrb[23].mxu0  ;;  %v5985_v3 = vpop.f32.mrb[182].mxu1 }
 0x4ee   : > { %v6512_v43 = vadd.f32 %v5848_v23, %v9315_v22  ;;  %v5851_v47 = vadd.f32 %v5850_v15, %v5849_v9  ;;  %v5986_v58 = vpop.f32.mrb[183].mxu1 }
 0x4ef   : > { %v5987_v60 = vadd.f32 %v5986_v58, %v5985_v3 }
 0x4f0   : > { %v6518_v29 = vadd.f32 %v5851_v47, %v9317_v53  ;;  %v9407_v34 = vadd.f32 %v6512_v43, %v5984_v26 }
 0x4f2   : > { %v5852_v32 = vpop.f32.mrb[24].mxu0  ;;  %v9409_v50 = vadd.f32 %v6518_v29, %v5987_v60 }
 0x4f3   : > { %v5853_v51 = vpop.f32.mrb[25].mxu0  ;;  %v5988_v37 = vpop.f32.mrb[184].mxu1 }
 0x4f4   : > { %v5854_v19 = vadd.f32 %v5853_v51, %v5852_v32  ;;  %v5855_v45 = vpop.f32.mrb[26].mxu0  ;;  %v5989_v41 = vpop.f32.mrb[185].mxu1 }
 0x4f5   : > { %v5990_v6 = vadd.f32 %v5989_v41, %v5988_v37  ;;  %v5856_v20 = vpop.f32.mrb[27].mxu0  ;;  %v5991_v40 = vpop.f32.mrb[186].mxu1 }
 0x4f6   : > { %v6527_v22 = vadd.f32 %v5854_v19, %v9319_v39  ;;  %v5857_v59 = vadd.f32 %v5856_v20, %v5855_v45  ;;  %v5992_v62 = vpop.f32.mrb[187].mxu1 }
 0x4f7   : > { %v5993_v44 = vadd.f32 %v5992_v62, %v5991_v40 }
 0x4f8   : > { %v6533_v53 = vadd.f32 %v5857_v59, %v9321_v33  ;;  %v9413_v12 = vadd.f32 %v6527_v22, %v5990_v6 }
 0x4fa   : > { %v5858_v56 = vpop.f32.mrb[28].mxu0  ;;  %v9415_v28 = vadd.f32 %v6533_v53, %v5993_v44 }
 0x4fb   : > { %v5859_v4 = vpop.f32.mrb[29].mxu0  ;;  %v5994_v1 = vpop.f32.mrb[188].mxu1 }
 0x4fc   : > { %v5860_v16 = vadd.f32 %v5859_v4, %v5858_v56  ;;  %v5861_v13 = vpop.f32.mrb[30].mxu0  ;;  %v5995_v23 = vpop.f32.mrb[189].mxu1 }
 0x4fd   : > { %v5996_v9 = vadd.f32 %v5995_v23, %v5994_v1  ;;  %v5862_v17 = vpop.f32.mrb[31].mxu0  ;;  %v5997_v26 = vpop.f32.mrb[190].mxu1 }
 0x4fe   : > { %v6524_v39 = vadd.f32 %v5860_v16, %v9323_v30  ;;  %v5863_v15 = vadd.f32 %v5862_v17, %v5861_v13  ;;  %v5998_v3 = vpop.f32.mrb[191].mxu1 }
 0x4ff   : > { %v5999_v43 = vadd.f32 %v5998_v3, %v5997_v26 }
 0x500   : > { %v6530_v33 = vadd.f32 %v5863_v15, %v9325_v46  ;;  %v9419_v47 = vadd.f32 %v6524_v39, %v5996_v9 }
 0x502   : > { %v9421_v58 = vadd.f32 %v6530_v33, %v5999_v43 }
 0x503   : > { %v6282_v60 = vpop.f32.mrb[96].mxu1 }
 0x504   : > { %v9424_v29 = vadd.f32 %v9335_v61, %v6282_v60  ;;  %v4379_v32 = vpop.f32.mrb[97].mxu1 }
 0x505   : > { %v9427_v51 = vadd.f32 %v9329_v18, %v4379_v32  ;;  %v6283_v37 = vpop.f32.mrb[98].mxu1 }
 0x506   : > { %v9430_v30 = vadd.f32 %v9337_v35, %v6283_v37  ;;  %v4382_v19 = vpop.f32.mrb[99].mxu1 }
 0x507   : > { %v9433_v45 = vadd.f32 %v9331_v55, %v4382_v19 }
 0x509   : > { %v4538_v46 = vadd.f32 %v9433_v45, %v9427_v51 }
 0x50b   : > { %v4539_v41 = vadd.f32 %v9424_v29, %v4538_v46  ;;  %v6286_v6 = vpop.f32.mrb[100].mxu1 }
 0x50c   : > { %v9439_v61 = vadd.f32 %v9347_v2, %v6286_v6  ;;  %v4395_v20 = vpop.f32.mrb[101].mxu1 }
 0x50d   : > { %v9442_v18 = vadd.f32 %v9341_v25, %v4395_v20  ;;  %v4540_v35 = vadd.f32 %v9430_v30, %v4539_v41  ;;  %v6287_v40 = vpop.f32.mrb[102].mxu1 }
 0x50e   : > { %v9446_v22 = vadd.f32 %v9349_v27, %v6287_v40  ;;  %v4398_v55 = vpop.f32.mrb[103].mxu1 }
 0x50f   : > { %v4541_v59 = vadd.f32 %v9442_v18, %v4540_v35  ;;  %v9450_v62 = vadd.f32 %v9343_v7, %v4398_v55 }
 0x511   : > { %v4542_v44 = vadd.f32 %v9450_v62, %v4541_v59 }
 0x513   : > { %v4543_v2 = vadd.f32 %v9439_v61, %v4542_v44  ;;  %v6290_v53 = vpop.f32.mrb[104].mxu1 }
 0x514   : > { %v9455_v25 = vadd.f32 %v9359_v36, %v6290_v53  ;;  %v4411_v56 = vpop.f32.mrb[105].mxu1 }
 0x515   : > { %v9458_v4 = vadd.f32 %v9353_v42, %v4411_v56  ;;  %v4544_v27 = vadd.f32 %v9446_v22, %v4543_v2  ;;  %v6291_v1 = vpop.f32.mrb[106].mxu1 }
 0x516   : > { %v9462_v16 = vadd.f32 %v9361_v38, %v6291_v1  ;;  %v4414_v7 = vpop.f32.mrb[107].mxu1 }
 0x517   : > { %v4545_v13 = vadd.f32 %v9458_v4, %v4544_v27  ;;  %v9466_v23 = vadd.f32 %v9355_v21, %v4414_v7 }
 0x519   : > { %v4546_v9 = vadd.f32 %v9466_v23, %v4545_v13 }
 0x51b   : > { %v4547_v36 = vadd.f32 %v9455_v25, %v4546_v9  ;;  %v6294_v17 = vpop.f32.mrb[108].mxu1 }
 0x51c   : > { %v9471_v42 = vadd.f32 %v9371_v8, %v6294_v17  ;;  %v4427_v26 = vpop.f32.mrb[109].mxu1 }
 0x51d   : > { %v9474_v39 = vadd.f32 %v9365_v31, %v4427_v26  ;;  %v4548_v38 = vadd.f32 %v9462_v16, %v4547_v36  ;;  %v6295_v15 = vpop.f32.mrb[110].mxu1 }
 0x51e   : > { %v9478_v3 = vadd.f32 %v9373_v0, %v6295_v15  ;;  %v4430_v21 = vpop.f32.mrb[111].mxu1 }
 0x51f   : > { %v4549_v43 = vadd.f32 %v9474_v39, %v4548_v38  ;;  %v9482_v33 = vadd.f32 %v9367_v52, %v4430_v21 }
 0x521   : > { %v4550_v60 = vadd.f32 %v9482_v33, %v4549_v43 }
 0x523   : > { %v4551_v8 = vadd.f32 %v9471_v42, %v4550_v60  ;;  %v6298_v32 = vpop.f32.mrb[112].mxu1 }
 0x524   : > { %v9487_v31 = vadd.f32 %v9383_v49, %v6298_v32  ;;  %v4443_v37 = vpop.f32.mrb[113].mxu1 }
 0x525   : > { %v6493_v19 = vadd.f32 %v9377_v57, %v4443_v37  ;;  %v4552_v0 = vadd.f32 %v9478_v3, %v4551_v8  ;;  %v6299_v46 = vpop.f32.mrb[114].mxu1 }
 0x526   : > { %v6496_v41 = vadd.f32 %v9385_v24, %v6299_v46  ;;  %v4446_v6 = vpop.f32.mrb[115].mxu1 }
 0x527   : > { %v4553_v20 = vadd.f32 %v6493_v19, %v4552_v0  ;;  %v6499_v52 = vadd.f32 %v9379_v11, %v4446_v6 }
 0x529   : > { %v4554_v35 = vadd.f32 %v6499_v52, %v4553_v20 }
 0x52b   : > { %v4555_v40 = vadd.f32 %v9487_v31, %v4554_v35  ;;  %v6302_v55 = vpop.f32.mrb[116].mxu1 }
 0x52c   : > { %v6502_v59 = vadd.f32 %v9395_v54, %v6302_v55  ;;  %v4459_v49 = vpop.f32.mrb[117].mxu1 }
 0x52d   : > { %v6505_v44 = vadd.f32 %v9389_v5, %v4459_v49  ;;  %v4556_v2 = vadd.f32 %v6496_v41, %v4555_v40  ;;  %v6303_v57 = vpop.f32.mrb[118].mxu1 }
 0x52e   : > { %v6508_v53 = vadd.f32 %v9397_v10, %v6303_v57  ;;  %v4462_v56 = vpop.f32.mrb[119].mxu1 }
 0x52f   : > { %v4557_v27 = vadd.f32 %v6505_v44, %v4556_v2  ;;  %v6511_v24 = vadd.f32 %v9391_v14, %v4462_v56 }
 0x531   : > { %v4558_v1 = vadd.f32 %v6511_v24, %v4557_v27 }
 0x533   : > { %v4559_v7 = vadd.f32 %v6502_v59, %v4558_v1  ;;  %v6306_v11 = vpop.f32.mrb[120].mxu1 }
 0x534   : > { %v6514_v13 = vadd.f32 %v9407_v34, %v6306_v11  ;;  %v4475_v9 = vpop.f32.mrb[121].mxu1 }
 0x535   : > { %v6517_v36 = vadd.f32 %v9401_v48, %v4475_v9  ;;  %v4560_v54 = vadd.f32 %v6508_v53, %v4559_v7  ;;  %v6307_v17 = vpop.f32.mrb[122].mxu1 }
 0x536   : > { %v6520_v5 = vadd.f32 %v9409_v50, %v6307_v17  ;;  %v4478_v26 = vpop.f32.mrb[123].mxu1 }
 0x537   : > { %v4561_v38 = vadd.f32 %v6517_v36, %v4560_v54  ;;  %v6523_v10 = vadd.f32 %v9403_v63, %v4478_v26 }
 0x539   : > { %v4562_v15 = vadd.f32 %v6523_v10, %v4561_v38 }
 0x53b   : > { %v4563_v21 = vadd.f32 %v6514_v13, %v4562_v15  ;;  %v6310_v43 = vpop.f32.mrb[124].mxu1 }
 0x53c   : > { %v6526_v14 = vadd.f32 %v9419_v47, %v6310_v43  ;;  %v4491_v60 = vpop.f32.mrb[125].mxu1 }
 0x53d   : > { %v6529_v8 = vadd.f32 %v9413_v12, %v4491_v60  ;;  %v4564_v34 = vadd.f32 %v6520_v5, %v4563_v21  ;;  %v6311_v32 = vpop.f32.mrb[126].mxu1 }
 0x53e   : > { %v6532_v48 = vadd.f32 %v9421_v58, %v6311_v32  ;;  %v4494_v37 = vpop.f32.mrb[127].mxu1 }
 0x53f   : > { %v4565_v0 = vadd.f32 %v6529_v8, %v4564_v34  ;;  %v6535_v50 = vadd.f32 %v9415_v28, %v4494_v37 }
 0x541   : > { %v4566_v46 = vadd.f32 %v6535_v50, %v4565_v0 }
 0x543   : > { %v4567_v6 = vadd.f32 %v6526_v14, %v4566_v46 }
 0x545   : > { %v4568_v20 = vadd.f32 %v6532_v48, %v4567_v6 }
 0x547   : > { %v4569_v63 = vrot.slane %v4568_v20, 4 }
 0x549   : > { %v4570_v35 = vadd.f32 %v4569_v63, %v4568_v20 }
 0x54b   : > { %v4571_v40 = vrot.slane %v4570_v35, 2 }
 0x54d   : > { %v4572_v55 = vadd.f32 %v4571_v40, %v4570_v35 }
 0x54f   : > { %v4573_v49 = vrot.slane %v4572_v55, 1 }
 0x551   : > { %v4574_v47 = vadd.f32 %v4573_v49, %v4572_v55 }
 0x553   : > { %v4575_v2 = vmul.f32 0.00390625, %v4574_v47 }
 0x555   : > { %v9507_v12 = vsub.f32 %v9458_v4, %v4575_v2  ;;  %v9510_v57 = vsub.f32 %v9466_v23, %v4575_v2  ;;  %v9513_v58 = vsub.f32 %v9455_v25, %v4575_v2  ;;  %v9516_v28 = vsub.f32 %v9462_v16, %v4575_v2 }
 0x556   : > { %v9519_v56 = vsub.f32 %v9474_v39, %v4575_v2  ;;  %v9522_v27 = vsub.f32 %v9482_v33, %v4575_v2  ;;  %v9525_v1 = vsub.f32 %v9471_v42, %v4575_v2  ;;  %v9528_v4 = vsub.f32 %v9478_v3, %v4575_v2 }
 0x557   : > { %v9530_v23 = vsub.f32 %v6493_v19, %v4575_v2  ;;  %v9532_v7 = vsub.f32 %v6499_v52, %v4575_v2  ;;  %v9535_v25 = vsub.f32 %v9487_v31, %v4575_v2  ;;  %v9537_v16 = vsub.f32 %v6496_v41, %v4575_v2 }
 0x558   : > { %v9539_v39 = vsub.f32 %v6505_v44, %v4575_v2  ;;  %v9541_v11 = vsub.f32 %v6511_v24, %v4575_v2  ;;  %v9543_v33 = vsub.f32 %v6502_v59, %v4575_v2  ;;  %v9545_v42 = vsub.f32 %v6508_v53, %v4575_v2 }
 0x559   : > { %v9547_v9 = vsub.f32 %v6517_v36, %v4575_v2  ;;  %v9549_v3 = vsub.f32 %v6523_v10, %v4575_v2  ;;  %v9551_v19 = vsub.f32 %v6514_v13, %v4575_v2  ;;  %v9553_v52 = vsub.f32 %v6520_v5, %v4575_v2 }
 0x55a   : > { %v9555_v31 = vsub.f32 %v6529_v8, %v4575_v2  ;;  %v9557_v41 = vsub.f32 %v6535_v50, %v4575_v2  ;;  %v9559_v44 = vsub.f32 %v6526_v14, %v4575_v2  ;;  %v9561_v24 = vsub.f32 %v6532_v48, %v4575_v2 }
 0x55b   : > { %v9564_v59 = vsub.f32 %v9427_v51, %v4575_v2  ;;  %v9567_v53 = vsub.f32 %v9433_v45, %v4575_v2  ;;  %v9570_v36 = vsub.f32 %v9424_v29, %v4575_v2  ;;  %v9577_v17 = vsub.f32 %v9430_v30, %v4575_v2 }
 0x55c   : > { %v9580_v5 = vsub.f32 %v9442_v18, %v4575_v2  ;;  %v9585_v26 = vsub.f32 %v9450_v62, %v4575_v2  ;;  %v9590_v10 = vsub.f32 %v9439_v61, %v4575_v2  ;;  %v9595_v18 = vsub.f32 %v9446_v22, %v4575_v2 }
 0x55d   : > { %v4608_v13 = vmul.f32 %v9564_v59, %v9564_v59  ;;  %v4609_v54 = vmul.f32 %v9567_v53, %v9567_v53  ;;  %v4610_v51 = vmul.f32 %v9570_v36, %v9570_v36  ;;  %v4611_v29 = vmul.f32 %v9577_v17, %v9577_v17 }
 0x55e   : > { %v4612_v30 = vmul.f32 %v9580_v5, %v9580_v5  ;;  %v4613_v21 = vmul.f32 %v9585_v26, %v9585_v26  ;;  %v4614_v62 = vmul.f32 %v9590_v10, %v9590_v10  ;;  %v4615_v60 = vmul.f32 %v9595_v18, %v9595_v18 }
 0x55f   : > { %v4640_v45 = vadd.f32 %v4609_v54, %v4608_v13  ;;  %v4616_v8 = vmul.f32 %v9507_v12, %v9507_v12  ;;  %v4617_v22 = vmul.f32 %v9510_v57, %v9510_v57  ;;  %v4618_v48 = vmul.f32 %v9513_v58, %v9513_v58 }
 0x560   : > { %v4619_v0 = vmul.f32 %v9516_v28, %v9516_v28  ;;  %v4620_v46 = vmul.f32 %v9519_v56, %v9519_v56  ;;  %v4621_v20 = vmul.f32 %v9522_v27, %v9522_v27  ;;  %v4622_v35 = vmul.f32 %v9525_v1, %v9525_v1 }
 0x561   : > { %v4641_v38 = vadd.f32 %v4640_v45, %v4610_v51  ;;  %v4623_v55 = vmul.f32 %v9528_v4, %v9528_v4  ;;  %v4624_v47 = vmul.f32 %v9530_v23, %v9530_v23  ;;  %v4625_v13 = vmul.f32 %v9532_v7, %v9532_v7 }
 0x562   : > { %v4626_v51 = vmul.f32 %v9535_v25, %v9535_v25 }
 0x563   : > { %v4642_v15 = vadd.f32 %v4641_v38, %v4611_v29  ;;  %v4627_v29 = vmul.f32 %v9537_v16, %v9537_v16 }
 0x565   : > { %v4643_v43 = vadd.f32 %v4642_v15, %v4612_v30  ;;  %v4628_v30 = vmul.f32 %v9539_v39, %v9539_v39 }
 0x567   : > { %v4644_v14 = vadd.f32 %v4643_v43, %v4613_v21  ;;  %v4629_v21 = vmul.f32 %v9541_v11, %v9541_v11 }
 0x569   : > { %v4645_v61 = vadd.f32 %v4644_v14, %v4614_v62  ;;  %v4630_v62 = vmul.f32 %v9543_v33, %v9543_v33 }
 0x56b   : > { %v4646_v34 = vadd.f32 %v4645_v61, %v4615_v60  ;;  %v4631_v60 = vmul.f32 %v9545_v42, %v9545_v42 }
 0x56d   : > { %v4647_v32 = vadd.f32 %v4646_v34, %v4616_v8  ;;  %v4632_v8 = vmul.f32 %v9547_v9, %v9547_v9 }
 0x56f   : > { %v4648_v37 = vadd.f32 %v4647_v32, %v4617_v22  ;;  %v4633_v22 = vmul.f32 %v9549_v3, %v9549_v3 }
 0x571   : > { %v4649_v50 = vadd.f32 %v4648_v37, %v4618_v48  ;;  %v4634_v48 = vmul.f32 %v9551_v19, %v9551_v19 }
 0x573   : > { %v4650_v6 = vadd.f32 %v4649_v50, %v4619_v0  ;;  %v4635_v0 = vmul.f32 %v9553_v52, %v9553_v52 }
 0x575   : > { %v4651_v63 = vadd.f32 %v4650_v6, %v4620_v46  ;;  %v4636_v46 = vmul.f32 %v9555_v31, %v9555_v31 }
 0x577   : > { %v4652_v40 = vadd.f32 %v4651_v63, %v4621_v20  ;;  %v4637_v20 = vmul.f32 %v9557_v41, %v9557_v41 }
 0x579   : > { %v4653_v49 = vadd.f32 %v4652_v40, %v4622_v35  ;;  %v4638_v35 = vmul.f32 %v9559_v44, %v9559_v44 }
 0x57b   : > { %v4654_v2 = vadd.f32 %v4653_v49, %v4623_v55  ;;  %v4639_v55 = vmul.f32 %v9561_v24, %v9561_v24 }
 0x57d   : > { %v4655_v54 = vadd.f32 %v4654_v2, %v4624_v47 }
 0x57f   : > { %v4656_v45 = vadd.f32 %v4655_v54, %v4625_v13 }
 0x581   : > { %v4657_v38 = vadd.f32 %v4656_v45, %v4626_v51 }
 0x583   : > { %v4658_v15 = vadd.f32 %v4657_v38, %v4627_v29 }
 0x585   : > { %v4659_v43 = vadd.f32 %v4658_v15, %v4628_v30  ;;  %v9652_v15 = vld [vmem:[%s7324_s19] sm:$0xf] }
 0x587   : > { %v4660_v14 = vadd.f32 %v4659_v43, %v4629_v21  ;;  %v9656_v43 = vld [vmem:[%s7324_s19 + $0x4] sm:$0xf]  ;;  %v9777_v21 = vld [vmem:[%s7324_s19 + $0x70] sm:$0xf] }
 0x588   : > { %10207 = vst [vmem:[#allocation22_spill] sm:$0xff] %v9777_v21 }
 0x589   : > { %v4661_v61 = vadd.f32 %v4660_v14, %v4630_v62  ;;  %v9660_v14 = vld [vmem:[%s7324_s19 + $0x78] sm:$0xf]  ;;  %v9773_v62 = vld [vmem:[%s7324_s19 + $0x64] sm:$0xf] }
 0x58a   : > { %10194 = vst [vmem:[#allocation27_spill] sm:$0xff] %v9660_v14  ;;  %10206 = vst [vmem:[#allocation23_spill] sm:$0xff] %v9773_v62 }
 0x58b   : > { %v4662_v34 = vadd.f32 %v4661_v61, %v4631_v60  ;;  %v9664_v61 = vld [vmem:[%s7324_s19 + $0x7c] sm:$0xf]  ;;  %v9736_v60 = vld [vmem:[%s7324_s19 + $0x44] sm:$0xf] }
 0x58c   : > { %10195 = vst [vmem:[#allocation26_spill] sm:$0xff] %v9664_v61  ;;  %10198 = vst [vmem:[#allocation14_spill] sm:$0xff] %v9736_v60  ;;  %v9760_v61 = vld [vmem:[%s7324_s19 + $0x60] sm:$0xf] }
 0x58d   : > { %v4663_v32 = vadd.f32 %v4662_v34, %v4632_v8  ;;  %v9668_v34 = vld [vmem:[%s7324_s19 + $0x8] sm:$0xf]  ;;  %v9716_v8 = vld [vmem:[%s7324_s19 + $0x3c] sm:$0xf]  ;;  %10204 = vst [vmem:[#allocation21_spill] sm:$0xff] %v9760_v61 }
 0x58f   : > { %v4664_v37 = vadd.f32 %v4663_v32, %v4633_v22  ;;  %v9672_v32 = vld [vmem:[%s7324_s19 + $0xc] sm:$0xf]  ;;  %v9752_v22 = vld [vmem:[%s7324_s19 + $0x54] sm:$0xf] }
 0x590   : > { %10202 = vst [vmem:[#allocation16_spill] sm:$0xff] %v9752_v22 }
 0x591   : > { %v4665_v50 = vadd.f32 %v4664_v37, %v4634_v48  ;;  %v9676_v37 = vld [vmem:[%s7324_s19 + $0x18] sm:$0xf]  ;;  %v9766_v48 = vld [vmem:[%s10035_s5] ss:$0 sm:$0xff] }
 0x593   : > { %v4666_v6 = vadd.f32 %v4665_v50, %v4635_v0  ;;  %v9680_v50 = vld [vmem:[%s7324_s19 + $0x10] sm:$0xf]  ;;  %v9788_v0 = vld [vmem:[%s10036_s6] ss:$0 sm:$0xff] }
 0x595   : > { %v4667_v63 = vadd.f32 %v4666_v6, %v4636_v46  ;;  %v9684_v6 = vld [vmem:[%s7324_s19 + $0x1c] sm:$0xf]  ;;  %v6932_v46 = vld [vmem:[%s7324_s19 + $0x74] sm:$0xf] }
 0x596   : > { %v4819_v61 = vunpack.c.l.bf16 %v6932_v46 }
 0x597   : > { %v4668_v40 = vadd.f32 %v4667_v63, %v4637_v20  ;;  %v9688_v63 = vld [vmem:[%s7324_s19 + $0x14] sm:$0xf]  ;;  %v9732_v20 = vld [vmem:[%s7324_s19 + $0x4c] sm:$0xf] }
 0x598   : > { %10197 = vst [vmem:[#allocation28_spill] sm:$0xff] %v9732_v20 }
 0x599   : > { %v4669_v49 = vadd.f32 %v4668_v40, %v4638_v35  ;;  %v9692_v40 = vld [vmem:[%s7324_s19 + $0x28] sm:$0xf] }
 0x59a   : > { %v9756_v35 = vld [vmem:[%s7324_s19 + $0x68] sm:$0xf] }
 0x59b   : > { %v4670_v47 = vadd.f32 %v4669_v49, %v4639_v55  ;;  %v9696_v49 = vld [vmem:[%s7324_s19 + $0x20] sm:$0xf]  ;;  %v9740_v55 = vld [vmem:[%s7324_s19 + $0x58] sm:$0xf]  ;;  %10203 = vst [vmem:[#allocation12_spill] sm:$0xff] %v9756_v35 }
 0x59c   : > { %10199 = vst [vmem:[#allocation18_spill] sm:$0xff] %v9740_v55  ;;  %v9769_v55 = vld [vmem:[%s7324_s19 + $0x6c] sm:$0xf] }
 0x59d   : > { %v4671_v2 = vrot.slane %v4670_v47, 4  ;;  %10205 = vst [vmem:[#allocation17_spill] sm:$0xff] %v9769_v55 }
 0x59f   : > { %v4672_v13 = vadd.f32 %v4671_v2, %v4670_v47  ;;  %v9700_v2 = vld [vmem:[%s7324_s19 + $0x2c] sm:$0xf]  ;;  %v9728_v47 = vld [vmem:[%s7324_s19 + $0x40] sm:$0xf] }
 0x5a1   : > { %v4673_v54 = vrot.slane %v4672_v13, 2 }
 0x5a3   : > { %v4674_v51 = vadd.f32 %v4673_v54, %v4672_v13  ;;  %v9704_v54 = vld [vmem:[%s7324_s19 + $0x24] sm:$0xf]  ;;  %v9720_v13 = vld [vmem:[%s7324_s19 + $0x34] sm:$0xf] }
 0x5a5   : > { %v4675_v45 = vrot.slane %v4674_v51, 1 }
 0x5a7   : > { %v4676_v29 = vadd.f32 %v4675_v45, %v4674_v51  ;;  %v9708_v45 = vld [vmem:[%s7324_s19 + $0x38] sm:$0xf]  ;;  %v9724_v51 = vld [vmem:[%s7324_s19 + $0x48] sm:$0xf] }
 0x5a8   : > { %10196 = vst [vmem:[#allocation15_spill] sm:$0xff] %v9724_v51 }
 0x5a9   : > { %v4677_v38 = vmul.f32 0.00390625, %v4676_v29  ;;  %v9744_v29 = vld [vmem:[%s7324_s19 + $0x50] sm:$0xf] }
 0x5aa   : > { %10200 = vst [vmem:[#allocation29_spill] sm:$0xff] %v9744_v29 }
 0x5ab   : > { %v4678_v30 = vadd.f32 1e-05, %v4677_v38  ;;  %v9712_v38 = vld [vmem:[%s7324_s19 + $0x30] sm:$0xf] }
 0x5ad   : > { %6897 = vrsqrt.f32 %v4678_v30  ;;  %v9748_v30 = vld [vmem:[%s7324_s19 + $0x5c] sm:$0xf] }
 0x5ae   : > { %10201 = vst [vmem:[#allocation30_spill] sm:$0xff] %v9748_v30 }
 0x5b7   : > { %v6898_v14 = vpop.eup %6897 }
 0x5b8   : > { %v4709_v22 = vmul.f32 %v6898_v14, %v9557_v41  ;;  %v4680_v29 = vmul.f32 %v6898_v14, %v9564_v59  ;;  %v4681_v20 = vmul.f32 %v6898_v14, %v9567_v53  ;;  %v4682_v51 = vmul.f32 %v6898_v14, %v9570_v36 }
 0x5b9   : > { %v4683_v30 = vmul.f32 %v6898_v14, %v9577_v17  ;;  %v4684_v55 = vmul.f32 %v6898_v14, %v9580_v5  ;;  %v4685_v35 = vmul.f32 %v6898_v14, %v9585_v26  ;;  %v4686_v46 = vmul.f32 %v6898_v14, %v9590_v10 }
 0x5ba   : > { %v4748_v41 = vmul.f32 %v9766_v48, %v4709_v22  ;;  %v4687_v59 = vmul.f32 %v6898_v14, %v9595_v18  ;;  %v4688_v53 = vmul.f32 %v6898_v14, %v9507_v12  ;;  %v4689_v36 = vmul.f32 %v6898_v14, %v9510_v57 }
 0x5bb   : > { %v4690_v21 = vmul.f32 %v6898_v14, %v9513_v58  ;;  %v4691_v62 = vmul.f32 %v6898_v14, %v9516_v28  ;;  %v4692_v17 = vmul.f32 %v6898_v14, %v9519_v56  ;;  %v4693_v5 = vmul.f32 %v6898_v14, %v9522_v27 }
 0x5bc   : > { %v4787_v26 = vadd.f32 %v9788_v0, %v4748_v41  ;;  %v4694_v10 = vmul.f32 %v6898_v14, %v9525_v1  ;;  %v4695_v22 = vmul.f32 %v6898_v14, %v9528_v4  ;;  %v4696_v18 = vmul.f32 %v6898_v14, %v9530_v23 }
 0x5bd   : > { %v4697_v12 = vmul.f32 %v6898_v14, %v9532_v7  ;;  %v4698_v57 = vmul.f32 %v6898_v14, %v9535_v25  ;;  %v4699_v58 = vmul.f32 %v6898_v14, %v9537_v16  ;;  %v4700_v28 = vmul.f32 %v6898_v14, %v9539_v39 }
 0x5be   : > { %v4851_v60 = vadd.f32 %v4819_v61, %v4787_v26  ;;  %v4701_v56 = vmul.f32 %v6898_v14, %v9541_v11  ;;  %v4702_v27 = vmul.f32 %v6898_v14, %v9543_v33  ;;  %v4703_v41 = vmul.f32 %v6898_v14, %v9545_v42 }
 0x5bf   : > { %v4704_v1 = vmul.f32 %v6898_v14, %v9547_v9  ;;  %v4705_v4 = vmul.f32 %v6898_v14, %v9549_v3  ;;  %v4706_v23 = vmul.f32 %v6898_v14, %v9551_v19  ;;  %v4707_v7 = vmul.f32 %v6898_v14, %v9553_v52 }
 0x5c0   : > { %4883 = vst [vmem:[%s9818_s23 + $0xe8] sm:$0xff] %v4851_v60  ;;  %v4708_v25 = vmul.f32 %v6898_v14, %v9555_v31  ;;  %v4710_v16 = vmul.f32 %v6898_v14, %v9559_v44  ;;  %v4711_v39 = vmul.f32 %v6898_v14, %v9561_v24  ;;  %v4719_v11 = vmul.f32 %v9766_v48, %v4680_v29 }
 0x5c1   : > { %v4720_v33 = vmul.f32 %v9766_v48, %v4681_v20  ;;  %v4721_v42 = vmul.f32 %v9766_v48, %v4682_v51  ;;  %v4722_v9 = vmul.f32 %v9766_v48, %v4683_v30  ;;  %v4723_v3 = vmul.f32 %v9766_v48, %v4684_v55 }
 0x5c2   : > { %v4724_v19 = vmul.f32 %v9766_v48, %v4685_v35  ;;  %v4725_v52 = vmul.f32 %v9766_v48, %v4686_v46  ;;  %v4726_v31 = vmul.f32 %v9766_v48, %v4687_v59  ;;  %v4727_v44 = vmul.f32 %v9766_v48, %v4688_v53 }
 0x5c3   : > { %v4728_v24 = vmul.f32 %v9766_v48, %v4689_v36  ;;  %v4729_v14 = vmul.f32 %v9766_v48, %v4690_v21  ;;  %v4730_v60 = vmul.f32 %v9766_v48, %v4691_v62  ;;  %v4731_v61 = vmul.f32 %v9766_v48, %v4692_v17 }
 0x5c4   : > { %v4732_v20 = vmul.f32 %v9766_v48, %v4693_v5  ;;  %v4733_v55 = vmul.f32 %v9766_v48, %v4694_v10  ;;  %v4734_v35 = vmul.f32 %v9766_v48, %v4695_v22  ;;  %v4735_v51 = vmul.f32 %v9766_v48, %v4696_v18 }
 0x5c5   : > { %v4736_v29 = vmul.f32 %v9766_v48, %v4697_v12  ;;  %v4737_v30 = vmul.f32 %v9766_v48, %v4698_v57  ;;  %v4738_v46 = vmul.f32 %v9766_v48, %v4699_v58  ;;  %v4739_v21 = vmul.f32 %v9766_v48, %v4700_v28 }
 0x5c6   : > { %v4740_v62 = vmul.f32 %v9766_v48, %v4701_v56  ;;  %v4741_v59 = vmul.f32 %v9766_v48, %v4702_v27  ;;  %v4742_v53 = vmul.f32 %v9766_v48, %v4703_v41  ;;  %v4743_v36 = vmul.f32 %v9766_v48, %v4704_v1 }
 0x5c7   : > { %v4744_v17 = vmul.f32 %v9766_v48, %v4705_v4  ;;  %v4745_v5 = vmul.f32 %v9766_v48, %v4706_v23  ;;  %v4746_v26 = vmul.f32 %v9766_v48, %v4707_v7  ;;  %v4747_v10 = vmul.f32 %v9766_v48, %v4708_v25 }
 0x5c8   : > { %v4749_v22 = vmul.f32 %v9766_v48, %v4710_v16  ;;  %v4750_v18 = vmul.f32 %v9766_v48, %v4711_v39  ;;  %v4758_v12 = vadd.f32 %v9788_v0, %v4719_v11  ;;  %v4759_v57 = vadd.f32 %v9788_v0, %v4720_v33 }
 0x5c9   : > { %v4760_v58 = vadd.f32 %v9788_v0, %v4721_v42  ;;  %v4761_v28 = vadd.f32 %v9788_v0, %v4722_v9  ;;  %v4762_v56 = vadd.f32 %v9788_v0, %v4723_v3  ;;  %v4763_v27 = vadd.f32 %v9788_v0, %v4724_v19 }
 0x5ca   : > { %v4764_v41 = vadd.f32 %v9788_v0, %v4725_v52  ;;  %v4765_v1 = vadd.f32 %v9788_v0, %v4726_v31  ;;  %v4766_v4 = vadd.f32 %v9788_v0, %v4727_v44  ;;  %v4767_v48 = vadd.f32 %v9788_v0, %v4728_v24 }
 0x5cb   : > { %v4768_v23 = vadd.f32 %v9788_v0, %v4729_v14  ;;  %v4769_v7 = vadd.f32 %v9788_v0, %v4730_v60  ;;  %v4770_v25 = vadd.f32 %v9788_v0, %v4731_v61  ;;  %v4771_v16 = vadd.f32 %v9788_v0, %v4732_v20 }
 0x5cc   : > { %v4772_v39 = vadd.f32 %v9788_v0, %v4733_v55  ;;  %v4773_v11 = vadd.f32 %v9788_v0, %v4734_v35  ;;  %v4774_v33 = vadd.f32 %v9788_v0, %v4735_v51  ;;  %v4775_v42 = vadd.f32 %v9788_v0, %v4736_v29 }
 0x5cd   : > { %v4776_v9 = vadd.f32 %v9788_v0, %v4737_v30  ;;  %v4777_v3 = vadd.f32 %v9788_v0, %v4738_v46  ;;  %v4778_v19 = vadd.f32 %v9788_v0, %v4739_v21  ;;  %v4779_v52 = vadd.f32 %v9788_v0, %v4740_v62 }
 0x5ce   : > { %v4780_v31 = vadd.f32 %v9788_v0, %v4741_v59  ;;  %v4781_v44 = vadd.f32 %v9788_v0, %v4742_v53  ;;  %v4782_v24 = vadd.f32 %v9788_v0, %v4743_v36  ;;  %v4783_v14 = vadd.f32 %v9788_v0, %v4744_v17 }
 0x5cf   : > { %v4784_v60 = vadd.f32 %v9788_v0, %v4745_v5  ;;  %v4785_v61 = vadd.f32 %v9788_v0, %v4746_v26  ;;  %v4786_v20 = vadd.f32 %v9788_v0, %v4747_v10  ;;  %v4788_v55 = vadd.f32 %v9788_v0, %v4749_v22 }
 0x5d0   : > { %v4789_v35 = vadd.f32 %v9788_v0, %v4750_v18  ;;  %v10208_v51 = vunpack.c.l.bf16 %v9652_v15  ;;  %v10209_v30 = vunpack.c.l.bf16 %v9656_v43  ;;  %v10210_v21 = vunpack.c.l.bf16 %v9668_v34 }
 0x5d1   : > { %v10211_v59 = vunpack.c.l.bf16 %v9672_v32  ;;  %v10212_v36 = vunpack.c.l.bf16 %v9680_v50  ;;  %v10213_v5 = vunpack.c.l.bf16 %v9688_v63  ;;  %v10214_v15 = vunpack.c.l.bf16 %v9676_v37 }
 0x5d2   : > { %v4822_v29 = vadd.f32 %v10208_v51, %v4758_v12  ;;  %v4823_v46 = vadd.f32 %v10209_v30, %v4759_v57  ;;  %v4824_v62 = vadd.f32 %v10210_v21, %v4760_v58  ;;  %v10215_v26 = vunpack.c.l.bf16 %v9684_v6  ;;  %v10237_v51 = vld [vmem:[#allocation30_spill] sm:$0xff] }
 0x5d3   : > { %v4825_v53 = vadd.f32 %v10211_v59, %v4761_v28  ;;  %v4826_v17 = vadd.f32 %v10212_v36, %v4762_v56  ;;  %v4827_v0 = vadd.f32 %v10213_v5, %v4763_v27  ;;  %v4828_v43 = vadd.f32 %v10214_v15, %v4764_v41  ;;  %v10225_v56 = vld [vmem:[#allocation14_spill] sm:$0xff]  ;;  %v10227_v41 = vld [vmem:[#allocation15_spill] sm:$0xff]  ;;  %v10243_v59 = vld [vmem:[#allocation12_spill] sm:$0xff] }
 0x5d4   : > { %v4829_v34 = vadd.f32 %v10215_v26, %v4765_v1  ;;  %v10216_v32 = vunpack.c.l.bf16 %v9696_v49  ;;  %v10217_v50 = vunpack.c.l.bf16 %v9704_v54  ;;  %v10218_v18 = vunpack.c.l.bf16 %v9692_v40  ;;  %4854 = vst [vmem:[%s9818_s23] sm:$0xff] %v4822_v29  ;;  %4855 = vst [vmem:[%s9818_s23 + $0x8] sm:$0xff] %v4823_v46  ;;  %v10239_v46 = vld [vmem:[#allocation21_spill] sm:$0xff]  ;;  %v10249_v5 = vld [vmem:[#allocation27_spill] sm:$0xff] }
 0x5d5   : > { %4856 = vst [vmem:[%s9818_s23 + $0x10] sm:$0xff] %v4824_v62  ;;  %v10219_v37 = vunpack.c.l.bf16 %v9700_v2  ;;  %v10220_v12 = vunpack.c.l.bf16 %v9712_v38  ;;  %v10221_v57 = vunpack.c.l.bf16 %v9720_v13  ;;  %v10222_v58 = vunpack.c.l.bf16 %v9708_v45  ;;  %4857 = vst [vmem:[%s9818_s23 + $0x18] sm:$0xff] %v4825_v53 }
 0x5d6   : > { %v4830_v10 = vadd.f32 %v10216_v32, %v4766_v4  ;;  %v4831_v22 = vadd.f32 %v10217_v50, %v4767_v48  ;;  %v4832_v63 = vadd.f32 %v10218_v18, %v4768_v23  ;;  %4858 = vst [vmem:[%s9818_s23 + $0x20] sm:$0xff] %v4826_v17  ;;  %4859 = vst [vmem:[%s9818_s23 + $0x28] sm:$0xff] %v4827_v0  ;;  %v10223_v2 = vunpack.c.l.bf16 %v9716_v8  ;;  %v10229_v48 = vld [vmem:[#allocation28_spill] sm:$0xff] }
 0x5d7   : > { %v4833_v6 = vadd.f32 %v10219_v37, %v4769_v7  ;;  %v4834_v49 = vadd.f32 %v10220_v12, %v4770_v25  ;;  %v4835_v54 = vadd.f32 %v10221_v57, %v4771_v16  ;;  %v4836_v40 = vadd.f32 %v10222_v58, %v4772_v39  ;;  %4860 = vst [vmem:[%s9818_s23 + $0x30] sm:$0xff] %v4828_v43  ;;  %v10231_v7 = vld [vmem:[#allocation29_spill] sm:$0xff]  ;;  %v10233_v16 = vld [vmem:[#allocation16_spill] sm:$0xff]  ;;  %v10251_v43 = vld [vmem:[#allocation26_spill] sm:$0xff] }
 0x5d8   : > { %v4837_v38 = vadd.f32 %v10223_v2, %v4773_v11  ;;  %v10224_v13 = vunpack.c.l.bf16 %v9728_v47  ;;  %v10226_v27 = vunpack.c.l.bf16 %v10225_v56  ;;  %v10228_v1 = vunpack.c.l.bf16 %v10227_v41  ;;  %4861 = vst [vmem:[%s9818_s23 + $0x38] sm:$0xff] %v4829_v34  ;;  %4862 = vst [vmem:[%s9818_s23 + $0x40] sm:$0xff] %v4830_v10 }
 0x5d9   : > { %4863 = vst [vmem:[%s9818_s23 + $0x48] sm:$0xff] %v4831_v22  ;;  %4864 = vst [vmem:[%s9818_s23 + $0x50] sm:$0xff] %v4832_v63  ;;  %v10230_v8 = vunpack.c.l.bf16 %v10229_v48  ;;  %v10232_v47 = vunpack.c.l.bf16 %v10231_v7  ;;  %v10234_v39 = vunpack.c.l.bf16 %v10233_v16  ;;  %v10238_v29 = vunpack.c.l.bf16 %v10237_v51 }
 0x5da   : > { %v4838_v28 = vadd.f32 %v10224_v13, %v4774_v33  ;;  %v4839_v45 = vadd.f32 %v10226_v27, %v4775_v42  ;;  %v4840_v4 = vadd.f32 %v10228_v1, %v4776_v9  ;;  %v10235_v33 = vld [vmem:[#allocation18_spill] sm:$0xff]  ;;  %4865 = vst [vmem:[%s9818_s23 + $0x58] sm:$0xff] %v4833_v6  ;;  %4866 = vst [vmem:[%s9818_s23 + $0x60] sm:$0xff] %v4834_v49  ;;  %v10244_v53 = vunpack.c.l.bf16 %v10243_v59 }
 0x5db   : > { %v4841_v23 = vadd.f32 %v10230_v8, %v4777_v3  ;;  %v4842_v25 = vadd.f32 %v10232_v47, %v4778_v19  ;;  %v4843_v11 = vadd.f32 %v10234_v39, %v4779_v52  ;;  %v10236_v42 = vunpack.c.l.bf16 %v10235_v33  ;;  %4867 = vst [vmem:[%s9818_s23 + $0x68] sm:$0xff] %v4835_v54  ;;  %4868 = vst [vmem:[%s9818_s23 + $0x70] sm:$0xff] %v4836_v40  ;;  %v10241_v19 = vld [vmem:[#allocation23_spill] sm:$0xff] }
 0x5dc   : > { %v4845_v30 = vadd.f32 %v10238_v29, %v4781_v44  ;;  %v10240_v3 = vunpack.c.l.bf16 %v10239_v46  ;;  %v10242_v62 = vunpack.c.l.bf16 %v10241_v19  ;;  %4869 = vst [vmem:[%s9818_s23 + $0x78] sm:$0xff] %v4837_v38  ;;  %4870 = vst [vmem:[%s9818_s23 + $0x80] sm:$0xff] %v4838_v28  ;;  %v10245_v44 = vld [vmem:[#allocation17_spill] sm:$0xff]  ;;  %v10250_v0 = vunpack.c.l.bf16 %v10249_v5 }
 0x5dd   : > { %v4844_v9 = vadd.f32 %v10236_v42, %v4780_v31  ;;  %v4848_v31 = vadd.f32 %v10244_v53, %v4784_v60  ;;  %4871 = vst [vmem:[%s9818_s23 + $0x88] sm:$0xff] %v4839_v45  ;;  %4872 = vst [vmem:[%s9818_s23 + $0x90] sm:$0xff] %v4840_v4  ;;  %v10247_v60 = vld [vmem:[#allocation22_spill] sm:$0xff]  ;;  %v10252_v26 = vunpack.c.l.bf16 %v10251_v43 }
 0x5de   : > { %v4846_v21 = vadd.f32 %v10240_v3, %v4782_v24  ;;  %v4847_v52 = vadd.f32 %v10242_v62, %v4783_v14  ;;  %v10246_v24 = vunpack.c.l.bf16 %v10245_v44  ;;  %v10248_v36 = vunpack.c.l.bf16 %v10247_v60  ;;  %4873 = vst [vmem:[%s9818_s23 + $0x98] sm:$0xff] %v4841_v23  ;;  %4874 = vst [vmem:[%s9818_s23 + $0xa0] sm:$0xff] %v4842_v25 }
 0x5df   : > { %v4852_v15 = vadd.f32 %v10250_v0, %v4788_v55  ;;  %v4853_v34 = vadd.f32 %v10252_v26, %v4789_v35  ;;  %4875 = vst [vmem:[%s9818_s23 + $0xa8] sm:$0xff] %v4843_v11  ;;  %4876 = vst [vmem:[%s9818_s23 + $0xb0] sm:$0xff] %v4844_v9 }
 0x5e0   : > { %v4849_v14 = vadd.f32 %v10246_v24, %v4785_v61  ;;  %v4850_v17 = vadd.f32 %v10248_v36, %v4786_v20  ;;  %4877 = vst [vmem:[%s9818_s23 + $0xb8] sm:$0xff] %v4845_v30  ;;  %4878 = vst [vmem:[%s9818_s23 + $0xc0] sm:$0xff] %v4846_v21 }
 0x5e1   : > { %4879 = vst [vmem:[%s9818_s23 + $0xc8] sm:$0xff] %v4847_v52  ;;  %4880 = vst [vmem:[%s9818_s23 + $0xd0] sm:$0xff] %v4848_v31 }
 0x5e2   : > { %4881 = vst [vmem:[%s9818_s23 + $0xd8] sm:$0xff] %v4849_v14  ;;  %4882 = vst [vmem:[%s9818_s23 + $0xe0] sm:$0xff] %v4850_v17 }
 0x5e3   : > { %4884 = vst [vmem:[%s9818_s23 + $0xf0] sm:$0xff] %v4852_v15  ;;  %4885 = vst [vmem:[%s9818_s23 + $0xf8] sm:$0xff] %v4853_v34 }
 0x5e4   : > { %7032 = shalt.err (!%p7029_p1)
}
 0x5e5   : > { %s7033_s15 = scalar_lea.hbm %s9964_s30, 4096  ;;  %s7037_s23 = scalar_lea.hbm %s10037_s7, 8192 }
 0x5e6   : > { %p7034_p13 = scmp.ne.s32.totalorder %s9964_s30, %s7033_s15  ;;  %p7038_p4 = scmp.lt.u32.totalorder %s9964_s30, %s10037_s7 }
 0x5e7   : > { %p7039_p5 = scmp.lt.u32.totalorder %s7037_s23, %s7033_s15  ;;  %p7041_p11 = scmp.lt.u32.totalorder %s7033_s15, %s9964_s30 }
 0x5e8   : > { %p7035_p6 = pnand %p7034_p13, %p10253_p0 }
 0x5e9   : > { %p7040_p8 = por %p7039_p5, %p7038_p4 }
 0x5ea   : > { %p7036_p10 = pneg %p7035_p6 }
 0x5eb   : > { %p7042_p2 = por %p7041_p11, %p7040_p8 }
 0x5ed   : > { %p7043_p3 = pnand %p7042_p2, %p7036_p10 }
 0x5ef   : > { %7046 = shalt.err (!%p7043_p3)
}
 0x5f0   : > { %s7097_s19 = smov 128   ;;  %s7098_s29 = smov 8  }
 0x5f1   : > { %6642 = dma.vmem_to_hbm [thread:$0]  (%p10253_p0), %s9966_s18, 4096, %s9964_s30, %s4887_s9, %s7097_s19, %s7097_s19, %s7098_s29  }
 0x5f2 PF: > { %s4915_s11 = sand.u32 1, %s7077_s24   ;;  %p10254_p7 = scmp.ne.s32.totalorder %s10091_s8, 0 }
 0x5f3   : > { %p10255_p9 = scmp.ge.s32.totalorder %s7089_s27, 2  ;;  %s4916_s10 = scalar_lea.sflag [#allocation4], %s4915_s11 }
 0x5f5   : > { %p6656_p12 = pnand %p10255_p9, %p10254_p7 }
 0x5f7   : > { %7072 = dma.done.wait (!%p6656_p12), %s4916_s10, 4096  }
 0x5f8   : > { %7074 = vsyncadd (!%p6656_p12), %s4916_s10, 4294963200  ;;  %p21_p1 = scmp.ge.s32.totalorder %s7255_s12, 4   ;;  %s10256_s24 = smov %s7081_s25 }
 0x5f9   : > { %s10257_s25 = smov %s7085_s26  ;;  %s10258_s26 = smov %s7271_s17 }
 0x5fa   : > { %s10259_s27 = smov %s7255_s12  ;;  %23 = sbr.rel (!%p21_p1) target bundleno = 6 (0x6), region = 105 }
 0x601   :  { %4921 = vsyncpa [#allocation3], 1 }
 0x602   :  { %4923 = vsyncpa [#allocation3 + $0x1], 1 }
 0x603   :  { %4924 = vsyncpa [#allocation6], 1 }
 0x604   :  { %4925 = vsyncpa [#allocation4], 1 }
 0x605   :  { %4927 = vsyncpa [#allocation4 + $0x1], 1 }

</bundles_post_ra>
